<compile_context>
chip_gen: v6e
topology: v6e:2x2x1
jax: 0.10.0
libtpu: 0.0.40
codegen_flags: <defaults>
</compile_context>

<pallas_src>
import jax
import jax.numpy as jnp
from jax import lax
from jax.experimental import pallas as pl
from jax.experimental.pallas import tpu as pltpu

EPS = 1e-5
SLOPE = 0.2


def _round_up(x, m):
    return ((x + m - 1) // m) * m


# -----------------------------------------------------------------------------
# Hardware-derived budgets + optional-feature probe
# -----------------------------------------------------------------------------
_VMEM_LIMIT = None        # vmem_limit_bytes handed to Mosaic
_PIPE_BUDGET = None       # bytes the software pipeline may occupy
_WEIGHT_PIPE_KW = None    # {"pipeline_mode": pl.Buffered(1)} if supported


def _budgets():
    """Per-generation VMEM budget (128 MiB on v5e/v6e, 64 MiB per core on v7x)."""
    global _VMEM_LIMIT, _PIPE_BUDGET
    if _VMEM_LIMIT is None:
        try:
            cap = int(pltpu.get_tpu_info().vmem_capacity_bytes)
        except Exception:
            cap = 64 * 1024 * 1024            # conservative (v7x per-core size)
        _VMEM_LIMIT = min(int(cap * 0.75), 100 * 1024 * 1024)
        _PIPE_BUDGET = int(_VMEM_LIMIT * 0.6)
    return _VMEM_LIMIT, _PIPE_BUDGET


def _detect_features():
    """Eagerly (outside jit) probe whether single-buffered weight blocks work."""
    global _WEIGHT_PIPE_KW
    if _WEIGHT_PIPE_KW is not None:
        return
    try:
        def probe(x_ref, o_ref):
            o_ref[...] = x_ref[...] + 1.0

        f = pl.pallas_call(
            probe,
            out_shape=jax.ShapeDtypeStruct((8, 128), jnp.float32),
            grid=(2,),
            in_specs=[pl.BlockSpec((8, 128), lambda i: (0, 0),
                                   pipeline_mode=pl.Buffered(1))],
            out_specs=pl.BlockSpec((8, 128), lambda i: (0, 0)),
        )
        jax.block_until_ready(f(jnp.zeros((8, 128), jnp.float32)))
        _WEIGHT_PIPE_KW = {"pipeline_mode": pl.Buffered(1)}
    except Exception:
        _WEIGHT_PIPE_KW = {}


def _wkw():
    return _WEIGHT_PIPE_KW or {}


def _pick_tile(rows, per_row, fixed, budget, min_tile=16):
    """Largest 16-multiple row tile whose pipeline footprint fits the budget."""
    min_tile = _round_up(max(min_tile, 16), 16)
    t = max(budget - fixed, per_row) // max(per_row, 1)
    half = _round_up(max((rows + 1) // 2, 16), 16)   # per-TensorCore share
    t = min(t, half)
    t = max((t // 16) * 16, min_tile)
    return int(t)


# -----------------------------------------------------------------------------
# Pallas kernels
# -----------------------------------------------------------------------------
def _matmul_stats_kernel(p_ref, w_ref, y_ref, stats_ref):
    """y = P @ W on the MXU (bf16 in, f32 acc); accumulate per-channel stats."""
    y = jnp.dot(p_ref[...], w_ref[...], preferred_element_type=jnp.float32)
    y_ref[...] = y.astype(y_ref.dtype)

    @pl.when(pl.program_id(1) == 0)
    def _():
        stats_ref[...] = jnp.zeros_like(stats_ref)

    # single combined RMW store: row 0 = sum(y), row 1 = sum(y^2).  Padded rows
    # come from all-zero patches and contribute nothing.
    upd = jnp.concatenate([jnp.sum(y, axis=0, keepdims=True),
                           jnp.sum(y * y, axis=0, keepdims=True)], axis=0)
    stats_ref[0:2, :] = stats_ref[0:2, :] + upd


def _make_conv3x3_kernel(tile, halo_pad, wp, cin_pad, cout_pad):
    """3x3/s1/p1 conv as 9 shifted MXU matmuls over the flattened, spatially
    padded activation; per-channel stats are masked to valid output rows."""
    shifts = [kh * wp + kw for kh in range(3) for kw in range(3)]

    def kernel(a_ref, b_ref, w_ref, m_ref, y_ref, stats_ref):
        # rows any tap needs = current tile + first halo_pad rows of the next tile
        window = jnp.concatenate([a_ref[...], b_ref[0:halo_pad, :]], axis=0)
        acc = jnp.zeros((tile, cout_pad), jnp.float32)
        for t, sh in enumerate(shifts):
            acc = acc + jnp.dot(window[sh:sh + tile, :],
                                w_ref[t * cin_pad:(t + 1) * cin_pad, :],
                                preferred_element_type=jnp.float32)
        y_ref[...] = acc.astype(y_ref.dtype)

        @pl.when(pl.program_id(1) == 0)
        def _():
            stats_ref[...] = jnp.zeros_like(stats_ref)

        ym = acc * m_ref[...]          # zero out spatial-padding / tail rows
        upd = jnp.concatenate([jnp.sum(ym, axis=0, keepdims=True),
                               jnp.sum(ym * ym, axis=0, keepdims=True)], axis=0)
        stats_ref[0:2, :] = stats_ref[0:2, :] + upd

    return kernel


def _affine_lrelu_kernel(y_ref, s_ref, t_ref, o_ref):
    z = y_ref[...].astype(jnp.float32) * s_ref[...] + t_ref[...]
    o_ref[...] = jnp.where(z >= 0, z, SLOPE * z).astype(o_ref.dtype)


def _affine_lrelu_add_kernel(y_ref, s_ref, t_ref, r_ref, o_ref):
    z = y_ref[...].astype(jnp.float32) * s_ref[...] + t_ref[...]
    o_ref[...] = (jnp.where(z >= 0, z, SLOPE * z)
                  + r_ref[...].astype(jnp.float32)).astype(o_ref.dtype)


# -----------------------------------------------------------------------------
# Kernel wrappers
# -----------------------------------------------------------------------------
def _matmul_stats(p, w2d):
    """p: (R, K) bf16 patch/pixel matrix; w2d: (K, C) f32.
    Returns (y bf16 (R_pad, C_pad), stats f32 (2, C_pad), tile)."""
    vmem_limit, pipe_budget = _budgets()
    R, K = p.shape
    C = w2d.shape[1]
    C_pad = _round_up(max(C, 128), 128)
    K_pad = _round_up(max(K, 128), 128)

    # per-row bytes: lhs bf16 x2 bufs + y bf16 x2 bufs + f32 matmul temp
    # + slack for the pass-2 pipeline that reuses this tile size.
    per_row = 4 * K_pad + 4 * C_pad + 4 * C_pad + 24 * C_pad
    w_bufs = 1 if _wkw() else 2
    fixed = w_bufs * K_pad * C_pad * 2 + 2 * 16 * C_pad * 4
    tile = _pick_tile(R, per_row, fixed, pipe_budget)
    R_pad = _round_up(R, 2 * tile)
    n_half = R_pad // (2 * tile)

    p_pad = jnp.pad(p, ((0, R_pad - R), (0, K_pad - K)))
    w = jnp.pad(w2d.astype(jnp.float32),
                ((0, K_pad - K), (0, C_pad - C))).astype(jnp.bfloat16)

    y, stats = pl.pallas_call(
        _matmul_stats_kernel,
        out_shape=(jax.ShapeDtypeStruct((R_pad, C_pad), jnp.bfloat16),
                   jax.ShapeDtypeStruct((16, C_pad), jnp.float32)),
        grid=(2, n_half),
        in_specs=[
            pl.BlockSpec((tile, K_pad), lambda c, i: (c * n_half + i, 0)),
            pl.BlockSpec((K_pad, C_pad), lambda c, i: (0, 0), **_wkw()),
        ],
        out_specs=(
            pl.BlockSpec((tile, C_pad), lambda c, i: (c * n_half + i, 0)),
            pl.BlockSpec((8, C_pad), lambda c, i: (c, 0)),
        ),
        compiler_params=pltpu.CompilerParams(
            dimension_semantics=("parallel", "arbitrary"),
            vmem_limit_bytes=vmem_limit),
    )(p_pad, w)
    return y, stats[0:2] + stats[8:10], tile


def _conv3x3_stats(x_sp, w4d):
    """3x3 / stride 1 / pad 1 conv of x_sp (N, Ho, Wo, Cin_pad) bf16 without
    materializing the 9x im2col; output rows are in 'extended' (padded-spatial)
    layout and invalid rows are masked out of the BN statistics."""
    vmem_limit, pipe_budget = _budgets()
    N, Ho, Wo, Cin_pad = x_sp.shape
    C_out, Cin_real = w4d.shape[0], w4d.shape[1]
    Cout_pad = _round_up(max(C_out, 128), 128)
    Hp, Wp = Ho + 2, Wo + 2
    R = N * Hp * Wp
    halo = 2 * Wp + 2
    halo_pad = _round_up(halo, 16)

    # (c_out, c_in, kh, kw) -> rows (kh, kw, ci zero-padded to Cin_pad), cols c_out
    w = jnp.transpose(w4d.astype(jnp.float32), (2, 3, 1, 0))
    w = jnp.pad(w, ((0, 0), (0, 0), (0, Cin_pad - Cin_real), (0, Cout_pad - C_out)))
    w = w.reshape(9 * Cin_pad, Cout_pad).astype(jnp.bfloat16)

    per_row = (4 * Cin_pad + 4 * Cin_pad + 8        # current + next-tile blocks, mask
               + 4 * Cout_pad + 4 * Cout_pad        # y out bufs + f32 accumulator
               + 2 * Cin_pad + 24 * Cout_pad)       # window copy + pass-2 slack
    w_bufs = 1 if _wkw() else 2
    fixed = w_bufs * 9 * Cin_pad * Cout_pad * 2 + 2 * 16 * Cout_pad * 4
    tile = _pick_tile(R, per_row, fixed, pipe_budget, min_tile=halo_pad)
    R_pad = _round_up(R, 2 * tile)
    n_half = R_pad // (2 * tile)

    # spatial zero-pad (1 px), flatten rows, add one extra all-zero tile so the
    # last tile's "next block" halo fetch stays in bounds.
    x_ext = jnp.pad(x_sp, ((0, 0), (1, 1), (1, 1), (0, 0))).reshape(R, Cin_pad)
    x_ext = jnp.pad(x_ext, ((0, R_pad + tile - R), (0, 0)))
    # 1.0 exactly at flat rows that correspond to a real output position
    msk = jnp.pad(jnp.ones((N, Ho, Wo, 1), jnp.float32),
                  ((0, 0), (0, 2), (0, 2), (0, 0))).reshape(R, 1)
    msk = jnp.pad(msk, ((0, R_pad - R), (0, 0)))

    kernel = _make_conv3x3_kernel(tile, halo_pad, Wp, Cin_pad, Cout_pad)
    y, stats = pl.pallas_call(
        kernel,
        out_shape=(jax.ShapeDtypeStruct((R_pad, Cout_pad), jnp.bfloat16),
                   jax.ShapeDtypeStruct((16, Cout_pad), jnp.float32)),
        grid=(2, n_half),
        in_specs=[
            pl.BlockSpec((tile, Cin_pad), lambda c, i: (c * n_half + i, 0)),
            pl.BlockSpec((tile, Cin_pad), lambda c, i: (c * n_half + i + 1, 0)),
            pl.BlockSpec((9 * Cin_pad, Cout_pad), lambda c, i: (0, 0), **_wkw()),
            pl.BlockSpec((tile, 1), lambda c, i: (c * n_half + i, 0)),
        ],
        out_specs=(
            pl.BlockSpec((tile, Cout_pad), lambda c, i: (c * n_half + i, 0)),
            pl.BlockSpec((8, Cout_pad), lambda c, i: (c, 0)),
        ),
        compiler_params=pltpu.CompilerParams(
            dimension_semantics=("parallel", "arbitrary"),
            vmem_limit_bytes=vmem_limit),
    )(x_ext, x_ext, w, msk)
    return y, stats[0:2] + stats[8:10], tile, (Hp, Wp)


def _affine_lrelu(y, scale, shift, tile, out_dtype, residual=None):
    """Pass 2: z = y*scale + shift; LeakyReLU(0.2) [+ residual, aliased]."""
    vmem_limit, _ = _budgets()
    R_pad, C_pad = y.shape
    grid = (R_pad // tile,)
    row_spec = pl.BlockSpec((tile, C_pad), lambda i: (i, 0))
    ch_spec = pl.BlockSpec((1, C_pad), lambda i: (0, 0))
    params = pltpu.CompilerParams(dimension_semantics=("parallel",),
                                  vmem_limit_bytes=vmem_limit)
    if residual is None:
        return pl.pallas_call(
            _affine_lrelu_kernel,
            out_shape=jax.ShapeDtypeStruct((R_pad, C_pad), out_dtype),
            grid=grid,
            in_specs=[row_spec, ch_spec, ch_spec],
            out_specs=row_spec,
            compiler_params=params,
        )(y, scale, shift)
    return pl.pallas_call(
        _affine_lrelu_add_kernel,
        out_shape=jax.ShapeDtypeStruct((R_pad, C_pad), out_dtype),
        grid=grid,
        in_specs=[row_spec, ch_spec, ch_spec, row_spec],
        out_specs=row_spec,
        input_output_aliases={3: 0},
        compiler_params=params,
    )(y, scale, shift, residual)


def _bn_scale_shift(stats, gamma, beta, count):
    """Training-mode BatchNorm folded into per-channel scale/shift (plain JAX)."""
    C_pad = stats.shape[1]
    C = gamma.shape[0]
    mean = stats[0] / count
    var = jnp.maximum(stats[1] / count - mean * mean, 0.0)
    g = jnp.pad(gamma.astype(jnp.float32), (0, C_pad - C))
    b = jnp.pad(beta.astype(jnp.float32), (0, C_pad - C))
    scale = g * lax.rsqrt(var + EPS)
    shift = b - mean * scale
    return scale.reshape(1, C_pad), shift.reshape(1, C_pad)


# -----------------------------------------------------------------------------
# JAX glue: im2col, weight reshape, row fitting
# -----------------------------------------------------------------------------
def extract_patches(x_nhwc, ksize, stride, pad):
    """im2col in the input dtype (bf16); column order (kh, kw, ci)."""
    N, H, W, C = x_nhwc.shape
    xp = jnp.pad(x_nhwc, ((0, 0), (pad, pad), (pad, pad), (0, 0)))
    Ho = (H + 2 * pad - ksize) // stride + 1
    Wo = (W + 2 * pad - ksize) // stride + 1
    cols = []
    for kh in range(ksize):
        for kw in range(ksize):
            cols.append(xp[:, kh:kh + stride * Ho:stride,
                           kw:kw + stride * Wo:stride, :])
    return jnp.concatenate(cols, axis=-1).reshape(N * Ho * Wo, ksize * ksize * C)


def _w_to_2d(w):
    c_out, c_in, kh, kw = w.shape
    return jnp.transpose(w.astype(jnp.float32), (2, 3, 1, 0)).reshape(kh * kw * c_in, c_out)


def _fit_rows(a, rows):
    if a.shape[0] == rows:
        return a
    if a.shape[0] > rows:
        return a[:rows]
    return jnp.pad(a, ((0, rows - a.shape[0]), (0, 0)))


# -----------------------------------------------------------------------------
# DownSample forward (NCHW in / NCHW out, like PyTorch)
# -----------------------------------------------------------------------------
def downsample_forward(x_nchw, params, use_fused_conv3x3=True):
    w1, w2, w3, g1, b1, g2, b2, g3, b3 = params
    N, C_in, H, W = x_nchw.shape
    C_out = w1.shape[0]
    Ho, Wo = H // 2, W // 2
    M = N * Ho * Wo

    # NHWC + bf16 up front: every im2col / pooled intermediate is built in bf16.
    x = jnp.transpose(x_nchw, (0, 2, 3, 1)).astype(jnp.bfloat16)

    # --- DownSample1: conv 4x4 / s2 / p1 -> BN -> LeakyReLU (kept bf16) ---
    p1 = extract_patches(x, 4, 2, 1)                         # (M, 16*C_in) bf16
    y1, st1, t1 = _matmul_stats(p1, _w_to_2d(w1))
    s1, sh1 = _bn_scale_shift(st1, g1, b1, M)
    x1 = _affine_lrelu(y1, s1, sh1, t1, jnp.bfloat16)        # (M_pad1, C_pad) bf16

    #               conv 3x3 / s1 / p1 -> BN -> LeakyReLU
    C_pad = x1.shape[1]
    x1_sp = x1[:M].reshape(N, Ho, Wo, C_pad)                 # padded channels are 0
    if use_fused_conv3x3:
        y2, st2, t2, (Hp, Wp) = _conv3x3_stats(x1_sp, w2)
        s2, sh2 = _bn_scale_shift(st2, g2, b2, M)
        x1b_ext = _affine_lrelu(y2, s2, sh2, t2, jnp.float32)     # extended rows
        x1b = x1b_ext[:N * Hp * Wp].reshape(N, Hp, Wp, C_pad)[:, :Ho, :Wo, :]
        x1b = x1b.reshape(M, C_pad)
    else:
        # fallback: bf16 im2col (9x materialization) + the same fused matmul path
        p2 = extract_patches(x1_sp[..., :C_out], 3, 1, 1)
        y2, st2, t2 = _matmul_stats(p2, _w_to_2d(w2))
        s2, sh2 = _bn_scale_shift(st2, g2, b2, M)
        x1b = _affine_lrelu(y2, s2, sh2, t2, jnp.float32)[:M]

    # --- DownSample2: avgpool 2x2 -> conv 1x1 -> BN -> LeakyReLU, residual fused ---
    x_pool = x.astype(jnp.float32).reshape(N, Ho, 2, Wo, 2, C_in).mean(axis=(2, 4))
    p3 = x_pool.reshape(M, C_in).astype(jnp.bfloat16)
    y3, st3, t3 = _matmul_stats(p3, _w_to_2d(w3))
    s3, sh3 = _bn_scale_shift(st3, g3, b3, M)
    res = _fit_rows(x1b, y3.shape[0])                        # f32, aliased to output
    out_flat = _affine_lrelu(y3, s3, sh3, t3, jnp.float32, residual=res)

    out = out_flat[:M, :C_out].reshape(N, Ho, Wo, C_out)
    return jnp.transpose(out, (0, 3, 1, 2))                  # NCHW


# -----------------------------------------------------------------------------
# Pure-JAX f32 reference (for correctness check)
# -----------------------------------------------------------------------------
def _conv_ref(x, w, stride, pad):
    return lax.conv_general_dilated(
        x, w, (stride, stride), [(pad, pad), (pad, pad)],
        dimension_numbers=("NCHW", "OIHW", "NCHW"))


def _bn_ref(x, g, b):
    mean = x.mean(axis=(0, 2, 3), keepdims=True)
    var = ((x - mean) ** 2).mean(axis=(0, 2, 3), keepdims=True)
    return (x - mean) / jnp.sqrt(var + EPS) * g.reshape(1, -1, 1, 1) + b.reshape(1, -1, 1, 1)


def downsample_ref(x, params):
    w1, w2, w3, g1, b1, g2, b2, g3, b3 = params
    lrelu = lambda z: jnp.where(z >= 0, z, SLOPE * z)
    x1 = lrelu(_bn_ref(_conv_ref(x, w1, 2, 1), g1, b1))
    x1 = lrelu(_bn_ref(_conv_ref(x1, w2, 1, 1), g2, b2))
    N, C, H, W = x.shape
    xp = x.reshape(N, C, H // 2, 2, W // 2, 2).mean(axis=(3, 5))
    x2 = lrelu(_bn_ref(_conv_ref(xp, w3, 1, 0), g3, b3))
    return x1 + x2


# -----------------------------------------------------------------------------
if __name__ == "__main__":
    _detect_features()   # eager feature probe, must run before jit tracing

    key = jax.random.PRNGKey(0)
    N, C_IN, C_OUT, H, W = 2, 4, 8, 16, 16
    k1, k2, k3, k4 = jax.random.split(key, 4)

    x = jax.random.normal(k1, (N, C_IN, H, W), jnp.float32)
    w1 = jax.random.normal(k2, (C_OUT, C_IN, 4, 4), jnp.float32) * 0.1
    w2 = jax.random.normal(k3, (C_OUT, C_OUT, 3, 3), jnp.float32) * 0.1
    w3 = jax.random.normal(k4, (C_OUT, C_IN, 1, 1), jnp.float32) * 0.1
    # BatchNorm2d default init: weight=1, bias=0 (deterministic).
    g1 = jnp.ones((C_OUT,), jnp.float32); b1 = jnp.zeros((C_OUT,), jnp.float32)
    g2 = jnp.ones((C_OUT,), jnp.float32); b2 = jnp.zeros((C_OUT,), jnp.float32)
    g3 = jnp.ones((C_OUT,), jnp.float32); b3 = jnp.zeros((C_OUT,), jnp.float32)
    params = (w1, w2, w3, g1, b1, g2, b2, g3, b3)

    try:
        fwd = jax.jit(lambda a, p: downsample_forward(a, p, use_fused_conv3x3=True))
        out = jax.block_until_ready(fwd(x, params))
    except Exception:
        # Safety net: fall back to the bf16 im2col formulation of the 3x3 conv
        # if the fused shifted-matmul kernel fails to lower on this toolchain.
        fwd = jax.jit(lambda a, p: downsample_forward(a, p, use_fused_conv3x3=False))
        out = jax.block_until_ready(fwd(x, params))

    ref = downsample_ref(x, params)
    assert out.shape == (N, C_OUT, H // 2, W // 2), out.shape
    # bf16 MXU inputs + bf16 intermediates (f32 accumulation / f32 BN stats)
    # -> slightly looser tolerance vs the f32 reference.
    max_err = float(jnp.abs(out - ref).max())
    assert jnp.allclose(out, ref, atol=6e-2, rtol=5e-2), max_err

    print("KERNEL_OK")
</pallas_src>

<mosaic_0001>
module attributes {stable_mosaic.version = 11 : i64} {
  func.func @probe(%arg0: i32, %arg1: memref<8x128xf32, #tpu.memory_space<vmem>>, %arg2: memref<8x128xf32, #tpu.memory_space<vmem>>) attributes {dimension_semantics = [#tpu.dimension_semantics<arbitrary>], iteration_bounds = array<i64: 2>, scalar_prefetch = 0 : i64, scratch_operands = 0 : i64, tpu.core_type = #tpu.core_type<tc>, window_params = [{pipeline_mode = #tpu.pipeline_mode<synchronous>, transform_indices = @transform_0, window_bounds = array<i64: 8, 128>}, {pipeline_mode = #tpu.pipeline_mode<synchronous>, transform_indices = @transform_1, window_bounds = array<i64: 8, 128>}]} {
    %c0 = arith.constant 0 : index
    %c0_0 = arith.constant 0 : index
    %0 = vector.load %arg1[%c0, %c0_0] : memref<8x128xf32, #tpu.memory_space<vmem>>, vector<8x128xf32>
    %cst = arith.constant 1.000000e+00 : f32
    %1 = vector.broadcast %cst : f32 to vector<8x128xf32>
    %2 = arith.addf %0, %1 : vector<8x128xf32>
    %c0_1 = arith.constant 0 : index
    %c0_2 = arith.constant 0 : index
    %3 = vector.load %arg2[%c0_1, %c0_2] : memref<8x128xf32, #tpu.memory_space<vmem>>, vector<8x128xf32>
    tpu.vector_store %arg2[%c0_1, %c0_2], %2 {strides = array<i32>} : memref<8x128xf32, #tpu.memory_space<vmem>>, vector<8x128xf32>,
    return
  }
  func.func @transform_0(%arg0: i32) -> (i32, i32) {
    %c0_i32 = arith.constant 0 : i32
    %c0_i32_0 = arith.constant 0 : i32
    %c0_i32_1 = arith.constant 0 : i32
    return %c0_i32, %c0_i32_0 : i32, i32
  }
  func.func @transform_1(%arg0: i32) -> (i32, i32) {
    %c0_i32 = arith.constant 0 : i32
    %c0_i32_0 = arith.constant 0 : i32
    %c0_i32_1 = arith.constant 0 : i32
    return %c0_i32, %c0_i32_0 : i32, i32
  }
}

module attributes {stable_mosaic.version = 11 : i64} {
  func.func @_matmul_stats_kernel(%arg0: i32, %arg1: i32, %arg2: memref<64x128xbf16, #tpu.memory_space<vmem>>, %arg3: memref<128x128xbf16, #tpu.memory_space<vmem>>, %arg4: memref<64x128xbf16, #tpu.memory_space<vmem>>, %arg5: memref<8x128xf32, #tpu.memory_space<vmem>>) attributes {dimension_semantics = [#tpu.dimension_semantics<parallel>, #tpu.dimension_semantics<arbitrary>], iteration_bounds = array<i64: 2, 1>, scalar_prefetch = 0 : i64, scratch_operands = 0 : i64, tpu.core_type = #tpu.core_type<tc>, window_params = [{transform_indices = @transform_0, window_bounds = array<i64: 64, 128>}, {pipeline_mode = #tpu.pipeline_mode<synchronous>, transform_indices = @transform_1, window_bounds = array<i64: 128, 128>}, {transform_indices = @transform_2, window_bounds = array<i64: 64, 128>}, {transform_indices = @transform_3, window_bounds = array<i64: 8, 128>}]} {
    %c0 = arith.constant 0 : index
    %c0_0 = arith.constant 0 : index
    %0 = vector.load %arg2[%c0, %c0_0] : memref<64x128xbf16, #tpu.memory_space<vmem>>, vector<64x128xbf16>
    %c0_1 = arith.constant 0 : index
    %c0_2 = arith.constant 0 : index
    %1 = vector.load %arg3[%c0_1, %c0_2] : memref<128x128xbf16, #tpu.memory_space<vmem>>, vector<128x128xbf16>
    %cst = arith.constant dense<0.000000e+00> : vector<64x128xf32>
    %2 = tpu.matmul %0, %1, %cst {dimension_numbers = #tpu.dot_dimension_numbers<[1], [0], [0], [1], [0, 0, 1, 1], [], []>} : vector<64x128xbf16>, vector<128x128xbf16>, vector<64x128xf32> -> vector<64x128xf32>
    %3 = arith.truncf %2 : vector<64x128xf32> to vector<64x128xbf16>
    %c0_3 = arith.constant 0 : index
    %c0_4 = arith.constant 0 : index
    %4 = vector.load %arg4[%c0_3, %c0_4] : memref<64x128xbf16, #tpu.memory_space<vmem>>, vector<64x128xbf16>
    tpu.vector_store %arg4[%c0_3, %c0_4], %3 {strides = array<i32>} : memref<64x128xbf16, #tpu.memory_space<vmem>>, vector<64x128xbf16>,
    %c0_i32 = arith.constant 0 : i32
    %5 = arith.cmpi eq, %arg1, %c0_i32 : i32
    %6 = arith.extui %5 : i1 to i32
    %c0_i32_5 = arith.constant 0 : i32
    %7 = arith.cmpi ne, %6, %c0_i32_5 : i32
    scf.if %7 {
      %cst_12 = arith.constant 0.000000e+00 : f32
      %17 = vector.broadcast %cst_12 : f32 to vector<8x128xf32>
      %c0_13 = arith.constant 0 : index
      %c0_14 = arith.constant 0 : index
      %18 = vector.load %arg5[%c0_13, %c0_14] : memref<8x128xf32, #tpu.memory_space<vmem>>, vector<8x128xf32>
      tpu.vector_store %arg5[%c0_13, %c0_14], %17 {strides = array<i32>} : memref<8x128xf32, #tpu.memory_space<vmem>>, vector<8x128xf32>,
    } else {
    }
    %cst_6 = arith.constant dense<0.000000e+00> : vector<128xf32>
    %8 = vector.multi_reduction <add>, %2, %cst_6 [0] : vector<64x128xf32> to vector<128xf32>
    %9 = vector.shape_cast %8 : vector<128xf32> to vector<1x128xf32>
    %10 = arith.mulf %2, %2 : vector<64x128xf32>
    %cst_7 = arith.constant dense<0.000000e+00> : vector<128xf32>
    %11 = vector.multi_reduction <add>, %10, %cst_7 [0] : vector<64x128xf32> to vector<128xf32>
    %12 = vector.shape_cast %11 : vector<128xf32> to vector<1x128xf32>
    %13 = tpu.concatenate %9, %12 in 0 : vector<1x128xf32>, vector<1x128xf32> -> vector<2x128xf32>
    %c0_8 = arith.constant 0 : index
    %c0_9 = arith.constant 0 : index
    %14 = vector.load %arg5[%c0_8, %c0_9] : memref<8x128xf32, #tpu.memory_space<vmem>>, vector<2x128xf32>
    %15 = arith.addf %14, %13 : vector<2x128xf32>
    %c0_10 = arith.constant 0 : index
    %c0_11 = arith.constant 0 : index
    %16 = vector.load %arg5[%c0_10, %c0_11] : memref<8x128xf32, #tpu.memory_space<vmem>>, vector<2x128xf32>
    tpu.vector_store %arg5[%c0_10, %c0_11], %15 {strides = array<i32>} : memref<8x128xf32, #tpu.memory_space<vmem>>, vector<2x128xf32>,
    return
  }
  func.func @transform_0(%arg0: i32, %arg1: i32) -> (i32, i32) {
    %c1_i32 = arith.constant 1 : i32
    %0 = arith.muli %arg0, %c1_i32 : i32
    %1 = arith.addi %0, %arg1 : i32
    %c0_i32 = arith.constant 0 : i32
    %c0_i32_0 = arith.constant 0 : i32
    return %1, %c0_i32 : i32, i32
  }
  func.func @transform_1(%arg0: i32, %arg1: i32) -> (i32, i32) {
    %c0_i32 = arith.constant 0 : i32
    %c0_i32_0 = arith.constant 0 : i32
    %c0_i32_1 = arith.constant 0 : i32
    return %c0_i32, %c0_i32_0 : i32, i32
  }
  func.func @transform_2(%arg0: i32, %arg1: i32) -> (i32, i32) {
    %c1_i32 = arith.constant 1 : i32
    %0 = arith.muli %arg0, %c1_i32 : i32
    %1 = arith.addi %0, %arg1 : i32
    %c0_i32 = arith.constant 0 : i32
    %c0_i32_0 = arith.constant 0 : i32
    return %1, %c0_i32 : i32, i32
  }
  func.func @transform_3(%arg0: i32, %arg1: i32) -> (i32, i32) {
    %c0_i32 = arith.constant 0 : i32
    %c0_i32_0 = arith.constant 0 : i32
    return %arg0, %c0_i32 : i32, i32
  }
}

module attributes {stable_mosaic.version = 11 : i64} {
  func.func @_affine_lrelu_kernel(%arg0: i32, %arg1: memref<64x128xbf16, #tpu.memory_space<vmem>>, %arg2: memref<1x128xf32, #tpu.memory_space<vmem>>, %arg3: memref<1x128xf32, #tpu.memory_space<vmem>>, %arg4: memref<64x128xbf16, #tpu.memory_space<vmem>>) attributes {dimension_semantics = [#tpu.dimension_semantics<parallel>], iteration_bounds = array<i64: 2>, scalar_prefetch = 0 : i64, scratch_operands = 0 : i64, tpu.core_type = #tpu.core_type<tc>, window_params = [{transform_indices = @transform_0, window_bounds = array<i64: 64, 128>}, {pipeline_mode = #tpu.pipeline_mode<synchronous>, transform_indices = @transform_1, window_bounds = array<i64: 1, 128>}, {pipeline_mode = #tpu.pipeline_mode<synchronous>, transform_indices = @transform_2, window_bounds = array<i64: 1, 128>}, {transform_indices = @transform_3, window_bounds = array<i64: 64, 128>}]} {
    %c0 = arith.constant 0 : index
    %c0_0 = arith.constant 0 : index
    %0 = vector.load %arg1[%c0, %c0_0] : memref<64x128xbf16, #tpu.memory_space<vmem>>, vector<64x128xbf16>
    %1 = arith.extf %0 : vector<64x128xbf16> to vector<64x128xf32>
    %c0_1 = arith.constant 0 : index
    %c0_2 = arith.constant 0 : index
    %2 = vector.load %arg2[%c0_1, %c0_2] : memref<1x128xf32, #tpu.memory_space<vmem>>, vector<1x128xf32>
    %3 = vector.broadcast %2 : vector<1x128xf32> to vector<64x128xf32>
    %4 = arith.mulf %1, %3 : vector<64x128xf32>
    %c0_3 = arith.constant 0 : index
    %c0_4 = arith.constant 0 : index
    %5 = vector.load %arg3[%c0_3, %c0_4] : memref<1x128xf32, #tpu.memory_space<vmem>>, vector<1x128xf32>
    %6 = vector.broadcast %5 : vector<1x128xf32> to vector<64x128xf32>
    %7 = arith.addf %4, %6 : vector<64x128xf32>
    %cst = arith.constant 0.000000e+00 : f32
    %8 = vector.broadcast %cst : f32 to vector<64x128xf32>
    %9 = arith.cmpf oge, %7, %8 : vector<64x128xf32>
    %cst_5 = arith.constant 2.000000e-01 : f32
    %10 = vector.broadcast %cst_5 : f32 to vector<64x128xf32>
    %11 = arith.mulf %10, %7 : vector<64x128xf32>
    %12 = arith.select %9, %7, %11 : vector<64x128xi1>, vector<64x128xf32>
    %13 = arith.truncf %12 : vector<64x128xf32> to vector<64x128xbf16>
    %c0_6 = arith.constant 0 : index
    %c0_7 = arith.constant 0 : index
    %14 = vector.load %arg4[%c0_6, %c0_7] : memref<64x128xbf16, #tpu.memory_space<vmem>>, vector<64x128xbf16>
    tpu.vector_store %arg4[%c0_6, %c0_7], %13 {strides = array<i32>} : memref<64x128xbf16, #tpu.memory_space<vmem>>, vector<64x128xbf16>,
    return
  }
  func.func @transform_0(%arg0: i32) -> (i32, i32) {
    %c0_i32 = arith.constant 0 : i32
    %c0_i32_0 = arith.constant 0 : i32
    return %arg0, %c0_i32 : i32, i32
  }
  func.func @transform_1(%arg0: i32) -> (i32, i32) {
    %c0_i32 = arith.constant 0 : i32
    %c0_i32_0 = arith.constant 0 : i32
    %c0_i32_1 = arith.constant 0 : i32
    return %c0_i32, %c0_i32_0 : i32, i32
  }
  func.func @transform_2(%arg0: i32) -> (i32, i32) {
    %c0_i32 = arith.constant 0 : i32
    %c0_i32_0 = arith.constant 0 : i32
    %c0_i32_1 = arith.constant 0 : i32
    return %c0_i32, %c0_i32_0 : i32, i32
  }
  func.func @transform_3(%arg0: i32) -> (i32, i32) {
    %c0_i32 = arith.constant 0 : i32
    %c0_i32_0 = arith.constant 0 : i32
    return %arg0, %c0_i32 : i32, i32
  }
}

module attributes {stable_mosaic.version = 11 : i64} {
  func.func @kernel(%arg0: i32, %arg1: i32, %arg2: memref<112x128xbf16, #tpu.memory_space<vmem>>, %arg3: memref<112x128xbf16, #tpu.memory_space<vmem>>, %arg4: memref<1152x128xbf16, #tpu.memory_space<vmem>>, %arg5: memref<112x1xf32, #tpu.memory_space<vmem>>, %arg6: memref<112x128xbf16, #tpu.memory_space<vmem>>, %arg7: memref<8x128xf32, #tpu.memory_space<vmem>>) attributes {dimension_semantics = [#tpu.dimension_semantics<parallel>, #tpu.dimension_semantics<arbitrary>], iteration_bounds = array<i64: 2, 1>, scalar_prefetch = 0 : i64, scratch_operands = 0 : i64, tpu.core_type = #tpu.core_type<tc>, window_params = [{transform_indices = @transform_0, window_bounds = array<i64: 112, 128>}, {transform_indices = @transform_1, window_bounds = array<i64: 112, 128>}, {pipeline_mode = #tpu.pipeline_mode<synchronous>, transform_indices = @transform_2, window_bounds = array<i64: 1152, 128>}, {transform_indices = @transform_3, window_bounds = array<i64: 112, 1>}, {transform_indices = @transform_4, window_bounds = array<i64: 112, 128>}, {transform_indices = @transform_5, window_bounds = array<i64: 8, 128>}]} {
    %c0 = arith.constant 0 : index
    %c0_0 = arith.constant 0 : index
    %0 = vector.load %arg2[%c0, %c0_0] : memref<112x128xbf16, #tpu.memory_space<vmem>>, vector<112x128xbf16>
    %c0_1 = arith.constant 0 : index
    %c0_2 = arith.constant 0 : index
    %1 = vector.load %arg3[%c0_1, %c0_2] : memref<112x128xbf16, #tpu.memory_space<vmem>>, vector<32x128xbf16>
    %2 = tpu.concatenate %0, %1 in 0 : vector<112x128xbf16>, vector<32x128xbf16> -> vector<144x128xbf16>
    %cst = arith.constant 0.000000e+00 : f32
    %3 = vector.broadcast %cst : f32 to vector<112x128xf32>
    %4 = vector.extract_strided_slice %2 {offsets = [0, 0], sizes = [112, 128], strides = [1, 1]} : vector<144x128xbf16> to vector<112x128xbf16>
    %c0_3 = arith.constant 0 : index
    %c0_4 = arith.constant 0 : index
    %5 = vector.load %arg4[%c0_3, %c0_4] : memref<1152x128xbf16, #tpu.memory_space<vmem>>, vector<128x128xbf16>
    %cst_5 = arith.constant dense<0.000000e+00> : vector<112x128xf32>
    %6 = tpu.matmul %4, %5, %cst_5 {dimension_numbers = #tpu.dot_dimension_numbers<[1], [0], [0], [1], [0, 0, 1, 1], [], []>} : vector<112x128xbf16>, vector<128x128xbf16>, vector<112x128xf32> -> vector<112x128xf32>
    %7 = arith.addf %3, %6 : vector<112x128xf32>
    %8 = vector.extract_strided_slice %2 {offsets = [1, 0], sizes = [112, 128], strides = [1, 1]} : vector<144x128xbf16> to vector<112x128xbf16>
    %c128 = arith.constant 128 : index
    %c0_6 = arith.constant 0 : index
    %9 = vector.load %arg4[%c128, %c0_6] : memref<1152x128xbf16, #tpu.memory_space<vmem>>, vector<128x128xbf16>
    %cst_7 = arith.constant dense<0.000000e+00> : vector<112x128xf32>
    %10 = tpu.matmul %8, %9, %cst_7 {dimension_numbers = #tpu.dot_dimension_numbers<[1], [0], [0], [1], [0, 0, 1, 1], [], []>} : vector<112x128xbf16>, vector<128x128xbf16>, vector<112x128xf32> -> vector<112x128xf32>
    %11 = arith.addf %7, %10 : vector<112x128xf32>
    %12 = vector.extract_strided_slice %2 {offsets = [2, 0], sizes = [112, 128], strides = [1, 1]} : vector<144x128xbf16> to vector<112x128xbf16>
    %c256 = arith.constant 256 : index
    %c0_8 = arith.constant 0 : index
    %13 = vector.load %arg4[%c256, %c0_8] : memref<1152x128xbf16, #tpu.memory_space<vmem>>, vector<128x128xbf16>
    %cst_9 = arith.constant dense<0.000000e+00> : vector<112x128xf32>
    %14 = tpu.matmul %12, %13, %cst_9 {dimension_numbers = #tpu.dot_dimension_numbers<[1], [0], [0], [1], [0, 0, 1, 1], [], []>} : vector<112x128xbf16>, vector<128x128xbf16>, vector<112x128xf32> -> vector<112x128xf32>
    %15 = arith.addf %11, %14 : vector<112x128xf32>
    %16 = vector.extract_strided_slice %2 {offsets = [10, 0], sizes = [112, 128], strides = [1, 1]} : vector<144x128xbf16> to vector<112x128xbf16>
    %c384 = arith.constant 384 : index
    %c0_10 = arith.constant 0 : index
    %17 = vector.load %arg4[%c384, %c0_10] : memref<1152x128xbf16, #tpu.memory_space<vmem>>, vector<128x128xbf16>
    %cst_11 = arith.constant dense<0.000000e+00> : vector<112x128xf32>
    %18 = tpu.matmul %16, %17, %cst_11 {dimension_numbers = #tpu.dot_dimension_numbers<[1], [0], [0], [1], [0, 0, 1, 1], [], []>} : vector<112x128xbf16>, vector<128x128xbf16>, vector<112x128xf32> -> vector<112x128xf32>
    %19 = arith.addf %15, %18 : vector<112x128xf32>
    %20 = vector.extract_strided_slice %2 {offsets = [11, 0], sizes = [112, 128], strides = [1, 1]} : vector<144x128xbf16> to vector<112x128xbf16>
    %c512 = arith.constant 512 : index
    %c0_12 = arith.constant 0 : index
    %21 = vector.load %arg4[%c512, %c0_12] : memref<1152x128xbf16, #tpu.memory_space<vmem>>, vector<128x128xbf16>
    %cst_13 = arith.constant dense<0.000000e+00> : vector<112x128xf32>
    %22 = tpu.matmul %20, %21, %cst_13 {dimension_numbers = #tpu.dot_dimension_numbers<[1], [0], [0], [1], [0, 0, 1, 1], [], []>} : vector<112x128xbf16>, vector<128x128xbf16>, vector<112x128xf32> -> vector<112x128xf32>
    %23 = arith.addf %19, %22 : vector<112x128xf32>
    %24 = vector.extract_strided_slice %2 {offsets = [12, 0], sizes = [112, 128], strides = [1, 1]} : vector<144x128xbf16> to vector<112x128xbf16>
    %c640 = arith.constant 640 : index
    %c0_14 = arith.constant 0 : index
    %25 = vector.load %arg4[%c640, %c0_14] : memref<1152x128xbf16, #tpu.memory_space<vmem>>, vector<128x128xbf16>
    %cst_15 = arith.constant dense<0.000000e+00> : vector<112x128xf32>
    %26 = tpu.matmul %24, %25, %cst_15 {dimension_numbers = #tpu.dot_dimension_numbers<[1], [0], [0], [1], [0, 0, 1, 1], [], []>} : vector<112x128xbf16>, vector<128x128xbf16>, vector<112x128xf32> -> vector<112x128xf32>
    %27 = arith.addf %23, %26 : vector<112x128xf32>
    %28 = vector.extract_strided_slice %2 {offsets = [20, 0], sizes = [112, 128], strides = [1, 1]} : vector<144x128xbf16> to vector<112x128xbf16>
    %c768 = arith.constant 768 : index
    %c0_16 = arith.constant 0 : index
    %29 = vector.load %arg4[%c768, %c0_16] : memref<1152x128xbf16, #tpu.memory_space<vmem>>, vector<128x128xbf16>
    %cst_17 = arith.constant dense<0.000000e+00> : vector<112x128xf32>
    %30 = tpu.matmul %28, %29, %cst_17 {dimension_numbers = #tpu.dot_dimension_numbers<[1], [0], [0], [1], [0, 0, 1, 1], [], []>} : vector<112x128xbf16>, vector<128x128xbf16>, vector<112x128xf32> -> vector<112x128xf32>
    %31 = arith.addf %27, %30 : vector<112x128xf32>
    %32 = vector.extract_strided_slice %2 {offsets = [21, 0], sizes = [112, 128], strides = [1, 1]} : vector<144x128xbf16> to vector<112x128xbf16>
    %c896 = arith.constant 896 : index
    %c0_18 = arith.constant 0 : index
    %33 = vector.load %arg4[%c896, %c0_18] : memref<1152x128xbf16, #tpu.memory_space<vmem>>, vector<128x128xbf16>
    %cst_19 = arith.constant dense<0.000000e+00> : vector<112x128xf32>
    %34 = tpu.matmul %32, %33, %cst_19 {dimension_numbers = #tpu.dot_dimension_numbers<[1], [0], [0], [1], [0, 0, 1, 1], [], []>} : vector<112x128xbf16>, vector<128x128xbf16>, vector<112x128xf32> -> vector<112x128xf32>
    %35 = arith.addf %31, %34 : vector<112x128xf32>
    %36 = vector.extract_strided_slice %2 {offsets = [22, 0], sizes = [112, 128], strides = [1, 1]} : vector<144x128xbf16> to vector<112x128xbf16>
    %c1024 = arith.constant 1024 : index
    %c0_20 = arith.constant 0 : index
    %37 = vector.load %arg4[%c1024, %c0_20] : memref<1152x128xbf16, #tpu.memory_space<vmem>>, vector<128x128xbf16>
    %cst_21 = arith.constant dense<0.000000e+00> : vector<112x128xf32>
    %38 = tpu.matmul %36, %37, %cst_21 {dimension_numbers = #tpu.dot_dimension_numbers<[1], [0], [0], [1], [0, 0, 1, 1], [], []>} : vector<112x128xbf16>, vector<128x128xbf16>, vector<112x128xf32> -> vector<112x128xf32>
    %39 = arith.addf %35, %38 : vector<112x128xf32>
    %40 = arith.truncf %39 : vector<112x128xf32> to vector<112x128xbf16>
    %c0_22 = arith.constant 0 : index
    %c0_23 = arith.constant 0 : index
    %41 = vector.load %arg6[%c0_22, %c0_23] : memref<112x128xbf16, #tpu.memory_space<vmem>>, vector<112x128xbf16>
    tpu.vector_store %arg6[%c0_22, %c0_23], %40 {strides = array<i32>} : memref<112x128xbf16, #tpu.memory_space<vmem>>, vector<112x128xbf16>,
    %c0_i32 = arith.constant 0 : i32
    %42 = arith.cmpi eq, %arg1, %c0_i32 : i32
    %43 = arith.extui %42 : i1 to i32
    %c0_i32_24 = arith.constant 0 : i32
    %44 = arith.cmpi ne, %43, %c0_i32_24 : i32
    scf.if %44 {
      %cst_33 = arith.constant 0.000000e+00 : f32
      %57 = vector.broadcast %cst_33 : f32 to vector<8x128xf32>
      %c0_34 = arith.constant 0 : index
      %c0_35 = arith.constant 0 : index
      %58 = vector.load %arg7[%c0_34, %c0_35] : memref<8x128xf32, #tpu.memory_space<vmem>>, vector<8x128xf32>
      tpu.vector_store %arg7[%c0_34, %c0_35], %57 {strides = array<i32>} : memref<8x128xf32, #tpu.memory_space<vmem>>, vector<8x128xf32>,
    } else {
    }
    %c0_25 = arith.constant 0 : index
    %c0_26 = arith.constant 0 : index
    %45 = vector.load %arg5[%c0_25, %c0_26] : memref<112x1xf32, #tpu.memory_space<vmem>>, vector<112x1xf32>
    %46 = vector.broadcast %45 : vector<112x1xf32> to vector<112x128xf32>
    %47 = arith.mulf %39, %46 : vector<112x128xf32>
    %cst_27 = arith.constant dense<0.000000e+00> : vector<128xf32>
    %48 = vector.multi_reduction <add>, %47, %cst_27 [0] : vector<112x128xf32> to vector<128xf32>
    %49 = vector.shape_cast %48 : vector<128xf32> to vector<1x128xf32>
    %50 = arith.mulf %47, %47 : vector<112x128xf32>
    %cst_28 = arith.constant dense<0.000000e+00> : vector<128xf32>
    %51 = vector.multi_reduction <add>, %50, %cst_28 [0] : vector<112x128xf32> to vector<128xf32>
    %52 = vector.shape_cast %51 : vector<128xf32> to vector<1x128xf32>
    %53 = tpu.concatenate %49, %52 in 0 : vector<1x128xf32>, vector<1x128xf32> -> vector<2x128xf32>
    %c0_29 = arith.constant 0 : index
    %c0_30 = arith.constant 0 : index
    %54 = vector.load %arg7[%c0_29, %c0_30] : memref<8x128xf32, #tpu.memory_space<vmem>>, vector<2x128xf32>
    %55 = arith.addf %54, %53 : vector<2x128xf32>
    %c0_31 = arith.constant 0 : index
    %c0_32 = arith.constant 0 : index
    %56 = vector.load %arg7[%c0_31, %c0_32] : memref<8x128xf32, #tpu.memory_space<vmem>>, vector<2x128xf32>
    tpu.vector_store %arg7[%c0_31, %c0_32], %55 {strides = array<i32>} : memref<8x128xf32, #tpu.memory_space<vmem>>, vector<2x128xf32>,
    return
  }
  func.func @transform_0(%arg0: i32, %arg1: i32) -> (i32, i32) {
    %c1_i32 = arith.constant 1 : i32
    %0 = arith.muli %arg0, %c1_i32 : i32
    %1 = arith.addi %0, %arg1 : i32
    %c0_i32 = arith.constant 0 : i32
    %c0_i32_0 = arith.constant 0 : i32
    return %1, %c0_i32 : i32, i32
  }
  func.func @transform_1(%arg0: i32, %arg1: i32) -> (i32, i32) {
    %c1_i32 = arith.constant 1 : i32
    %0 = arith.muli %arg0, %c1_i32 : i32
    %1 = arith.addi %0, %arg1 : i32
    %c1_i32_0 = arith.constant 1 : i32
    %2 = arith.addi %1, %c1_i32_0 : i32
    %c0_i32 = arith.constant 0 : i32
    %c0_i32_1 = arith.constant 0 : i32
    return %2, %c0_i32 : i32, i32
  }
  func.func @transform_2(%arg0: i32, %arg1: i32) -> (i32, i32) {
    %c0_i32 = arith.constant 0 : i32
    %c0_i32_0 = arith.constant 0 : i32
    %c0_i32_1 = arith.constant 0 : i32
    return %c0_i32, %c0_i32_0 : i32, i32
  }
  func.func @transform_3(%arg0: i32, %arg1: i32) -> (i32, i32) {
    %c1_i32 = arith.constant 1 : i32
    %0 = arith.muli %arg0, %c1_i32 : i32
    %1 = arith.addi %0, %arg1 : i32
    %c0_i32 = arith.constant 0 : i32
    %c0_i32_0 = arith.constant 0 : i32
    return %1, %c0_i32 : i32, i32
  }
  func.func @transform_4(%arg0: i32, %arg1: i32) -> (i32, i32) {
    %c1_i32 = arith.constant 1 : i32
    %0 = arith.muli %arg0, %c1_i32 : i32
    %1 = arith.addi %0, %arg1 : i32
    %c0_i32 = arith.constant 0 : i32
    %c0_i32_0 = arith.constant 0 : i32
    return %1, %c0_i32 : i32, i32
  }
  func.func @transform_5(%arg0: i32, %arg1: i32) -> (i32, i32) {
    %c0_i32 = arith.constant 0 : i32
    %c0_i32_0 = arith.constant 0 : i32
    return %arg0, %c0_i32 : i32, i32
  }
}

module attributes {stable_mosaic.version = 11 : i64} {
  func.func @_affine_lrelu_kernel(%arg0: i32, %arg1: memref<112x128xbf16, #tpu.memory_space<vmem>>, %arg2: memref<1x128xf32, #tpu.memory_space<vmem>>, %arg3: memref<1x128xf32, #tpu.memory_space<vmem>>, %arg4: memref<112x128xf32, #tpu.memory_space<vmem>>) attributes {dimension_semantics = [#tpu.dimension_semantics<parallel>], iteration_bounds = array<i64: 2>, scalar_prefetch = 0 : i64, scratch_operands = 0 : i64, tpu.core_type = #tpu.core_type<tc>, window_params = [{transform_indices = @transform_0, window_bounds = array<i64: 112, 128>}, {pipeline_mode = #tpu.pipeline_mode<synchronous>, transform_indices = @transform_1, window_bounds = array<i64: 1, 128>}, {pipeline_mode = #tpu.pipeline_mode<synchronous>, transform_indices = @transform_2, window_bounds = array<i64: 1, 128>}, {transform_indices = @transform_3, window_bounds = array<i64: 112, 128>}]} {
    %c0 = arith.constant 0 : index
    %c0_0 = arith.constant 0 : index
    %0 = vector.load %arg1[%c0, %c0_0] : memref<112x128xbf16, #tpu.memory_space<vmem>>, vector<112x128xbf16>
    %1 = arith.extf %0 : vector<112x128xbf16> to vector<112x128xf32>
    %c0_1 = arith.constant 0 : index
    %c0_2 = arith.constant 0 : index
    %2 = vector.load %arg2[%c0_1, %c0_2] : memref<1x128xf32, #tpu.memory_space<vmem>>, vector<1x128xf32>
    %3 = vector.broadcast %2 : vector<1x128xf32> to vector<112x128xf32>
    %4 = arith.mulf %1, %3 : vector<112x128xf32>
    %c0_3 = arith.constant 0 : index
    %c0_4 = arith.constant 0 : index
    %5 = vector.load %arg3[%c0_3, %c0_4] : memref<1x128xf32, #tpu.memory_space<vmem>>, vector<1x128xf32>
    %6 = vector.broadcast %5 : vector<1x128xf32> to vector<112x128xf32>
    %7 = arith.addf %4, %6 : vector<112x128xf32>
    %cst = arith.constant 0.000000e+00 : f32
    %8 = vector.broadcast %cst : f32 to vector<112x128xf32>
    %9 = arith.cmpf oge, %7, %8 : vector<112x128xf32>
    %cst_5 = arith.constant 2.000000e-01 : f32
    %10 = vector.broadcast %cst_5 : f32 to vector<112x128xf32>
    %11 = arith.mulf %10, %7 : vector<112x128xf32>
    %12 = arith.select %9, %7, %11 : vector<112x128xi1>, vector<112x128xf32>
    %c0_6 = arith.constant 0 : index
    %c0_7 = arith.constant 0 : index
    %13 = vector.load %arg4[%c0_6, %c0_7] : memref<112x128xf32, #tpu.memory_space<vmem>>, vector<112x128xf32>
    tpu.vector_store %arg4[%c0_6, %c0_7], %12 {strides = array<i32>} : memref<112x128xf32, #tpu.memory_space<vmem>>, vector<112x128xf32>,
    return
  }
  func.func @transform_0(%arg0: i32) -> (i32, i32) {
    %c0_i32 = arith.constant 0 : i32
    %c0_i32_0 = arith.constant 0 : i32
    return %arg0, %c0_i32 : i32, i32
  }
  func.func @transform_1(%arg0: i32) -> (i32, i32) {
    %c0_i32 = arith.constant 0 : i32
    %c0_i32_0 = arith.constant 0 : i32
    %c0_i32_1 = arith.constant 0 : i32
    return %c0_i32, %c0_i32_0 : i32, i32
  }
  func.func @transform_2(%arg0: i32) -> (i32, i32) {
    %c0_i32 = arith.constant 0 : i32
    %c0_i32_0 = arith.constant 0 : i32
    %c0_i32_1 = arith.constant 0 : i32
    return %c0_i32, %c0_i32_0 : i32, i32
  }
  func.func @transform_3(%arg0: i32) -> (i32, i32) {
    %c0_i32 = arith.constant 0 : i32
    %c0_i32_0 = arith.constant 0 : i32
    return %arg0, %c0_i32 : i32, i32
  }
}

module attributes {stable_mosaic.version = 11 : i64} {
  func.func @_affine_lrelu_add_kernel(%arg0: i32, %arg1: memref<64x128xbf16, #tpu.memory_space<vmem>>, %arg2: memref<1x128xf32, #tpu.memory_space<vmem>>, %arg3: memref<1x128xf32, #tpu.memory_space<vmem>>, %arg4: memref<64x128xf32, #tpu.memory_space<vmem>>, %arg5: memref<64x128xf32, #tpu.memory_space<vmem>>) attributes {dimension_semantics = [#tpu.dimension_semantics<parallel>], iteration_bounds = array<i64: 2>, scalar_prefetch = 0 : i64, scratch_operands = 0 : i64, tpu.core_type = #tpu.core_type<tc>, window_params = [{transform_indices = @transform_0, window_bounds = array<i64: 64, 128>}, {pipeline_mode = #tpu.pipeline_mode<synchronous>, transform_indices = @transform_1, window_bounds = array<i64: 1, 128>}, {pipeline_mode = #tpu.pipeline_mode<synchronous>, transform_indices = @transform_2, window_bounds = array<i64: 1, 128>}, {transform_indices = @transform_3, window_bounds = array<i64: 64, 128>}, {transform_indices = @transform_4, window_bounds = array<i64: 64, 128>}]} {
    %c0 = arith.constant 0 : index
    %c0_0 = arith.constant 0 : index
    %0 = vector.load %arg1[%c0, %c0_0] : memref<64x128xbf16, #tpu.memory_space<vmem>>, vector<64x128xbf16>
    %1 = arith.extf %0 : vector<64x128xbf16> to vector<64x128xf32>
    %c0_1 = arith.constant 0 : index
    %c0_2 = arith.constant 0 : index
    %2 = vector.load %arg2[%c0_1, %c0_2] : memref<1x128xf32, #tpu.memory_space<vmem>>, vector<1x128xf32>
    %3 = vector.broadcast %2 : vector<1x128xf32> to vector<64x128xf32>
    %4 = arith.mulf %1, %3 : vector<64x128xf32>
    %c0_3 = arith.constant 0 : index
    %c0_4 = arith.constant 0 : index
    %5 = vector.load %arg3[%c0_3, %c0_4] : memref<1x128xf32, #tpu.memory_space<vmem>>, vector<1x128xf32>
    %6 = vector.broadcast %5 : vector<1x128xf32> to vector<64x128xf32>
    %7 = arith.addf %4, %6 : vector<64x128xf32>
    %cst = arith.constant 0.000000e+00 : f32
    %8 = vector.broadcast %cst : f32 to vector<64x128xf32>
    %9 = arith.cmpf oge, %7, %8 : vector<64x128xf32>
    %cst_5 = arith.constant 2.000000e-01 : f32
    %10 = vector.broadcast %cst_5 : f32 to vector<64x128xf32>
    %11 = arith.mulf %10, %7 : vector<64x128xf32>
    %12 = arith.select %9, %7, %11 : vector<64x128xi1>, vector<64x128xf32>
    %c0_6 = arith.constant 0 : index
    %c0_7 = arith.constant 0 : index
    %13 = vector.load %arg4[%c0_6, %c0_7] : memref<64x128xf32, #tpu.memory_space<vmem>>, vector<64x128xf32>
    %14 = arith.addf %12, %13 : vector<64x128xf32>
    %c0_8 = arith.constant 0 : index
    %c0_9 = arith.constant 0 : index
    %15 = vector.load %arg5[%c0_8, %c0_9] : memref<64x128xf32, #tpu.memory_space<vmem>>, vector<64x128xf32>
    tpu.vector_store %arg5[%c0_8, %c0_9], %14 {strides = array<i32>} : memref<64x128xf32, #tpu.memory_space<vmem>>, vector<64x128xf32>,
    return
  }
  func.func @transform_0(%arg0: i32) -> (i32, i32) {
    %c0_i32 = arith.constant 0 : i32
    %c0_i32_0 = arith.constant 0 : i32
    return %arg0, %c0_i32 : i32, i32
  }
  func.func @transform_1(%arg0: i32) -> (i32, i32) {
    %c0_i32 = arith.constant 0 : i32
    %c0_i32_0 = arith.constant 0 : i32
    %c0_i32_1 = arith.constant 0 : i32
    return %c0_i32, %c0_i32_0 : i32, i32
  }
  func.func @transform_2(%arg0: i32) -> (i32, i32) {
    %c0_i32 = arith.constant 0 : i32
    %c0_i32_0 = arith.constant 0 : i32
    %c0_i32_1 = arith.constant 0 : i32
    return %c0_i32, %c0_i32_0 : i32, i32
  }
  func.func @transform_3(%arg0: i32) -> (i32, i32) {
    %c0_i32 = arith.constant 0 : i32
    %c0_i32_0 = arith.constant 0 : i32
    return %arg0, %c0_i32 : i32, i32
  }
  func.func @transform_4(%arg0: i32) -> (i32, i32) {
    %c0_i32 = arith.constant 0 : i32
    %c0_i32_0 = arith.constant 0 : i32
    return %arg0, %c0_i32 : i32, i32
  }
}

module attributes {stable_mosaic.version = 11 : i64} {
  func.func @_affine_lrelu_kernel(%arg0: i32, %arg1: memref<64x128xbf16, #tpu.memory_space<vmem>>, %arg2: memref<1x128xf32, #tpu.memory_space<vmem>>, %arg3: memref<1x128xf32, #tpu.memory_space<vmem>>, %arg4: memref<64x128xbf16, #tpu.memory_space<vmem>>) attributes {dimension_semantics = [#tpu.dimension_semantics<parallel>], iteration_bounds = array<i64: 2>, scalar_prefetch = 0 : i64, scratch_operands = 0 : i64, tpu.core_type = #tpu.core_type<tc>, window_params = [{transform_indices = @transform_0, window_bounds = array<i64: 64, 128>}, {pipeline_mode = #tpu.pipeline_mode<synchronous>, transform_indices = @transform_1, window_bounds = array<i64: 1, 128>}, {pipeline_mode = #tpu.pipeline_mode<synchronous>, transform_indices = @transform_2, window_bounds = array<i64: 1, 128>}, {transform_indices = @transform_3, window_bounds = array<i64: 64, 128>}]} {
    %c0 = arith.constant 0 : index
    %c0_0 = arith.constant 0 : index
    %0 = vector.load %arg1[%c0, %c0_0] : memref<64x128xbf16, #tpu.memory_space<vmem>>, vector<64x128xbf16>
    %1 = arith.extf %0 : vector<64x128xbf16> to vector<64x128xf32>
    %c0_1 = arith.constant 0 : index
    %c0_2 = arith.constant 0 : index
    %2 = vector.load %arg2[%c0_1, %c0_2] : memref<1x128xf32, #tpu.memory_space<vmem>>, vector<1x128xf32>
    %3 = vector.broadcast %2 : vector<1x128xf32> to vector<64x128xf32>
    %4 = arith.mulf %1, %3 : vector<64x128xf32>
    %c0_3 = arith.constant 0 : index
    %c0_4 = arith.constant 0 : index
    %5 = vector.load %arg3[%c0_3, %c0_4] : memref<1x128xf32, #tpu.memory_space<vmem>>, vector<1x128xf32>
    %6 = vector.broadcast %5 : vector<1x128xf32> to vector<64x128xf32>
    %7 = arith.addf %4, %6 : vector<64x128xf32>
    %cst = arith.constant 0.000000e+00 : f32
    %8 = vector.broadcast %cst : f32 to vector<64x128xf32>
    %9 = arith.cmpf oge, %7, %8 : vector<64x128xf32>
    %cst_5 = arith.constant 2.000000e-01 : f32
    %10 = vector.broadcast %cst_5 : f32 to vector<64x128xf32>
    %11 = arith.mulf %10, %7 : vector<64x128xf32>
    %12 = arith.select %9, %7, %11 : vector<64x128xi1>, vector<64x128xf32>
    %13 = arith.truncf %12 : vector<64x128xf32> to vector<64x128xbf16>
    %c0_6 = arith.constant 0 : index
    %c0_7 = arith.constant 0 : index
    %14 = vector.load %arg4[%c0_6, %c0_7] : memref<64x128xbf16, #tpu.memory_space<vmem>>, vector<64x128xbf16>
    tpu.vector_store %arg4[%c0_6, %c0_7], %13 {strides = array<i32>} : memref<64x128xbf16, #tpu.memory_space<vmem>>, vector<64x128xbf16>,
    return
  }
  func.func @transform_0(%arg0: i32) -> (i32, i32) {
    %c0_i32 = arith.constant 0 : i32
    %c0_i32_0 = arith.constant 0 : i32
    return %arg0, %c0_i32 : i32, i32
  }
  func.func @transform_1(%arg0: i32) -> (i32, i32) {
    %c0_i32 = arith.constant 0 : i32
    %c0_i32_0 = arith.constant 0 : i32
    %c0_i32_1 = arith.constant 0 : i32
    return %c0_i32, %c0_i32_0 : i32, i32
  }
  func.func @transform_2(%arg0: i32) -> (i32, i32) {
    %c0_i32 = arith.constant 0 : i32
    %c0_i32_0 = arith.constant 0 : i32
    %c0_i32_1 = arith.constant 0 : i32
    return %c0_i32, %c0_i32_0 : i32, i32
  }
  func.func @transform_3(%arg0: i32) -> (i32, i32) {
    %c0_i32 = arith.constant 0 : i32
    %c0_i32_0 = arith.constant 0 : i32
    return %arg0, %c0_i32 : i32, i32
  }
}

module attributes {stable_mosaic.version = 11 : i64} {
  func.func @_matmul_stats_kernel(%arg0: i32, %arg1: i32, %arg2: memref<64x128xbf16, #tpu.memory_space<vmem>>, %arg3: memref<128x128xbf16, #tpu.memory_space<vmem>>, %arg4: memref<64x128xbf16, #tpu.memory_space<vmem>>, %arg5: memref<8x128xf32, #tpu.memory_space<vmem>>) attributes {dimension_semantics = [#tpu.dimension_semantics<parallel>, #tpu.dimension_semantics<arbitrary>], iteration_bounds = array<i64: 2, 1>, scalar_prefetch = 0 : i64, scratch_operands = 0 : i64, tpu.core_type = #tpu.core_type<tc>, window_params = [{transform_indices = @transform_0, window_bounds = array<i64: 64, 128>}, {pipeline_mode = #tpu.pipeline_mode<synchronous>, transform_indices = @transform_1, window_bounds = array<i64: 128, 128>}, {transform_indices = @transform_2, window_bounds = array<i64: 64, 128>}, {transform_indices = @transform_3, window_bounds = array<i64: 8, 128>}]} {
    %c0 = arith.constant 0 : index
    %c0_0 = arith.constant 0 : index
    %0 = vector.load %arg2[%c0, %c0_0] : memref<64x128xbf16, #tpu.memory_space<vmem>>, vector<64x128xbf16>
    %c0_1 = arith.constant 0 : index
    %c0_2 = arith.constant 0 : index
    %1 = vector.load %arg3[%c0_1, %c0_2] : memref<128x128xbf16, #tpu.memory_space<vmem>>, vector<128x128xbf16>
    %cst = arith.constant dense<0.000000e+00> : vector<64x128xf32>
    %2 = tpu.matmul %0, %1, %cst {dimension_numbers = #tpu.dot_dimension_numbers<[1], [0], [0], [1], [0, 0, 1, 1], [], []>} : vector<64x128xbf16>, vector<128x128xbf16>, vector<64x128xf32> -> vector<64x128xf32>
    %3 = arith.truncf %2 : vector<64x128xf32> to vector<64x128xbf16>
    %c0_3 = arith.constant 0 : index
    %c0_4 = arith.constant 0 : index
    %4 = vector.load %arg4[%c0_3, %c0_4] : memref<64x128xbf16, #tpu.memory_space<vmem>>, vector<64x128xbf16>
    tpu.vector_store %arg4[%c0_3, %c0_4], %3 {strides = array<i32>} : memref<64x128xbf16, #tpu.memory_space<vmem>>, vector<64x128xbf16>,
    %c0_i32 = arith.constant 0 : i32
    %5 = arith.cmpi eq, %arg1, %c0_i32 : i32
    %6 = arith.extui %5 : i1 to i32
    %c0_i32_5 = arith.constant 0 : i32
    %7 = arith.cmpi ne, %6, %c0_i32_5 : i32
    scf.if %7 {
      %cst_12 = arith.constant 0.000000e+00 : f32
      %17 = vector.broadcast %cst_12 : f32 to vector<8x128xf32>
      %c0_13 = arith.constant 0 : index
      %c0_14 = arith.constant 0 : index
      %18 = vector.load %arg5[%c0_13, %c0_14] : memref<8x128xf32, #tpu.memory_space<vmem>>, vector<8x128xf32>
      tpu.vector_store %arg5[%c0_13, %c0_14], %17 {strides = array<i32>} : memref<8x128xf32, #tpu.memory_space<vmem>>, vector<8x128xf32>,
    } else {
    }
    %cst_6 = arith.constant dense<0.000000e+00> : vector<128xf32>
    %8 = vector.multi_reduction <add>, %2, %cst_6 [0] : vector<64x128xf32> to vector<128xf32>
    %9 = vector.shape_cast %8 : vector<128xf32> to vector<1x128xf32>
    %10 = arith.mulf %2, %2 : vector<64x128xf32>
    %cst_7 = arith.constant dense<0.000000e+00> : vector<128xf32>
    %11 = vector.multi_reduction <add>, %10, %cst_7 [0] : vector<64x128xf32> to vector<128xf32>
    %12 = vector.shape_cast %11 : vector<128xf32> to vector<1x128xf32>
    %13 = tpu.concatenate %9, %12 in 0 : vector<1x128xf32>, vector<1x128xf32> -> vector<2x128xf32>
    %c0_8 = arith.constant 0 : index
    %c0_9 = arith.constant 0 : index
    %14 = vector.load %arg5[%c0_8, %c0_9] : memref<8x128xf32, #tpu.memory_space<vmem>>, vector<2x128xf32>
    %15 = arith.addf %14, %13 : vector<2x128xf32>
    %c0_10 = arith.constant 0 : index
    %c0_11 = arith.constant 0 : index
    %16 = vector.load %arg5[%c0_10, %c0_11] : memref<8x128xf32, #tpu.memory_space<vmem>>, vector<2x128xf32>
    tpu.vector_store %arg5[%c0_10, %c0_11], %15 {strides = array<i32>} : memref<8x128xf32, #tpu.memory_space<vmem>>, vector<2x128xf32>,
    return
  }
  func.func @transform_0(%arg0: i32, %arg1: i32) -> (i32, i32) {
    %c1_i32 = arith.constant 1 : i32
    %0 = arith.muli %arg0, %c1_i32 : i32
    %1 = arith.addi %0, %arg1 : i32
    %c0_i32 = arith.constant 0 : i32
    %c0_i32_0 = arith.constant 0 : i32
    return %1, %c0_i32 : i32, i32
  }
  func.func @transform_1(%arg0: i32, %arg1: i32) -> (i32, i32) {
    %c0_i32 = arith.constant 0 : i32
    %c0_i32_0 = arith.constant 0 : i32
    %c0_i32_1 = arith.constant 0 : i32
    return %c0_i32, %c0_i32_0 : i32, i32
  }
  func.func @transform_2(%arg0: i32, %arg1: i32) -> (i32, i32) {
    %c1_i32 = arith.constant 1 : i32
    %0 = arith.muli %arg0, %c1_i32 : i32
    %1 = arith.addi %0, %arg1 : i32
    %c0_i32 = arith.constant 0 : i32
    %c0_i32_0 = arith.constant 0 : i32
    return %1, %c0_i32 : i32, i32
  }
  func.func @transform_3(%arg0: i32, %arg1: i32) -> (i32, i32) {
    %c0_i32 = arith.constant 0 : i32
    %c0_i32_0 = arith.constant 0 : i32
    return %arg0, %c0_i32 : i32, i32
  }
}

module attributes {stable_mosaic.version = 11 : i64} {
  func.func @_affine_lrelu_kernel(%arg0: i32, %arg1: memref<64x128xbf16, #tpu.memory_space<vmem>>, %arg2: memref<1x128xf32, #tpu.memory_space<vmem>>, %arg3: memref<1x128xf32, #tpu.memory_space<vmem>>, %arg4: memref<64x128xf32, #tpu.memory_space<vmem>>) attributes {dimension_semantics = [#tpu.dimension_semantics<parallel>], iteration_bounds = array<i64: 2>, scalar_prefetch = 0 : i64, scratch_operands = 0 : i64, tpu.core_type = #tpu.core_type<tc>, window_params = [{transform_indices = @transform_0, window_bounds = array<i64: 64, 128>}, {pipeline_mode = #tpu.pipeline_mode<synchronous>, transform_indices = @transform_1, window_bounds = array<i64: 1, 128>}, {pipeline_mode = #tpu.pipeline_mode<synchronous>, transform_indices = @transform_2, window_bounds = array<i64: 1, 128>}, {transform_indices = @transform_3, window_bounds = array<i64: 64, 128>}]} {
    %c0 = arith.constant 0 : index
    %c0_0 = arith.constant 0 : index
    %0 = vector.load %arg1[%c0, %c0_0] : memref<64x128xbf16, #tpu.memory_space<vmem>>, vector<64x128xbf16>
    %1 = arith.extf %0 : vector<64x128xbf16> to vector<64x128xf32>
    %c0_1 = arith.constant 0 : index
    %c0_2 = arith.constant 0 : index
    %2 = vector.load %arg2[%c0_1, %c0_2] : memref<1x128xf32, #tpu.memory_space<vmem>>, vector<1x128xf32>
    %3 = vector.broadcast %2 : vector<1x128xf32> to vector<64x128xf32>
    %4 = arith.mulf %1, %3 : vector<64x128xf32>
    %c0_3 = arith.constant 0 : index
    %c0_4 = arith.constant 0 : index
    %5 = vector.load %arg3[%c0_3, %c0_4] : memref<1x128xf32, #tpu.memory_space<vmem>>, vector<1x128xf32>
    %6 = vector.broadcast %5 : vector<1x128xf32> to vector<64x128xf32>
    %7 = arith.addf %4, %6 : vector<64x128xf32>
    %cst = arith.constant 0.000000e+00 : f32
    %8 = vector.broadcast %cst : f32 to vector<64x128xf32>
    %9 = arith.cmpf oge, %7, %8 : vector<64x128xf32>
    %cst_5 = arith.constant 2.000000e-01 : f32
    %10 = vector.broadcast %cst_5 : f32 to vector<64x128xf32>
    %11 = arith.mulf %10, %7 : vector<64x128xf32>
    %12 = arith.select %9, %7, %11 : vector<64x128xi1>, vector<64x128xf32>
    %c0_6 = arith.constant 0 : index
    %c0_7 = arith.constant 0 : index
    %13 = vector.load %arg4[%c0_6, %c0_7] : memref<64x128xf32, #tpu.memory_space<vmem>>, vector<64x128xf32>
    tpu.vector_store %arg4[%c0_6, %c0_7], %12 {strides = array<i32>} : memref<64x128xf32, #tpu.memory_space<vmem>>, vector<64x128xf32>,
    return
  }
  func.func @transform_0(%arg0: i32) -> (i32, i32) {
    %c0_i32 = arith.constant 0 : i32
    %c0_i32_0 = arith.constant 0 : i32
    return %arg0, %c0_i32 : i32, i32
  }
  func.func @transform_1(%arg0: i32) -> (i32, i32) {
    %c0_i32 = arith.constant 0 : i32
    %c0_i32_0 = arith.constant 0 : i32
    %c0_i32_1 = arith.constant 0 : i32
    return %c0_i32, %c0_i32_0 : i32, i32
  }
  func.func @transform_2(%arg0: i32) -> (i32, i32) {
    %c0_i32 = arith.constant 0 : i32
    %c0_i32_0 = arith.constant 0 : i32
    %c0_i32_1 = arith.constant 0 : i32
    return %c0_i32, %c0_i32_0 : i32, i32
  }
  func.func @transform_3(%arg0: i32) -> (i32, i32) {
    %c0_i32 = arith.constant 0 : i32
    %c0_i32_0 = arith.constant 0 : i32
    return %arg0, %c0_i32 : i32, i32
  }
}

module attributes {stable_mosaic.version = 11 : i64} {
  func.func @_affine_lrelu_add_kernel(%arg0: i32, %arg1: memref<64x128xbf16, #tpu.memory_space<vmem>>, %arg2: memref<1x128xf32, #tpu.memory_space<vmem>>, %arg3: memref<1x128xf32, #tpu.memory_space<vmem>>, %arg4: memref<64x128xf32, #tpu.memory_space<vmem>>, %arg5: memref<64x128xf32, #tpu.memory_space<vmem>>) attributes {dimension_semantics = [#tpu.dimension_semantics<parallel>], iteration_bounds = array<i64: 2>, scalar_prefetch = 0 : i64, scratch_operands = 0 : i64, tpu.core_type = #tpu.core_type<tc>, window_params = [{transform_indices = @transform_0, window_bounds = array<i64: 64, 128>}, {pipeline_mode = #tpu.pipeline_mode<synchronous>, transform_indices = @transform_1, window_bounds = array<i64: 1, 128>}, {pipeline_mode = #tpu.pipeline_mode<synchronous>, transform_indices = @transform_2, window_bounds = array<i64: 1, 128>}, {transform_indices = @transform_3, window_bounds = array<i64: 64, 128>}, {transform_indices = @transform_4, window_bounds = array<i64: 64, 128>}]} {
    %c0 = arith.constant 0 : index
    %c0_0 = arith.constant 0 : index
    %0 = vector.load %arg1[%c0, %c0_0] : memref<64x128xbf16, #tpu.memory_space<vmem>>, vector<64x128xbf16>
    %1 = arith.extf %0 : vector<64x128xbf16> to vector<64x128xf32>
    %c0_1 = arith.constant 0 : index
    %c0_2 = arith.constant 0 : index
    %2 = vector.load %arg2[%c0_1, %c0_2] : memref<1x128xf32, #tpu.memory_space<vmem>>, vector<1x128xf32>
    %3 = vector.broadcast %2 : vector<1x128xf32> to vector<64x128xf32>
    %4 = arith.mulf %1, %3 : vector<64x128xf32>
    %c0_3 = arith.constant 0 : index
    %c0_4 = arith.constant 0 : index
    %5 = vector.load %arg3[%c0_3, %c0_4] : memref<1x128xf32, #tpu.memory_space<vmem>>, vector<1x128xf32>
    %6 = vector.broadcast %5 : vector<1x128xf32> to vector<64x128xf32>
    %7 = arith.addf %4, %6 : vector<64x128xf32>
    %cst = arith.constant 0.000000e+00 : f32
    %8 = vector.broadcast %cst : f32 to vector<64x128xf32>
    %9 = arith.cmpf oge, %7, %8 : vector<64x128xf32>
    %cst_5 = arith.constant 2.000000e-01 : f32
    %10 = vector.broadcast %cst_5 : f32 to vector<64x128xf32>
    %11 = arith.mulf %10, %7 : vector<64x128xf32>
    %12 = arith.select %9, %7, %11 : vector<64x128xi1>, vector<64x128xf32>
    %c0_6 = arith.constant 0 : index
    %c0_7 = arith.constant 0 : index
    %13 = vector.load %arg4[%c0_6, %c0_7] : memref<64x128xf32, #tpu.memory_space<vmem>>, vector<64x128xf32>
    %14 = arith.addf %12, %13 : vector<64x128xf32>
    %c0_8 = arith.constant 0 : index
    %c0_9 = arith.constant 0 : index
    %15 = vector.load %arg5[%c0_8, %c0_9] : memref<64x128xf32, #tpu.memory_space<vmem>>, vector<64x128xf32>
    tpu.vector_store %arg5[%c0_8, %c0_9], %14 {strides = array<i32>} : memref<64x128xf32, #tpu.memory_space<vmem>>, vector<64x128xf32>,
    return
  }
  func.func @transform_0(%arg0: i32) -> (i32, i32) {
    %c0_i32 = arith.constant 0 : i32
    %c0_i32_0 = arith.constant 0 : i32
    return %arg0, %c0_i32 : i32, i32
  }
  func.func @transform_1(%arg0: i32) -> (i32, i32) {
    %c0_i32 = arith.constant 0 : i32
    %c0_i32_0 = arith.constant 0 : i32
    %c0_i32_1 = arith.constant 0 : i32
    return %c0_i32, %c0_i32_0 : i32, i32
  }
  func.func @transform_2(%arg0: i32) -> (i32, i32) {
    %c0_i32 = arith.constant 0 : i32
    %c0_i32_0 = arith.constant 0 : i32
    %c0_i32_1 = arith.constant 0 : i32
    return %c0_i32, %c0_i32_0 : i32, i32
  }
  func.func @transform_3(%arg0: i32) -> (i32, i32) {
    %c0_i32 = arith.constant 0 : i32
    %c0_i32_0 = arith.constant 0 : i32
    return %arg0, %c0_i32 : i32, i32
  }
  func.func @transform_4(%arg0: i32) -> (i32, i32) {
    %c0_i32 = arith.constant 0 : i32
    %c0_i32_0 = arith.constant 0 : i32
    return %arg0, %c0_i32 : i32, i32
  }
}

</mosaic_0001>

<bundles_post_ra>
// kernel: tpu_custom_call.1
= control target key start
LH: loop header
LB: loop body
LE: loop exit
PB: predicated region body
PF: predicated region fallthrough
CT: control target
= control target key end

     0   :  { %6 = vsyncpa [#allocation3], 0  ;;  %s305_s0 = inlined_call_operand.hbm [shape: f32[8,128], index: 0, kind: input, shape index: {}]   ;;  %s306_s1 = inlined_call_operand.hbm [shape: f32[8,128], index: 1, kind: output, shape index: {}]  }
   0x1   :  { %7 = vsyncpa [#allocation4], 0  ;;  %s258_s6 = smov 0  }
   0x2 LB: > { %s145_s7 = sadd.s32 4294967295, %s244_s6   ;;  %p146_p0 = scmp.ge.s32.totalorder %s244_s6, 1  ;;  %s244_s6 = sphi %s258_s6, %s13_s6  }
   0x3   : > { %p60_p1 = scmp.lt.s32.totalorder %s244_s6, 3  ;;  %p270_p3 = scmp.eq.s32.totalorder %s145_s7, 0 }
   0x4   : > { %s246_s10 = smov [#allocation2]  }
   0x5   : > { %p266_p2 = pnand %p146_p0, %p60_p1  ;;  %s73_s11 = sshll.u32 %s246_s10, 4  ;;  %s74_s11 = int_to_ptr.vmem [resolvable:$true] %s73_s11 }
   0x6   : > { %s191_s12 = scalar_lea.vmem %s74_s11, 128  ;;  %p199_p10 = scmp.lt.s32.totalorder %s74_s11, %s74_s11 }
   0x7   : > { %p162_p4 = pneg %p266_p2  ;;  %p192_p7 = scmp.ne.s32.totalorder %s74_s11, %s191_s12 }
   0x8   : > { %p200_p11 = scmp.lt.s32.totalorder %s191_s12, %s191_s12 }
   0x9   : > { %p163_p5 = pnand %p270_p3, %p162_p4 }
   0xa   : > { %p201_p12 = por %p200_p11, %p199_p10 }
   0xb   : > { %p182_p6 = pneg %p163_p5 }
   0xd   : > { %p194_p8 = pnand %p192_p7, %p182_p6 }
   0xf   : > { %p195_p9 = pneg %p194_p8 }
  0x11   : > { %p202_p13 = pnand %p201_p12, %p195_p9 }
  0x13   : > { %205 = shalt.err (!%p202_p13)
}
  0x14   : > { %165 = dma.hbm_to_vmem [thread:$0]  (!%p163_p5), %s305_s0, 128, %s74_s11, [#allocation3]  }
  0x15   : > { %86 = sbr.rel (%p266_p2) target bundleno = 42 (0x2a), region = 24 }
  0x1a   : > { %235 = dma.done.wait (%p270_p3), [#allocation3], 128  }
  0x1b   : > { %237 = vsyncadd (%p270_p3), [#allocation3], 4294967168  ;;  %s247_s15 = smov [#allocation5]   ;;  %v96_v0 = vld [vmem:[#allocation2] sm:$0xff]  ;;  %p287_p0 = scmp.eq.s32.totalorder %s145_s7, 1 }
  0x1c   : > { %s106_s16 = sshll.u32 %s247_s15, 4  ;;  %v97_v1 = vadd.f32 1.0, %v96_v0  ;;  %s107_s16 = int_to_ptr.vmem [resolvable:$true] %s106_s16 }
  0x1d   : > { %s206_s18 = scalar_lea.vmem %s107_s16, 128  ;;  %p213_p5 = scmp.lt.s32.totalorder %s107_s16, %s107_s16 }
  0x1e   : > { %98 = vst [vmem:[#allocation5] sm:$0xff] %v97_v1  ;;  %p207_p1 = scmp.ne.s32.totalorder %s107_s16, %s206_s18  ;;  %p214_p6 = scmp.lt.s32.totalorder %s206_s18, %s206_s18 }
  0x20   : > { %p208_p2 = pnand %p207_p1, %p287_p0  ;;  %p215_p7 = por %p214_p6, %p213_p5 }
  0x22   : > { %p209_p4 = pneg %p208_p2 }
  0x24   : > { %p216_p3 = pnand %p215_p7, %p209_p4 }
  0x26   : > { %219 = shalt.err (!%p216_p3)
}
  0x27   : > { %159 = dma.vmem_to_hbm [thread:$0]  (%p287_p0), %s107_s16, 128, %s306_s1, [#allocation4]  }
  0x28   : > { %239 = dma.done.wait (%p287_p0), [#allocation4], 128  }
  0x29   : > { %241 = vsyncadd (%p287_p0), [#allocation4], 4294967168 }
  0x2a PF: > { %s13_s6 = sadd.s32 1, %s244_s6  }
  0x2b   : > { %p10_p8 = scmp.ge.s32.totalorder %s13_s6, 4  }
  0x2d   :  { %12 = sbr.rel (!%p10_p8) target bundleno = 2 (0x2), region = 53 }
  0x32   :  { %119 = vsyncpa [#allocation3], 1 }
  0x33   :  { %121 = vsyncpa [#allocation3 + $0x1], 1 }
  0x34   :  { %122 = vsyncpa [#allocation4], 1 }
  0x35   :  { %124 = vsyncpa [#allocation4 + $0x1], 1 }

// kernel: _lambda_.7
= control target key start
LH: loop header
LB: loop body
LE: loop exit
PB: predicated region body
PF: predicated region fallthrough
CT: control target
= control target key end

     0   :  { %s447_s12 = smov 0   ;;  %s477_s0 = inlined_call_operand.vmem [shape: bf16[128,128], index: 0, kind: input, shape index: {}]   ;;  %s478_s1 = inlined_call_operand.vmem [shape: f32[1,128], index: 1, kind: input, shape index: {}]   ;;  %s479_s2 = inlined_call_operand.vmem [shape: f32[1,128], index: 2, kind: input, shape index: {}]   ;;  %s480_s3 = inlined_call_operand.vmem [shape: bf16[128,128], index: 3, kind: output, shape index: {}]  }
   0x1 LB: > { %s340_s13 = sadd.s32 4294967295, %s425_s12   ;;  %p344_p0 = scmp.ge.s32.totalorder %s425_s12, 1  ;;  %s425_s12 = sphi %s447_s12, %s13_s12  }
   0x2   : > { %p138_p1 = scmp.lt.s32.totalorder %s425_s12, 3 }
   0x4   : > { %p139_p2 = pnand %p344_p0, %p138_p1 }
   0x5   : > { %s345_s14 = sshll.u32 (!%p139_p2), %s340_s13, 3 }
   0x6   : > { %142 = sbr.rel (%p139_p2) target bundleno = 32 (0x20), region = 32  ;;  %p163_p3 = scmp.lt.s32.totalorder (!%p139_p2), %s345_s14, 15 }
   0xb   : > { %s482_s14 = smov (!%p163_p3, %s345_s14), 15  ;;  %v349_v0 = vld [vmem:[%s478_s1] ss:$0 sm:$0xff] }
   0xc   : > { %s346_s15 = sshll.u32 %s482_s14, 2  ;;  %v350_v13 = vld [vmem:[%s479_s2] ss:$0 sm:$0xff] }
   0xd   : > { %s166_s18 = scalar_lea.vmem %s477_s0, %s346_s15  ;;  %s172_s25 = scalar_lea.vmem %s480_s3, %s346_s15 }
   0xe   : > { %v370_v1 = vld [vmem:[%s166_s18] sm:$0xff]   ;;  %v405_v2 = vld [vmem:[%s166_s18 + $0x8] sm:$0xff]   ;;  %v406_v3 = vld [vmem:[%s166_s18 + $0x10] sm:$0xff]  }
   0xf   : > { %v371_v4 = vunpack.c.l.bf16 %v370_v1  ;;  %v372_v5 = vunpack.c.h.bf16 %v370_v1  ;;  %v375_v6 = vunpack.c.l.bf16 %v405_v2  ;;  %v376_v7 = vunpack.c.h.bf16 %v405_v2  ;;  %v407_v8 = vld [vmem:[%s166_s18 + $0x18] sm:$0xff]  }
  0x10   : > { %v379_v9 = vunpack.c.l.bf16 %v406_v3  ;;  %v380_v10 = vunpack.c.h.bf16 %v406_v3  ;;  %v383_v11 = vunpack.c.l.bf16 %v407_v8  ;;  %v384_v12 = vunpack.c.h.bf16 %v407_v8 }
  0x11   : > { %v197_v14 = vmul.f32 %v371_v4, %v349_v0  ;;  %v198_v15 = vmul.f32 %v372_v5, %v349_v0  ;;  %v199_v16 = vmul.f32 %v375_v6, %v349_v0  ;;  %v200_v17 = vmul.f32 %v376_v7, %v349_v0 }
  0x12   : > { %v201_v18 = vmul.f32 %v379_v9, %v349_v0  ;;  %v202_v19 = vmul.f32 %v380_v10, %v349_v0  ;;  %v203_v20 = vmul.f32 %v383_v11, %v349_v0  ;;  %v204_v21 = vmul.f32 %v384_v12, %v349_v0 }
  0x13   : > { %v212_v22 = vadd.f32 %v350_v13, %v197_v14  ;;  %v213_v23 = vadd.f32 %v350_v13, %v198_v15  ;;  %v214_v24 = vadd.f32 %v350_v13, %v199_v16  ;;  %v215_v25 = vadd.f32 %v350_v13, %v200_v17 }
  0x14   : > { %v216_v26 = vadd.f32 %v350_v13, %v201_v18  ;;  %v217_v27 = vadd.f32 %v350_v13, %v202_v19  ;;  %v218_v28 = vadd.f32 %v350_v13, %v203_v20  ;;  %v219_v29 = vadd.f32 %v350_v13, %v204_v21 }
  0x15   : > { %vm220_vm0 = vcmp.ge.f32.partialorder %v212_v22, 0.0  ;;  %vm221_vm1 = vcmp.ge.f32.partialorder %v213_v23, 0.0  ;;  %v228_v30 = vmul.f32 0.2, %v212_v22  ;;  %v229_v31 = vmul.f32 0.2, %v213_v23 }
  0x16   : > { %vm222_vm2 = vcmp.ge.f32.partialorder %v214_v24, 0.0  ;;  %vm223_vm3 = vcmp.ge.f32.partialorder %v215_v25, 0.0  ;;  %v230_v32 = vmul.f32 0.2, %v214_v24  ;;  %v231_v33 = vmul.f32 0.2, %v215_v25 }
  0x17   : > { %v236_v34 = vsel %vm220_vm0, %v212_v22, %v228_v30  ;;  %v237_v35 = vsel %vm221_vm1, %v213_v23, %v229_v31  ;;  %vm224_vm4 = vcmp.ge.f32.partialorder %v216_v26, 0.0  ;;  %vm225_vm5 = vcmp.ge.f32.partialorder %v217_v27, 0.0 }
  0x18   : > { %v388_v36 = vpack.c.bf16 %v237_v35, %v236_v34  ;;  %v238_v37 = vsel %vm222_vm2, %v214_v24, %v230_v32  ;;  %v239_v38 = vsel %vm223_vm3, %v215_v25, %v231_v33  ;;  %v232_v39 = vmul.f32 0.2, %v216_v26 }
  0x19   : > { %v393_v40 = vpack.c.bf16 %v239_v38, %v238_v37  ;;  %v233_v41 = vmul.f32 0.2, %v217_v27  ;;  %vm226_vm6 = vcmp.ge.f32.partialorder %v218_v28, 0.0  ;;  %vm227_vm7 = vcmp.ge.f32.partialorder %v219_v29, 0.0 }
  0x1a   : > { %389 = vst [vmem:[%s172_s25] sm:$0xff] %v388_v36   ;;  %v240_v42 = vsel %vm224_vm4, %v216_v26, %v232_v39  ;;  %v234_v43 = vmul.f32 0.2, %v218_v28  ;;  %v235_v44 = vmul.f32 0.2, %v219_v29 }
  0x1b   : > { %408 = vst [vmem:[%s172_s25 + $0x8] sm:$0xff] %v393_v40   ;;  %v241_v45 = vsel %vm225_vm5, %v217_v27, %v233_v41 }
  0x1c   : > { %v398_v46 = vpack.c.bf16 %v241_v45, %v240_v42  ;;  %v242_v47 = vsel %vm226_vm6, %v218_v28, %v234_v43  ;;  %v243_v48 = vsel %vm227_vm7, %v219_v29, %v235_v44 }
  0x1d   : > { %v403_v49 = vpack.c.bf16 %v243_v48, %v242_v47 }
  0x1e   : > { %409 = vst [vmem:[%s172_s25 + $0x10] sm:$0xff] %v398_v46  }
  0x1f   : > { %410 = vst [vmem:[%s172_s25 + $0x18] sm:$0xff] %v403_v49  }
  0x20 PF: > { %s13_s12 = sadd.s32 1, %s425_s12  }
  0x21   : > { %p10_p4 = scmp.ge.s32.totalorder %s13_s12, 4  }
  0x23   :  { %12 = sbr.rel (!%p10_p4) target bundleno = 1 (0x1), region = 62 }

// kernel: _lambda_.6
= control target key start
LH: loop header
LB: loop body
LE: loop exit
PB: predicated region body
PF: predicated region fallthrough
CT: control target
= control target key end

     0   :  { %s751_s12 = smov 0   ;;  %s753_s13 = smov 0   ;;  %s834_s0 = inlined_call_operand.vmem [shape: bf16[128,128], index: 0, kind: input, shape index: {}]   ;;  %s835_s1 = inlined_call_operand.vmem [shape: bf16[128,128], index: 1, kind: input, shape index: {}]   ;;  %s836_s2 = inlined_call_operand.vmem [shape: bf16[128,128], index: 2, kind: output, shape index: {0}]   ;;  %s837_s3 = inlined_call_operand.vmem [shape: f32[16,128], index: 3, kind: output, shape index: {1}]  }
   0x1   :  { %s755_s14 = smov 0  }
   0x2 LB: > { %s26_s15 = sadd.s32 1, %s724_s13  ;;  %p558_p0 = scmp.ge.s32.totalorder %s728_s14, 1  ;;  %s728_s14 = sphi %s755_s14, %s14_s14   ;;  %s724_s13 = sphi %s753_s13, %s839_s13   ;;  %s720_s12 = sphi %s751_s12, %s838_s12  }
   0x3   : > { %p28_p1 = scmp.ge.s32.totalorder %s26_s15, 2  ;;  %p159_p2 = scmp.lt.s32.totalorder %s728_s14, 3 }
   0x5   : > { %s841_s15 = smov (%p28_p1, %s26_s15), 0  ;;  %p160_p3 = pnand %p558_p0, %p159_p2 }
   0x6   : > { %s559_s18 = sshll.u32 (!%p160_p3), %s720_s12, 3  ;;  %p205_p5 = scmp.lt.s32.totalorder (!%p160_p3), %s720_s12, 1 }
   0x7   : > { %163 = sbr.rel (%p160_p3) target bundleno = 276 (0x114), region = 28  ;;  %p191_p4 = scmp.lt.s32.totalorder (!%p160_p3), %s559_s18, 15 }
   0xc   : > { %v694_v0 = vld [vmem:[%s835_s1 + $0x38] sm:$0xff]   ;;  %v695_v1 = vld [vmem:[%s835_s1 + $0x30] sm:$0xff]   ;;  %s843_s18 = smov (!%p191_p4, %s559_s18), 15  ;;  %v696_v2 = vld [vmem:[%s835_s1 + $0x28] sm:$0xff]   ;;  %s845_s12 = smov (!%p205_p5, %s720_s12), 1  ;;  %v730_v12 = vmov 0.0  }
   0xd   : > { %629 = vmatprep.subr.bf16.mxu0 %v694_v0  ;;  %653 = vmatprep.subr.bf16.mxu1 %v694_v0  ;;  %s560_s23 = sshll.u32 %s843_s18, 2  ;;  %v697_v3 = vld [vmem:[%s835_s1 + $0x20] sm:$0xff]   ;;  %v698_v6 = vld [vmem:[%s835_s1 + $0x18] sm:$0xff]   ;;  %v699_v7 = vld [vmem:[%s835_s1 + $0x10] sm:$0xff]   ;;  %s563_s10 = sshll.u32 %s845_s12, 3  ;;  %vm450_vm0 = vcmask 1040384  }
   0xe   : > { %630 = vmatpush3.bf16.msra.mxu0 %v694_v0  ;;  %661 = vmatpush3.bf16.msra.mxu1 %v694_v0  ;;  %s789_s26 = scalar_lea.vmem %s834_s0, %s560_s23  ;;  %v700_v8 = vld [vmem:[%s835_s1 + $0x8] sm:$0xff]   ;;  %v701_v9 = vld [vmem:[%s835_s1] sm:$0xff]   ;;  %s815_s17 = scalar_lea.vmem %s837_s3, %s563_s10 }
   0xf   : > { %631 = vmatprep.subr.bf16.mxu0 %v695_v1  ;;  %654 = vmatprep.subr.bf16.mxu1 %v695_v1  ;;  %v702_v4 = vld [vmem:[%s789_s26] sm:$0xff]   ;;  %v704_v5 = vld [vmem:[%s789_s26 + $0x10] sm:$0xff]   ;;  %v703_v10 = vld [vmem:[%s789_s26 + $0x8] sm:$0xff]   ;;  %415 = vst [vmem:[%s815_s17] sm:$0xff] %v730_v12  ;;  %s202_s21 = scalar_lea.vmem %s836_s2, %s560_s23 }
  0x10   : > { %645 = vmatprep.mubr.bf16.mxu0 %v702_v4  ;;  %649 = vmatprep.mubr.bf16.mxu1 %v704_v5  ;;  %v705_v11 = vld [vmem:[%s789_s26 + $0x18] sm:$0xff]  }
  0x12   : > { %632 = vmatpush3.bf16.msra.mxu0 %v695_v1  ;;  %662 = vmatpush3.bf16.msra.mxu1 %v695_v1 }
  0x13   : > { %633 = vmatprep.subr.bf16.mxu0 %v696_v2  ;;  %655 = vmatprep.subr.bf16.mxu1 %v696_v2 }
  0x16   : > { %634 = vmatpush3.bf16.msra.mxu0 %v696_v2  ;;  %663 = vmatpush3.bf16.msra.mxu1 %v696_v2  ;;  %v452_v59 = vld [vmem:[%s815_s17] sm:$0x3] }
  0x17   : > { %635 = vmatprep.subr.bf16.mxu0 %v697_v3  ;;  %656 = vmatprep.subr.bf16.mxu1 %v697_v3 }
  0x1a   : > { %636 = vmatpush3.bf16.msra.mxu0 %v697_v3  ;;  %664 = vmatpush3.bf16.msra.mxu1 %v697_v3 }
  0x1b   : > { %637 = vmatprep.subr.bf16.mxu0 %v698_v6  ;;  %657 = vmatprep.subr.bf16.mxu1 %v698_v6 }
  0x1e   : > { %638 = vmatpush3.bf16.msra.mxu0 %v698_v6  ;;  %665 = vmatpush3.bf16.msra.mxu1 %v698_v6 }
  0x1f   : > { %639 = vmatprep.subr.bf16.mxu0 %v699_v7  ;;  %658 = vmatprep.subr.bf16.mxu1 %v699_v7 }
  0x22   : > { %640 = vmatpush3.bf16.msra.mxu0 %v699_v7  ;;  %666 = vmatpush3.bf16.msra.mxu1 %v699_v7 }
  0x23   : > { %641 = vmatprep.subr.bf16.mxu0 %v700_v8  ;;  %659 = vmatprep.subr.bf16.mxu1 %v700_v8 }
  0x26   : > { %642 = vmatpush3.bf16.msra.mxu0 %v700_v8  ;;  %667 = vmatpush3.bf16.msra.mxu1 %v700_v8 }
  0x27   : > { %643 = vmatprep.subr.bf16.mxu0 %v701_v9  ;;  %660 = vmatprep.subr.bf16.mxu1 %v701_v9 }
  0x2a   : > { %644 = vmatpush3.bf16.msra.mxu0 %v701_v9  ;;  %668 = vmatpush3.bf16.msra.mxu1 %v701_v9 }
  0x2d   : > { %646 = vmatmul.mubr.bf16.vlgmr.msra.gmra.mxu0 %v703_v10  ;;  %650 = vmatmul.mubr.bf16.vlgmr.msra.gmra.mxu1 %v705_v11 }
  0xed   : > { %v647_v13 = vpop.f32.mrf.mxu0  ;;  %v651_v14 = vpop.f32.mrf.mxu1 }
  0xee   : > { %v431_v28 = vmul.f32 %v647_v13, %v647_v13  ;;  %v435_v40 = vmul.f32 %v651_v14, %v651_v14 }
  0xef   : > { %v340_v15 = vpop.f32.mrf.mxu0  ;;  %v356_v16 = vpop.f32.mrf.mxu1 }
  0xf0   : > { %v429_v21 = vmul.f32 %v340_v15, %v340_v15  ;;  %v433_v34 = vmul.f32 %v356_v16, %v356_v16 }
  0xf1   : > { %v648_v17 = vpop.f32.mrf.mxu0  ;;  %v652_v18 = vpop.f32.mrf.mxu1 }
  0xf2   : > { %v602_v19 = vpack.c.bf16 %v648_v17, %v647_v13  ;;  %v612_v20 = vpack.c.bf16 %v652_v18, %v651_v14  ;;  %v432_v31 = vmul.f32 %v648_v17, %v648_v17  ;;  %v436_v43 = vmul.f32 %v652_v18, %v652_v18 }
  0xf3   : > { %v343_v22 = vpop.f32.mrf.mxu0  ;;  %v359_v23 = vpop.f32.mrf.mxu1 }
  0xf4   : > { %614 = vst [vmem:[%s202_s21 + $0x8] sm:$0xff] %v602_v19   ;;  %v597_v24 = vpack.c.bf16 %v343_v22, %v340_v15  ;;  %v416_v25 = vadd.f32 %v343_v22, %v340_v15  ;;  %v430_v26 = vmul.f32 %v343_v22, %v343_v22  ;;  %616 = vst [vmem:[%s202_s21 + $0x18] sm:$0xff] %v612_v20  }
  0xf5   : > { %v607_v27 = vpack.c.bf16 %v359_v23, %v356_v16  ;;  %v434_v38 = vmul.f32 %v359_v23, %v359_v23 }
  0xf6   : > { %598 = vst [vmem:[%s202_s21] sm:$0xff] %v597_v24   ;;  %v417_v29 = vadd.f32 %v647_v13, %v416_v25  ;;  %v437_v30 = vadd.f32 %v430_v26, %v429_v21 }
  0xf7   : > { %615 = vst [vmem:[%s202_s21 + $0x10] sm:$0xff] %v607_v27  }
  0xf8   : > { %v438_v32 = vadd.f32 %v437_v30, %v431_v28  ;;  %v418_v33 = vadd.f32 %v648_v17, %v417_v29 }
  0xfa   : > { %v419_v35 = vadd.f32 %v418_v33, %v356_v16  ;;  %v439_v36 = vadd.f32 %v438_v32, %v432_v31 }
  0xfc   : > { %v420_v37 = vadd.f32 %v419_v35, %v359_v23  ;;  %v440_v39 = vadd.f32 %v439_v36, %v433_v34 }
  0xfe   : > { %v421_v41 = vadd.f32 %v651_v14, %v420_v37  ;;  %v441_v42 = vadd.f32 %v440_v39, %v434_v38 }
 0x100   : > { %v422_v44 = vadd.f32 %v652_v18, %v421_v41  ;;  %v442_v45 = vadd.f32 %v441_v42, %v435_v40 }
 0x102   : > { %v423_v46 = vrot.slane %v422_v44, 4  ;;  %v443_v47 = vadd.f32 %v442_v45, %v436_v43 }
 0x104   : > { %v424_v48 = vadd.f32 %v423_v46, %v422_v44  ;;  %v444_v49 = vrot.slane %v443_v47, 4 }
 0x106   : > { %v425_v50 = vrot.slane %v424_v48, 2  ;;  %v445_v51 = vadd.f32 %v444_v49, %v443_v47 }
 0x108   : > { %v426_v52 = vadd.f32 %v425_v50, %v424_v48  ;;  %v446_v53 = vrot.slane %v445_v51, 2 }
 0x10a   : > { %v427_v54 = vrot.slane %v426_v52, 1  ;;  %v447_v55 = vadd.f32 %v446_v53, %v445_v51 }
 0x10c   : > { %v448_v56 = vrot.slane %v447_v55, 1  ;;  %v428_v57 = vadd.f32 %v427_v54, %v426_v52 }
 0x10e   : > { %v449_v58 = vadd.f32 %v448_v56, %v447_v55 }
 0x110   : > { %v451_v60 = vsel %vm450_vm0, %v428_v57, %v449_v58 }
 0x111   : > { %v453_v61 = vadd.f32 %v452_v59, %v451_v60 }
 0x113   : > { %454 = vst [vmem:[%s815_s17] sm:$0x3] %v453_v61 }
 0x114 PF: > { %s14_s14 = sadd.s32 1, %s728_s14   ;;  %s838_s12 = smov %s724_s13 }
 0x115   : > { %p11_p6 = scmp.ge.s32.totalorder %s14_s14, 4   ;;  %s839_s13 = smov %s841_s15 }
 0x117   :  { %13 = sbr.rel (!%p11_p6) target bundleno = 2 (0x2), region = 74 }

// kernel: _lambda_.9
= control target key start
LH: loop header
LB: loop body
LE: loop exit
PB: predicated region body
PF: predicated region fallthrough
CT: control target
= control target key end

     0   :  { %s437_s12 = smov 0   ;;  %s521_s0 = inlined_call_operand.vmem [shape: bf16[224,128], index: 0, kind: input, shape index: {}]   ;;  %s522_s1 = inlined_call_operand.vmem [shape: f32[1,128], index: 1, kind: input, shape index: {}]   ;;  %s523_s2 = inlined_call_operand.vmem [shape: f32[1,128], index: 2, kind: input, shape index: {}]   ;;  %s524_s3 = inlined_call_operand.vmem [shape: f32[224,128], index: 3, kind: output, shape index: {}]  }
   0x1 LB: > { %s356_s13 = sadd.s32 4294967295, %s415_s12   ;;  %p360_p0 = scmp.ge.s32.totalorder %s415_s12, 1  ;;  %s415_s12 = sphi %s437_s12, %s13_s12  }
   0x2   : > { %p138_p1 = scmp.lt.s32.totalorder %s415_s12, 3 }
   0x4   : > { %p139_p2 = pnand %p360_p0, %p138_p1 }
   0x5   : > { %s162_s14 = smul.u32 (!%p139_p2), 14, %s356_s13 }
   0x6   : > { %142 = sbr.rel (%p139_p2) target bundleno = 41 (0x29), region = 32 }
   0x7   : > { %p163_p3 = scmp.lt.s32.totalorder (!%p139_p2), %s162_s14, 27 }
   0xb   : > { %s526_s14 = smov (!%p163_p3, %s162_s14), 27  ;;  %v456_v0 = vld [vmem:[%s522_s1] ss:$0 sm:$0xff] }
   0xc   : > { %s361_s15 = sshll.u32 %s526_s14, 2  ;;  %v465_v9 = vld [vmem:[%s523_s2] ss:$0 sm:$0xff]  ;;  %s362_s23 = sshll.u32 %s526_s14, 3 }
   0xd   : > { %s451_s18 = scalar_lea.vmem %s521_s0, %s361_s15  ;;  %s487_s26 = scalar_lea.vmem %s524_s3, %s362_s23 }
   0xe   : > { %v368_v1 = vld [vmem:[%s451_s18] sm:$0xff]   ;;  %v395_v2 = vld [vmem:[%s451_s18 + $0x8] sm:$0xff]   ;;  %v396_v3 = vld [vmem:[%s451_s18 + $0x10] sm:$0xff]  }
   0xf   : > { %v369_v4 = vunpack.c.l.bf16 %v368_v1  ;;  %v370_v5 = vunpack.c.h.bf16 %v368_v1  ;;  %v373_v6 = vunpack.c.l.bf16 %v395_v2  ;;  %v374_v7 = vunpack.c.h.bf16 %v395_v2  ;;  %v397_v8 = vld [vmem:[%s451_s18 + $0x18] sm:$0xff]   ;;  %v398_v37 = vld [vmem:[%s451_s18 + $0x20] sm:$0xff]   ;;  %v399_v41 = vld [vmem:[%s451_s18 + $0x28] sm:$0xff]  }
  0x10   : > { %v377_v10 = vunpack.c.l.bf16 %v396_v3  ;;  %v378_v11 = vunpack.c.h.bf16 %v396_v3  ;;  %v381_v12 = vunpack.c.l.bf16 %v397_v8  ;;  %v382_v13 = vunpack.c.h.bf16 %v397_v8  ;;  %v400_v42 = vld [vmem:[%s451_s18 + $0x30] sm:$0xff]  }
  0x11   : > { %v209_v14 = vmul.f32 %v369_v4, %v456_v0  ;;  %v210_v15 = vmul.f32 %v370_v5, %v456_v0  ;;  %v211_v16 = vmul.f32 %v373_v6, %v456_v0  ;;  %v212_v17 = vmul.f32 %v374_v7, %v456_v0 }
  0x12   : > { %v213_v18 = vmul.f32 %v377_v10, %v456_v0  ;;  %v214_v19 = vmul.f32 %v378_v11, %v456_v0  ;;  %v215_v20 = vmul.f32 %v381_v12, %v456_v0  ;;  %v216_v21 = vmul.f32 %v382_v13, %v456_v0 }
  0x13   : > { %v230_v22 = vadd.f32 %v465_v9, %v209_v14  ;;  %v231_v23 = vadd.f32 %v465_v9, %v210_v15  ;;  %v232_v24 = vadd.f32 %v465_v9, %v211_v16  ;;  %v233_v25 = vadd.f32 %v465_v9, %v212_v17 }
  0x14   : > { %v234_v26 = vadd.f32 %v465_v9, %v213_v18  ;;  %v235_v27 = vadd.f32 %v465_v9, %v214_v19  ;;  %v236_v28 = vadd.f32 %v465_v9, %v215_v20  ;;  %v237_v29 = vadd.f32 %v465_v9, %v216_v21 }
  0x15   : > { %vm244_vm0 = vcmp.ge.f32.partialorder %v230_v22, 0.0  ;;  %v258_v30 = vmul.f32 0.2, %v230_v22  ;;  %vm245_vm1 = vcmp.ge.f32.partialorder %v231_v23, 0.0  ;;  %v259_v31 = vmul.f32 0.2, %v231_v23 }
  0x16   : > { %vm246_vm2 = vcmp.ge.f32.partialorder %v232_v24, 0.0  ;;  %v260_v32 = vmul.f32 0.2, %v232_v24  ;;  %vm247_vm3 = vcmp.ge.f32.partialorder %v233_v25, 0.0  ;;  %v261_v33 = vmul.f32 0.2, %v233_v25 }
  0x17   : > { %v272_v34 = vsel %vm244_vm0, %v230_v22, %v258_v30  ;;  %v273_v35 = vsel %vm245_vm1, %v231_v23, %v259_v31  ;;  %vm248_vm4 = vcmp.ge.f32.partialorder %v234_v26, 0.0  ;;  %v262_v36 = vmul.f32 0.2, %v234_v26 }
  0x18   : > { %286 = vst [vmem:[%s487_s26] sm:$0xff] %v272_v34  ;;  %287 = vst [vmem:[%s487_s26 + $0x8] sm:$0xff] %v273_v35  ;;  %v274_v38 = vsel %vm246_vm2, %v232_v24, %v260_v32  ;;  %v275_v39 = vsel %vm247_vm3, %v233_v25, %v261_v33  ;;  %vm249_vm5 = vcmp.ge.f32.partialorder %v235_v27, 0.0  ;;  %v263_v40 = vmul.f32 0.2, %v235_v27 }
  0x19   : > { %288 = vst [vmem:[%s487_s26 + $0x10] sm:$0xff] %v274_v38  ;;  %289 = vst [vmem:[%s487_s26 + $0x18] sm:$0xff] %v275_v39  ;;  %v276_v43 = vsel %vm248_vm4, %v234_v26, %v262_v36  ;;  %vm250_vm6 = vcmp.ge.f32.partialorder %v236_v28, 0.0  ;;  %v264_v44 = vmul.f32 0.2, %v236_v28  ;;  %vm251_vm7 = vcmp.ge.f32.partialorder %v237_v29, 0.0 }
  0x1a   : > { %290 = vst [vmem:[%s487_s26 + $0x20] sm:$0xff] %v276_v43  ;;  %v277_v45 = vsel %vm249_vm5, %v235_v27, %v263_v40  ;;  %v265_v46 = vmul.f32 0.2, %v237_v29  ;;  %v385_v47 = vunpack.c.l.bf16 %v398_v37  ;;  %v386_v48 = vunpack.c.h.bf16 %v398_v37 }
  0x1b   : > { %291 = vst [vmem:[%s487_s26 + $0x28] sm:$0xff] %v277_v45  ;;  %v278_v49 = vsel %vm250_vm6, %v236_v28, %v264_v44  ;;  %v389_v50 = vunpack.c.l.bf16 %v399_v41  ;;  %v390_v51 = vunpack.c.h.bf16 %v399_v41  ;;  %v393_v52 = vunpack.c.l.bf16 %v400_v42 }
  0x1c   : > { %292 = vst [vmem:[%s487_s26 + $0x30] sm:$0xff] %v278_v49  ;;  %v279_v53 = vsel %vm251_vm7, %v237_v29, %v265_v46  ;;  %v217_v54 = vmul.f32 %v385_v47, %v456_v0  ;;  %v218_v55 = vmul.f32 %v386_v48, %v456_v0  ;;  %v394_v56 = vunpack.c.h.bf16 %v400_v42 }
  0x1d   : > { %293 = vst [vmem:[%s487_s26 + $0x38] sm:$0xff] %v279_v53  ;;  %v219_v57 = vmul.f32 %v389_v50, %v456_v0  ;;  %v220_v58 = vmul.f32 %v390_v51, %v456_v0  ;;  %v221_v59 = vmul.f32 %v393_v52, %v456_v0 }
  0x1e   : > { %v238_v60 = vadd.f32 %v465_v9, %v217_v54  ;;  %v239_v61 = vadd.f32 %v465_v9, %v218_v55  ;;  %v222_v2 = vmul.f32 %v394_v56, %v456_v0 }
  0x1f   : > { %v240_v62 = vadd.f32 %v465_v9, %v219_v57  ;;  %v241_v63 = vadd.f32 %v465_v9, %v220_v58  ;;  %v242_v1 = vadd.f32 %v465_v9, %v221_v59 }
  0x20   : > { %vm252_vm8 = vcmp.ge.f32.partialorder %v238_v60, 0.0  ;;  %v266_v3 = vmul.f32 0.2, %v238_v60  ;;  %vm253_vm9 = vcmp.ge.f32.partialorder %v239_v61, 0.0  ;;  %v267_v4 = vmul.f32 0.2, %v239_v61 }
  0x21   : > { %vm254_vm10 = vcmp.ge.f32.partialorder %v240_v62, 0.0  ;;  %v268_v5 = vmul.f32 0.2, %v240_v62  ;;  %vm255_vm11 = vcmp.ge.f32.partialorder %v241_v63, 0.0  ;;  %v269_v6 = vmul.f32 0.2, %v241_v63 }
  0x22   : > { %v280_v7 = vsel %vm252_vm8, %v238_v60, %v266_v3  ;;  %v281_v8 = vsel %vm253_vm9, %v239_v61, %v267_v4  ;;  %vm256_vm12 = vcmp.ge.f32.partialorder %v242_v1, 0.0  ;;  %v270_v10 = vmul.f32 0.2, %v242_v1 }
  0x23   : > { %294 = vst [vmem:[%s487_s26 + $0x40] sm:$0xff] %v280_v7  ;;  %295 = vst [vmem:[%s487_s26 + $0x48] sm:$0xff] %v281_v8  ;;  %v282_v11 = vsel %vm254_vm10, %v240_v62, %v268_v5  ;;  %v283_v0 = vsel %vm255_vm11, %v241_v63, %v269_v6  ;;  %v243_v12 = vadd.f32 %v465_v9, %v222_v2 }
  0x24   : > { %296 = vst [vmem:[%s487_s26 + $0x50] sm:$0xff] %v282_v11  ;;  %297 = vst [vmem:[%s487_s26 + $0x58] sm:$0xff] %v283_v0  ;;  %v284_v13 = vsel %vm256_vm12, %v242_v1, %v270_v10 }
  0x25   : > { %298 = vst [vmem:[%s487_s26 + $0x60] sm:$0xff] %v284_v13  ;;  %vm257_vm13 = vcmp.ge.f32.partialorder %v243_v12, 0.0  ;;  %v271_v14 = vmul.f32 0.2, %v243_v12 }
  0x27   : > { %v285_v15 = vsel %vm257_vm13, %v243_v12, %v271_v14 }
  0x28   : > { %299 = vst [vmem:[%s487_s26 + $0x68] sm:$0xff] %v285_v15 }
  0x29 PF: > { %s13_s12 = sadd.s32 1, %s415_s12  }
  0x2a   : > { %p10_p4 = scmp.ge.s32.totalorder %s13_s12, 4  }
  0x2c   :  { %12 = sbr.rel (!%p10_p4) target bundleno = 1 (0x1), region = 62 }

// kernel: _lambda_.11
= control target key start
LH: loop header
LB: loop body
LE: loop exit
PB: predicated region body
PF: predicated region fallthrough
CT: control target
= control target key end

     0   :  { %s460_s15 = smov 0   ;;  %s512_s0 = inlined_call_operand.vmem [shape: bf16[128,128], index: 0, kind: input, shape index: {}]   ;;  %s513_s1 = inlined_call_operand.vmem [shape: f32[1,128], index: 1, kind: input, shape index: {}]   ;;  %s514_s2 = inlined_call_operand.vmem [shape: f32[1,128], index: 2, kind: input, shape index: {}]   ;;  %s515_s3 = inlined_call_operand.vmem [shape: f32[128,128], index: 3, kind: input, shape index: {}, may-alias: {3,4}]   ;;  %s516_s4 = inlined_call_operand.vmem [shape: f32[128,128], index: 4, kind: output, shape index: {}, may-alias: {3,4}]  }
   0x1 LB: > { %s385_s16 = sadd.s32 4294967295, %s433_s15   ;;  %p389_p0 = scmp.ge.s32.totalorder %s433_s15, 1  ;;  %s433_s15 = sphi %s460_s15, %s14_s15  }
   0x2   : > { %p174_p1 = scmp.lt.s32.totalorder %s433_s15, 3 }
   0x4   : > { %p175_p2 = pnand %p389_p0, %p174_p1 }
   0x5   : > { %s390_s17 = sshll.u32 (!%p175_p2), %s385_s16, 3 }
   0x6   : > { %178 = sbr.rel (%p175_p2) target bundleno = 33 (0x21), region = 36  ;;  %p206_p3 = scmp.lt.s32.totalorder (!%p175_p2), %s390_s17, 15 }
   0xb   : > { %s518_s17 = smov (!%p206_p3, %s390_s17), 15  ;;  %v396_v0 = vld [vmem:[%s513_s1] ss:$0 sm:$0xff] }
   0xc   : > { %s391_s18 = sshll.u32 %s518_s17, 2  ;;  %s393_s24 = sshll.u32 %s518_s17, 3  ;;  %v397_v13 = vld [vmem:[%s514_s2] ss:$0 sm:$0xff] }
   0xd   : > { %s209_s21 = scalar_lea.vmem %s512_s0, %s391_s18  ;;  %s486_s29 = scalar_lea.vmem %s515_s3, %s393_s24 }
   0xe   : > { %v401_v1 = vld [vmem:[%s209_s21] sm:$0xff]   ;;  %v416_v2 = vld [vmem:[%s209_s21 + $0x8] sm:$0xff]   ;;  %v417_v3 = vld [vmem:[%s209_s21 + $0x10] sm:$0xff]   ;;  %s221_s6 = scalar_lea.vmem %s516_s4, %s393_s24 }
   0xf   : > { %v402_v4 = vunpack.c.l.bf16 %v401_v1  ;;  %v403_v5 = vunpack.c.h.bf16 %v401_v1  ;;  %v406_v6 = vunpack.c.l.bf16 %v416_v2  ;;  %v407_v7 = vunpack.c.h.bf16 %v416_v2  ;;  %v418_v8 = vld [vmem:[%s209_s21 + $0x18] sm:$0xff]   ;;  %v293_v30 = vld [vmem:[%s486_s29] sm:$0xff]  ;;  %v294_v31 = vld [vmem:[%s486_s29 + $0x8] sm:$0xff] }
  0x10   : > { %v410_v9 = vunpack.c.l.bf16 %v417_v3  ;;  %v411_v10 = vunpack.c.h.bf16 %v417_v3  ;;  %v414_v11 = vunpack.c.l.bf16 %v418_v8  ;;  %v415_v12 = vunpack.c.h.bf16 %v418_v8  ;;  %v295_v35 = vld [vmem:[%s486_s29 + $0x10] sm:$0xff]  ;;  %v296_v36 = vld [vmem:[%s486_s29 + $0x18] sm:$0xff]  ;;  %v297_v44 = vld [vmem:[%s486_s29 + $0x20] sm:$0xff] }
  0x11   : > { %v246_v14 = vmul.f32 %v402_v4, %v396_v0  ;;  %v247_v15 = vmul.f32 %v403_v5, %v396_v0  ;;  %v248_v16 = vmul.f32 %v406_v6, %v396_v0  ;;  %v249_v17 = vmul.f32 %v407_v7, %v396_v0  ;;  %v298_v45 = vld [vmem:[%s486_s29 + $0x28] sm:$0xff]  ;;  %v299_v50 = vld [vmem:[%s486_s29 + $0x30] sm:$0xff]  ;;  %v300_v51 = vld [vmem:[%s486_s29 + $0x38] sm:$0xff] }
  0x12   : > { %v250_v18 = vmul.f32 %v410_v9, %v396_v0  ;;  %v251_v19 = vmul.f32 %v411_v10, %v396_v0  ;;  %v252_v20 = vmul.f32 %v414_v11, %v396_v0  ;;  %v253_v21 = vmul.f32 %v415_v12, %v396_v0 }
  0x13   : > { %v261_v22 = vadd.f32 %v397_v13, %v246_v14  ;;  %v262_v23 = vadd.f32 %v397_v13, %v247_v15  ;;  %v263_v24 = vadd.f32 %v397_v13, %v248_v16  ;;  %v264_v25 = vadd.f32 %v397_v13, %v249_v17 }
  0x14   : > { %v265_v26 = vadd.f32 %v397_v13, %v250_v18  ;;  %v266_v27 = vadd.f32 %v397_v13, %v251_v19  ;;  %v267_v28 = vadd.f32 %v397_v13, %v252_v20  ;;  %v268_v29 = vadd.f32 %v397_v13, %v253_v21 }
  0x15   : > { %vm269_vm0 = vcmp.ge.f32.partialorder %v261_v22, 0.0  ;;  %vm270_vm1 = vcmp.ge.f32.partialorder %v262_v23, 0.0  ;;  %vm271_vm2 = vcmp.ge.f32.partialorder %v263_v24, 0.0  ;;  %vm272_vm3 = vcmp.ge.f32.partialorder %v264_v25, 0.0 }
  0x16   : > { %vm273_vm4 = vcmp.ge.f32.partialorder %v265_v26, 0.0  ;;  %vm274_vm5 = vcmp.ge.f32.partialorder %v266_v27, 0.0  ;;  %vm275_vm6 = vcmp.ge.f32.partialorder %v267_v28, 0.0  ;;  %vm276_vm7 = vcmp.ge.f32.partialorder %v268_v29, 0.0 }
  0x17   : > { %v277_v32 = vmul.f32 0.2, %v261_v22  ;;  %v278_v33 = vmul.f32 0.2, %v262_v23  ;;  %v279_v34 = vmul.f32 0.2, %v263_v24 }
  0x18   : > { %v280_v37 = vmul.f32 0.2, %v264_v25  ;;  %v281_v38 = vmul.f32 0.2, %v265_v26  ;;  %v282_v39 = vmul.f32 0.2, %v266_v27 }
  0x19   : > { %v283_v40 = vmul.f32 0.2, %v267_v28  ;;  %v284_v41 = vmul.f32 0.2, %v268_v29  ;;  %v285_v42 = vsel %vm269_vm0, %v261_v22, %v277_v32  ;;  %v286_v43 = vsel %vm270_vm1, %v262_v23, %v278_v33 }
  0x1a   : > { %v287_v46 = vsel %vm271_vm2, %v263_v24, %v279_v34  ;;  %v288_v47 = vsel %vm272_vm3, %v264_v25, %v280_v37  ;;  %v289_v48 = vsel %vm273_vm4, %v265_v26, %v281_v38  ;;  %v290_v49 = vsel %vm274_vm5, %v266_v27, %v282_v39 }
  0x1b   : > { %v291_v52 = vsel %vm275_vm6, %v267_v28, %v283_v40  ;;  %v292_v53 = vsel %vm276_vm7, %v268_v29, %v284_v41  ;;  %v301_v54 = vadd.f32 %v293_v30, %v285_v42  ;;  %v302_v55 = vadd.f32 %v294_v31, %v286_v43 }
  0x1c   : > { %v303_v56 = vadd.f32 %v295_v35, %v287_v46  ;;  %v304_v57 = vadd.f32 %v296_v36, %v288_v47  ;;  %v305_v58 = vadd.f32 %v297_v44, %v289_v48  ;;  %v306_v59 = vadd.f32 %v298_v45, %v290_v49 }
  0x1d   : > { %v307_v60 = vadd.f32 %v299_v50, %v291_v52  ;;  %v308_v61 = vadd.f32 %v300_v51, %v292_v53  ;;  %309 = vst [vmem:[%s221_s6] sm:$0xff] %v301_v54  ;;  %310 = vst [vmem:[%s221_s6 + $0x8] sm:$0xff] %v302_v55 }
  0x1e   : > { %311 = vst [vmem:[%s221_s6 + $0x10] sm:$0xff] %v303_v56  ;;  %312 = vst [vmem:[%s221_s6 + $0x18] sm:$0xff] %v304_v57 }
  0x1f   : > { %313 = vst [vmem:[%s221_s6 + $0x20] sm:$0xff] %v305_v58  ;;  %314 = vst [vmem:[%s221_s6 + $0x28] sm:$0xff] %v306_v59 }
  0x20   : > { %315 = vst [vmem:[%s221_s6 + $0x30] sm:$0xff] %v307_v60  ;;  %316 = vst [vmem:[%s221_s6 + $0x38] sm:$0xff] %v308_v61 }
  0x21 PF: > { %s14_s15 = sadd.s32 1, %s433_s15  }
  0x22   : > { %p11_p4 = scmp.ge.s32.totalorder %s14_s15, 4  }
  0x24   :  { %13 = sbr.rel (!%p11_p4) target bundleno = 1 (0x1), region = 69 }

// kernel: _lambda_.8
= control target key start
LH: loop header
LB: loop body
LE: loop exit
PB: predicated region body
PF: predicated region fallthrough
CT: control target
= control target key end

     0   :  { %s3378_s18 = smov 0   ;;  %s3380_s19 = smov 0   ;;  %s4335_s0 = inlined_call_operand.vmem [shape: bf16[336,128], index: 0, kind: input, shape index: {}, may-alias: {0,1}]   ;;  %s4336_s1 = inlined_call_operand.vmem [shape: bf16[336,128], index: 1, kind: input, shape index: {}, may-alias: {0,1}]   ;;  %s4337_s2 = inlined_call_operand.vmem [shape: bf16[1152,128], index: 2, kind: input, shape index: {}]   ;;  %s4338_s3 = inlined_call_operand.vmem [shape: f32[224,1], index: 3, kind: input, shape index: {}]   ;;  %s4339_s4 = inlined_call_operand.vmem [shape: bf16[224,128], index: 4, kind: output, shape index: {0}]   ;;  %s4340_s5 = inlined_call_operand.vmem [shape: f32[16,128], index: 5, kind: output, shape index: {1}]  }
   0x1   :  { %s3382_s20 = smov 0  }
   0x2 LB: > { %s28_s21 = sadd.s32 1, %s3339_s19  ;;  %p2499_p0 = scmp.ge.s32.totalorder %s3343_s20, 1  ;;  %s3343_s20 = sphi %s3382_s20, %s16_s20   ;;  %s3339_s19 = sphi %s3380_s19, %s4342_s19   ;;  %s3335_s18 = sphi %s3378_s18, %s4341_s18  }
   0x3   : > { %p30_p1 = scmp.ge.s32.totalorder %s28_s21, 2  ;;  %p243_p2 = scmp.lt.s32.totalorder %s3343_s20, 3 }
   0x5   : > { %s4344_s21 = smov (%p30_p1, %s28_s21), 0  ;;  %p244_p3 = pnand %p2499_p0, %p243_p2 }
   0x6   : > { %s3407_s26 = smul.u32 (!%p244_p3), 14, %s3335_s18  ;;  %s299_s27 = sadd.s32 (!%p244_p3), 1, %s3335_s18 }
   0x7   : > { %247 = sbr.rel (%p244_p3) target bundleno = 516 (0x204), region = 36  ;;  %p324_p7 = scmp.lt.s32.totalorder (!%p244_p3), %s3335_s18, 1 }
   0x8   : > { %p292_p4 = scmp.lt.s32.totalorder (!%p244_p3), %s3407_s26, 41  ;;  %s300_s6 = smul.u32 (!%p244_p3), 14, %s299_s27 }
   0x9   : > { %p310_p6 = scmp.lt.s32.totalorder (!%p244_p3), %s3407_s26, 27 }
   0xa   : > { %p301_p5 = scmp.lt.s32.totalorder (!%p244_p3), %s300_s6, 41 }
   0xc   : > { %v3233_v0 = vld [vmem:[%s4337_s2 + $0x78] sm:$0xff]   ;;  %v3345_v1 = vmov 0.0   ;;  %v3234_v2 = vld [vmem:[%s4337_s2 + $0x70] sm:$0xff]   ;;  %vm3346_vm0 = vmmov 0   ;;  %v3235_v3 = vld [vmem:[%s4337_s2 + $0x68] sm:$0xff]   ;;  %s293_s30 = scalar_select %p292_p4, %s3407_s26, 41 }
   0xd   : > { %2792 = vmatprep.subr.bf16.mxu0 %v3345_v1  ;;  %3188 = vmatprep.subr.bf16.mxu1 %v3345_v1  ;;  %v3236_v4 = vld [vmem:[%s4337_s2 + $0x60] sm:$0xff]   ;;  %v3237_v7 = vld [vmem:[%s4337_s2 + $0x58] sm:$0xff]   ;;  %s4346_s6 = smov (!%p301_p5, %s300_s6), 41  ;;  %v3238_v12 = vld [vmem:[%s4337_s2 + $0x50] sm:$0xff]   ;;  %vm431_vm1 = vsmask.f32 7424 }
   0xe   : > { %2793 = vmatpush3.bf16.msra.mxu0 %v3233_v0  ;;  %3196 = vmatpush3.bf16.msra.mxu1 %v3233_v0  ;;  %s2500_s9 = sshll.u32 %s293_s30, 2  ;;  %s2501_s17 = sshll.u32 %s4346_s6, 2  ;;  %v3239_v15 = vld [vmem:[%s4337_s2 + $0x48] sm:$0xff]   ;;  %v3240_v20 = vld [vmem:[%s4337_s2 + $0x40] sm:$0xff]   ;;  %v3245_v27 = vld [vmem:[%s4337_s2 + $0x38] sm:$0xff]   ;;  %vm789_vm2 = vcmask 1046528  }
   0xf   : > { %2794 = vmatprep.subr.bf16.mxu0 %v3345_v1  ;;  %3189 = vmatprep.subr.bf16.mxu1 %v3345_v1  ;;  %s3429_s12 = scalar_lea.vmem %s4335_s0, %s2500_s9  ;;  %s3489_s29 = scalar_lea.vmem %s4336_s1, %s2501_s17  ;;  %v3246_v28 = vld [vmem:[%s4337_s2 + $0xb8] sm:$0xff]   ;;  %v3247_v35 = vld [vmem:[%s4337_s2 + $0x30] sm:$0xff]   ;;  %v3250_v43 = vld [vmem:[%s4337_s2 + $0x28] sm:$0xff]   ;;  %vm979_vm3 = vcmask 1042432   ;;  %vm1169_vm4 = vsmask.f32 2304 }
  0x10   : > { %2808 = vmatprep.mubr.msk.bf16.mxu0 %vm3346_vm0, %v3345_v1  ;;  %2824 = vmatprep.mubr.msk.bf16.mxu1 %vm3346_vm0, %v3345_v1  ;;  %v3434_v5 = vld [vmem:[%s3429_s12] sm:$0xff]   ;;  %v3445_v8 = vld [vmem:[%s3429_s12 + $0x8] sm:$0xff]   ;;  %v3481_v21 = vld [vmem:[%s3429_s12 + $0x10] sm:$0xff]   ;;  %vm1377_vm5 = vcmask 1041408   ;;  %vm1567_vm6 = vcmask 1045504   ;;  %s4348_s26 = smov (!%p310_p6, %s3407_s26), 27 }
  0x11   : > { %v3437_v6 = vld [vmem:[%s3429_s12 + $0x20] sm:$0xff]   ;;  %v435_v9 = vshll.u32 %v3434_v5, 16  ;;  %v3449_v10 = vld [vmem:[%s3429_s12 + $0x28] sm:$0xff]   ;;  %v433_v13 = vshrl.u32 %v3434_v5, 16  ;;  %v3461_v14 = vshll.u32 %v3445_v8, 16  ;;  %v3484_v22 = vld [vmem:[%s3429_s12 + $0x30] sm:$0xff]  }
  0x12   : > { %2795 = vmatpush3.bf16.msra.mxu0 %v3234_v2  ;;  %3197 = vmatpush3.bf16.msra.mxu1 %v3234_v2  ;;  %v3452_v11 = vshll.u32 %v3437_v6, 16  ;;  %v3470_v18 = vshrl.u32 %v3437_v6, 16  ;;  %v3473_v19 = vshll.u32 %v3449_v10, 16  ;;  %v3507_v29 = vshrl.u32 %v3445_v8, 16  ;;  %v3248_v36 = vld [vmem:[%s4337_s2 + $0xb0] sm:$0xff]   ;;  %v3530_v38 = vld [vmem:[%s3429_s12 + $0x18] sm:$0xff]  }
  0x13   : > { %2796 = vmatprep.subr.bf16.mxu0 %v3345_v1  ;;  %3190 = vmatprep.subr.bf16.mxu1 %v3345_v1  ;;  %v437_v16 = vrot.slane %v435_v9, 1  ;;  %v442_v24 = vrot.slane %v3461_v14, 1  ;;  %v3510_v30 = vshll.u32 %v3481_v21, 16  ;;  %v3513_v31 = vshrl.u32 %v3449_v10, 16  ;;  %v3536_v42 = vld [vmem:[%s3489_s29] sm:$0xff]   ;;  %v3251_v44 = vld [vmem:[%s4337_s2 + $0xa8] sm:$0xff]  }
  0x14   : > { %v466_v17 = vrot.slane %v3452_v11, 1  ;;  %v474_v26 = vrot.slane %v3473_v19, 1  ;;  %v3516_v32 = vshll.u32 %v3484_v22, 16  ;;  %v3551_v45 = vshrl.u32 %v3481_v21, 16  ;;  %v3253_v51 = vld [vmem:[%s4337_s2 + $0x20] sm:$0xff]   ;;  %v3256_v59 = vld [vmem:[%s4337_s2 + $0x18] sm:$0xff]  }
  0x15   : > { %v438_v23 = vor.u32 %v437_v16, %v433_v13  ;;  %v450_v37 = vrot.slane %v3510_v30, 1  ;;  %v446_v39 = vor.u32 %v3507_v29, %v442_v24  ;;  %v3554_v46 = vshll.u32 %v3530_v38, 16  ;;  %v3254_v53 = vld [vmem:[%s4337_s2 + $0xa0] sm:$0xff]   ;;  %v3257_v62 = vld [vmem:[%s4337_s2 + $0x98] sm:$0xff]   ;;  %v3259_v2 = vld [vmem:[%s4337_s2 + $0x10] sm:$0xff]   ;;  %s2502_s16 = sshll.u32 %s4348_s26, 3 }
  0x16   : > { %2797 = vmatpush3.bf16.msra.mxu0 %v3235_v3  ;;  %3198 = vmatpush3.bf16.msra.mxu1 %v3235_v3  ;;  %v470_v25 = vor.u32 %v3470_v18, %v466_v17  ;;  %v478_v40 = vor.u32 %v3513_v31, %v474_v26  ;;  %v482_v41 = vrot.slane %v3516_v32, 1  ;;  %v3559_v49 = vshrl.u32 %v3484_v22, 16  ;;  %v3260_v3 = vld [vmem:[%s4337_s2 + $0x90] sm:$0xff]   ;;  %v3264_v16 = vld [vmem:[%s4337_s2 + $0x80] sm:$0xff]   ;;  %s3916_s28 = scalar_lea.vmem %s4338_s3, %s2502_s16  ;;  %s4350_s18 = smov (!%p324_p7, %s3335_s18), 1 }
  0x17   : > { %2798 = vmatprep.subr.bf16.mxu0 %v3345_v1  ;;  %3191 = vmatprep.subr.bf16.mxu1 %v3345_v1  ;;  %v443_v33 = vsel %vm431_vm1, %v438_v23, %v442_v24  ;;  %v451_v47 = vsel %vm431_vm1, %v446_v39, %v450_v37  ;;  %v3562_v50 = vshll.u32 %v3536_v42, 16  ;;  %v3571_v52 = vrot.slane %v433_v13, 5  ;;  %v3263_v13 = vld [vmem:[%s4337_s2] sm:$0xff]   ;;  %v3266_v23 = vld [vmem:[%s4337_s2 + $0x138] sm:$0xff]  }
  0x18   : > { %v475_v34 = vsel %vm431_vm1, %v470_v25, %v474_v26  ;;  %v483_v48 = vsel %vm431_vm1, %v478_v40, %v482_v41  ;;  %v454_v54 = vor.u32 %v3551_v45, %v450_v37  ;;  %v458_v55 = vrot.slane %v3554_v46, 1  ;;  %v3267_v26 = vld [vmem:[%s4337_s2 + $0xf0] sm:$0xff]   ;;  %v3272_v37 = vld [vmem:[%s4337_s2 + $0x120] sm:$0xff]   ;;  %v3273_v39 = vld [vmem:[%s4337_s2 + $0xd8] sm:$0xff]  }
  0x19   : > { %v486_v56 = vor.u32 %v3559_v49, %v482_v41  ;;  %v490_v57 = vrot.slane %v3562_v50, 1  ;;  %v3584_v58 = vrot.slane %v435_v9, 6  ;;  %v3601_v0 = vshrl.u32 %v3530_v38, 16  ;;  %v3274_v41 = vld [vmem:[%s4337_s2 + $0x118] sm:$0xff]  }
  0x1a   : > { %2799 = vmatpush3.bf16.msra.mxu0 %v3236_v4  ;;  %3199 = vmatpush3.bf16.msra.mxu1 %v3236_v4  ;;  %v459_v61 = vsel %vm431_vm1, %v454_v54, %v458_v55  ;;  %v793_v25 = vrot.slane %v3481_v21, 1  ;;  %v799_v54 = vrot.slane %v3449_v10, 1  ;;  %vm1757_vm7 = vsmask.f32 5376 }
  0x1b   : > { %2800 = vmatprep.subr.bf16.mxu0 %v3345_v1  ;;  %3192 = vmatprep.subr.bf16.mxu1 %v3345_v1  ;;  %v1172_v60 = vor.u32 %v3584_v58, %v3571_v52  ;;  %v491_v63 = vsel %vm431_vm1, %v486_v56, %v490_v57  ;;  %v462_v4 = vor.u32 %v3601_v0, %v458_v55  ;;  %v3279_v55 = vld [vmem:[%s4337_s2 + $0xc0] sm:$0xff]   ;;  %v983_v52 = vrot.slane %v3481_v21, 5 }
  0x1c   : > { %v3280_v56 = vld [vmem:[%s4337_s2 + $0x100] sm:$0xff]   ;;  %vm1968_vm8 = vcmask 1044480   ;;  %vm2367_vm9 = vcmask 1040384  }
  0x1d   : > { %v467_v9 = vsel %vm431_vm1, %v462_v4, %v466_v17  ;;  %v791_v17 = vrot.slane %v3445_v8, 1  ;;  %v980_v4 = vrot.slane %v3434_v5, 5 }
  0x1e   : > { %2801 = vmatpush3.bf16.msra.mxu0 %v3237_v7  ;;  %3200 = vmatpush3.bf16.msra.mxu1 %v3237_v7  ;;  %v3261_v7 = vld [vmem:[%s4337_s2 + $0x8] sm:$0xff]  }
  0x1f   : > { %2802 = vmatprep.subr.bf16.mxu0 %v3345_v1  ;;  %3193 = vmatprep.subr.bf16.mxu1 %v3345_v1 }
  0x22   : > { %2803 = vmatpush3.bf16.msra.mxu0 %v3238_v12  ;;  %3201 = vmatpush3.bf16.msra.mxu1 %v3238_v12  ;;  %v3262_v12 = vld [vmem:[%s4337_s2 + $0x88] sm:$0xff]  }
  0x23   : > { %2804 = vmatprep.subr.bf16.mxu0 %v3345_v1  ;;  %3194 = vmatprep.subr.bf16.mxu1 %v3345_v1 }
  0x26   : > { %2805 = vmatpush3.bf16.msra.mxu0 %v3239_v15  ;;  %3202 = vmatpush3.bf16.msra.mxu1 %v3239_v15  ;;  %v790_v15 = vrot.slane %v3434_v5, 1 }
  0x27   : > { %2806 = vmatprep.subr.bf16.mxu0 %v3345_v1  ;;  %3195 = vmatprep.subr.bf16.mxu1 %v3345_v1 }
  0x28   : > { %v792_v24 = vsel %vm789_vm2, %v790_v15, %v791_v17  ;;  %v3281_v15 = vld [vmem:[%s4337_s2 + $0x178] sm:$0xff]  }
  0x2a   : > { %2807 = vmatpush3.bf16.msra.mxu0 %v3240_v20  ;;  %3203 = vmatpush3.bf16.msra.mxu1 %v3240_v20  ;;  %v3265_v20 = vld [vmem:[%s4337_s2 + $0xf8] sm:$0xff]  }
  0x2b   : > { %2836 = vmatprep.subr.bf16.mxu1 %v3345_v1  ;;  %2880 = vmatprep.subr.bf16.mxu0 %v3345_v1 }
  0x2d   : > { %2809 = vmatmul.mubr.bf16.vlgmr.msra.gmra.mxu0 %v443_v33  ;;  %2825 = vmatmul.mubr.bf16.vlgmr.msra.gmra.mxu1 %v475_v34  ;;  %v3269_v33 = vld [vmem:[%s4337_s2 + $0xe8] sm:$0xff]  }
  0x2e   : > { %2837 = vmatpush3.bf16.msra.mxu1 %v3245_v27  ;;  %2881 = vmatpush3.bf16.msra.mxu0 %v3246_v28  ;;  %v3268_v27 = vld [vmem:[%s4337_s2 + $0x130] sm:$0xff]   ;;  %v794_v28 = vsel %vm789_vm2, %v791_v17, %v793_v25  ;;  %v3270_v34 = vld [vmem:[%s4337_s2 + $0x128] sm:$0xff]   ;;  %v1177_v17 = vrot.slane %v3551_v45, 5 }
  0x2f   : > { %2838 = vmatprep.subr.bf16.mxu1 %v3345_v1  ;;  %2882 = vmatprep.subr.bf16.mxu0 %v3345_v1 }
  0x30   : > { %2812 = vmatprep.mubr.msk.bf16.mxu0 %vm3346_vm0, %v3345_v1  ;;  %2828 = vmatprep.mubr.msk.bf16.mxu1 %vm3346_vm0, %v3345_v1 }
  0x32   : > { %2839 = vmatpush3.bf16.msra.mxu1 %v3247_v35  ;;  %2883 = vmatpush3.bf16.msra.mxu0 %v3248_v36  ;;  %v795_v35 = vrot.slane %v3530_v38, 1  ;;  %v3271_v36 = vld [vmem:[%s4337_s2 + $0xe0] sm:$0xff]  }
  0x33   : > { %2840 = vmatprep.subr.bf16.mxu1 %v3345_v1  ;;  %2884 = vmatprep.subr.bf16.mxu0 %v3345_v1 }
  0x34   : > { %v796_v40 = vsel %vm789_vm2, %v793_v25, %v795_v35 }
  0x35   : > { %2813 = vmatmul.mubr.bf16.gmra.mxu0 %v451_v47  ;;  %2829 = vmatmul.mubr.bf16.gmra.mxu1 %v483_v48  ;;  %v3276_v47 = vld [vmem:[%s4337_s2 + $0x110] sm:$0xff]  }
  0x36   : > { %2841 = vmatpush3.bf16.msra.mxu1 %v3250_v43  ;;  %2885 = vmatpush3.bf16.msra.mxu0 %v3251_v44  ;;  %v797_v43 = vrot.slane %v3437_v6, 1  ;;  %v3275_v44 = vld [vmem:[%s4337_s2 + $0xd0] sm:$0xff]  }
  0x37   : > { %2842 = vmatprep.subr.bf16.mxu1 %v3345_v1  ;;  %2886 = vmatprep.subr.bf16.mxu0 %v3345_v1 }
  0x38   : > { %2816 = vmatprep.mubr.msk.bf16.mxu0 %vm3346_vm0, %v3345_v1  ;;  %2832 = vmatprep.mubr.msk.bf16.mxu1 %vm3346_vm0, %v3345_v1  ;;  %v798_v48 = vsel %vm789_vm2, %v795_v35, %v797_v43  ;;  %v800_v57 = vsel %vm789_vm2, %v797_v43, %v799_v54  ;;  %v1186_v43 = vrot.slane %v3452_v11, 6 }
  0x3a   : > { %2843 = vmatpush3.bf16.msra.mxu1 %v3253_v51  ;;  %2887 = vmatpush3.bf16.msra.mxu0 %v3254_v53  ;;  %v3277_v51 = vld [vmem:[%s4337_s2 + $0xc8] sm:$0xff]  }
  0x3b   : > { %2844 = vmatprep.subr.bf16.mxu1 %v3345_v1  ;;  %2888 = vmatprep.subr.bf16.mxu0 %v3345_v1  ;;  %v3278_v53 = vld [vmem:[%s4337_s2 + $0x108] sm:$0xff]  }
  0x3d   : > { %2817 = vmatmul.mubr.bf16.gmra.mxu0 %v459_v61  ;;  %2833 = vmatmul.mubr.bf16.gmra.mxu1 %v491_v63 }
  0x3e   : > { %2845 = vmatpush3.bf16.msra.mxu1 %v3256_v59  ;;  %2889 = vmatpush3.bf16.msra.mxu0 %v3257_v62  ;;  %v801_v59 = vrot.slane %v3484_v22, 1  ;;  %v803_v62 = vrot.slane %v3536_v42, 1 }
  0x3f   : > { %2846 = vmatprep.subr.bf16.mxu1 %v3345_v1  ;;  %2890 = vmatprep.subr.bf16.mxu0 %v3345_v1 }
  0x40   : > { %2820 = vmatprep.mubr.msk.bf16.mxu0 %vm3346_vm0, %v3345_v1  ;;  %2852 = vmatprep.mubr.msk.bf16.mxu1 %vm3346_vm0, %v3345_v1  ;;  %v802_v61 = vsel %vm789_vm2, %v799_v54, %v801_v59  ;;  %v804_v63 = vsel %vm789_vm2, %v801_v59, %v803_v62  ;;  %v3292_v54 = vld [vmem:[%s4337_s2 + $0x190] sm:$0xff]   ;;  %v3293_v59 = vld [vmem:[%s4337_s2 + $0x148] sm:$0xff]   ;;  %v989_v62 = vrot.slane %v3449_v10, 5 }
  0x42   : > { %2847 = vmatpush3.bf16.msra.mxu1 %v3259_v2  ;;  %2891 = vmatpush3.bf16.msra.mxu0 %v3260_v3  ;;  %v1173_v2 = vrot.slane %v3507_v29, 5  ;;  %v1174_v3 = vrot.slane %v3461_v14, 6 }
  0x43   : > { %2848 = vmatprep.subr.bf16.mxu1 %v3345_v1  ;;  %2892 = vmatprep.subr.bf16.mxu0 %v3345_v1 }
  0x45   : > { %2821 = vmatmul.mubr.bf16.gmra.mxu0 %v467_v9  ;;  %v1175_v9 = vor.u32 %v1174_v3, %v1173_v2  ;;  %v3295_v2 = vld [vmem:[%s4337_s2 + $0x140] sm:$0xff]  }
  0x46   : > { %2849 = vmatpush3.bf16.msra.mxu1 %v3261_v7  ;;  %2893 = vmatpush3.bf16.msra.mxu0 %v3262_v12  ;;  %v981_v7 = vrot.slane %v3445_v8, 5  ;;  %v3296_v3 = vld [vmem:[%s4337_s2 + $0x180] sm:$0xff]  }
  0x47   : > { %2850 = vmatprep.subr.bf16.mxu1 %v3345_v1  ;;  %2894 = vmatprep.subr.bf16.mxu0 %v3345_v1 }
  0x48   : > { %2896 = vmatprep.mubr.msk.bf16.mxu0 %vm3346_vm0, %v3345_v1  ;;  %v982_v12 = vsel %vm979_vm3, %v980_v4, %v981_v7 }
  0x4a   : > { %2851 = vmatpush3.bf16.msra.mxu1 %v3263_v13  ;;  %2895 = vmatpush3.bf16.msra.mxu0 %v3264_v16  ;;  %v1176_v13 = vsel %vm1169_vm4, %v1172_v60, %v1175_v9  ;;  %v3282_v16 = vld [vmem:[%s4337_s2 + $0x1b8] sm:$0xff]   ;;  %v3283_v60 = vld [vmem:[%s4337_s2 + $0x170] sm:$0xff]  }
  0x4b   : > { %2924 = vmatprep.subr.bf16.mxu1 %v3345_v1  ;;  %2968 = vmatprep.subr.bf16.mxu0 %v3345_v1 }
  0x4d   : > { %2853 = vmatmul.mubr.bf16.vlgmr.msra.gmra.mxu1 %v3434_v5  ;;  %2897 = vmatmul.mubr.bf16.vlgmr.msra.gmra.mxu0 %v792_v24  ;;  %v984_v24 = vsel %vm979_vm3, %v981_v7, %v983_v52 }
  0x4e   : > { %2925 = vmatpush3.bf16.msra.mxu1 %v3265_v20  ;;  %2969 = vmatpush3.bf16.msra.mxu0 %v3266_v23  ;;  %v1178_v20 = vrot.slane %v3510_v30, 6  ;;  %v3284_v23 = vld [vmem:[%s4337_s2 + $0x1b0] sm:$0xff]  }
  0x4f   : > { %2856 = vmatprep.mubr.msk.bf16.mxu1 %vm3346_vm0, %v3345_v1  ;;  %2900 = vmatprep.mubr.msk.bf16.mxu0 %vm3346_vm0, %v3345_v1 }
  0x50   : > { %2926 = vmatprep.subr.bf16.mxu1 %v3345_v1  ;;  %2970 = vmatprep.subr.bf16.mxu0 %v3345_v1  ;;  %v1179_v58 = vor.u32 %v1178_v20, %v1177_v17 }
  0x52   : > { %2927 = vmatpush3.bf16.msra.mxu1 %v3267_v26  ;;  %2971 = vmatpush3.bf16.msra.mxu0 %v3268_v27  ;;  %v1180_v25 = vsel %vm1169_vm4, %v1175_v9, %v1179_v58  ;;  %v1181_v26 = vrot.slane %v3601_v0, 5  ;;  %v1182_v27 = vrot.slane %v3554_v46, 6  ;;  %v1194_v9 = vrot.slane %v3516_v32, 6 }
  0x53   : > { %2928 = vmatprep.subr.bf16.mxu1 %v3345_v1  ;;  %2972 = vmatprep.subr.bf16.mxu0 %v3345_v1 }
  0x54   : > { %v1183_v35 = vor.u32 %v1182_v27, %v1181_v26  ;;  %v1568_v26 = vrot.slane %v3445_v8, 2  ;;  %v1569_v27 = vrot.slane %v3481_v21, 2 }
  0x55   : > { %2857 = vmatmul.mubr.bf16.gmra.mxu1 %v3445_v8  ;;  %2901 = vmatmul.mubr.bf16.gmra.mxu0 %v794_v28  ;;  %v3285_v28 = vld [vmem:[%s4337_s2 + $0x168] sm:$0xff]  }
  0x56   : > { %2860 = vmatprep.mubr.msk.bf16.mxu1 %vm3346_vm0, %v3345_v1  ;;  %2904 = vmatprep.mubr.msk.bf16.mxu0 %vm3346_vm0, %v3345_v1 }
  0x57   : > { %2929 = vmatpush3.bf16.msra.mxu1 %v3269_v33  ;;  %2973 = vmatpush3.bf16.msra.mxu0 %v3270_v34  ;;  %v3286_v33 = vld [vmem:[%s4337_s2 + $0x1a8] sm:$0xff]   ;;  %v985_v34 = vrot.slane %v3530_v38, 5 }
  0x58   : > { %2930 = vmatprep.subr.bf16.mxu1 %v3345_v1  ;;  %2974 = vmatprep.subr.bf16.mxu0 %v3345_v1 }
  0x5b   : > { %2931 = vmatpush3.bf16.msra.mxu1 %v3271_v36  ;;  %2975 = vmatpush3.bf16.msra.mxu0 %v3272_v37  ;;  %v3287_v36 = vld [vmem:[%s4337_s2 + $0x160] sm:$0xff]  }
  0x5c   : > { %2932 = vmatprep.subr.bf16.mxu1 %v3345_v1  ;;  %2976 = vmatprep.subr.bf16.mxu0 %v3345_v1  ;;  %v3288_v37 = vld [vmem:[%s4337_s2 + $0x1a0] sm:$0xff]  }
  0x5d   : > { %2861 = vmatmul.mubr.bf16.gmra.mxu1 %v3481_v21  ;;  %2905 = vmatmul.mubr.bf16.gmra.mxu0 %v796_v40  ;;  %v1184_v40 = vsel %vm1169_vm4, %v1179_v58, %v1183_v35 }
  0x5e   : > { %2864 = vmatprep.mubr.msk.bf16.mxu1 %vm3346_vm0, %v3345_v1  ;;  %2908 = vmatprep.mubr.msk.bf16.mxu0 %vm3346_vm0, %v3345_v1 }
  0x5f   : > { %2933 = vmatpush3.bf16.msra.mxu1 %v3273_v39  ;;  %2977 = vmatpush3.bf16.msra.mxu0 %v3274_v41  ;;  %v986_v39 = vsel %vm979_vm3, %v983_v52, %v985_v34  ;;  %v1185_v41 = vrot.slane %v3470_v18, 5  ;;  %v1200_v52 = vrot.slane %v3562_v50, 6 }
  0x60   : > { %2934 = vmatprep.subr.bf16.mxu1 %v3345_v1  ;;  %2978 = vmatprep.subr.bf16.mxu0 %v3345_v1 }
  0x63   : > { %2935 = vmatpush3.bf16.msra.mxu1 %v3275_v44  ;;  %2979 = vmatpush3.bf16.msra.mxu0 %v3276_v47  ;;  %v3289_v44 = vld [vmem:[%s4337_s2 + $0x158] sm:$0xff]  }
  0x64   : > { %2936 = vmatprep.subr.bf16.mxu1 %v3345_v1  ;;  %2980 = vmatprep.subr.bf16.mxu0 %v3345_v1  ;;  %v3290_v47 = vld [vmem:[%s4337_s2 + $0x198] sm:$0xff]  }
  0x65   : > { %2865 = vmatmul.mubr.bf16.gmra.mxu1 %v3530_v38  ;;  %2909 = vmatmul.mubr.bf16.gmra.mxu0 %v798_v48  ;;  %v987_v48 = vrot.slane %v3437_v6, 5 }
  0x66   : > { %2868 = vmatprep.mubr.msk.bf16.mxu1 %vm3346_vm0, %v3345_v1  ;;  %2912 = vmatprep.mubr.msk.bf16.mxu0 %vm3346_vm0, %v3345_v1 }
  0x67   : > { %2937 = vmatpush3.bf16.msra.mxu1 %v3277_v51  ;;  %2981 = vmatpush3.bf16.msra.mxu0 %v3278_v53  ;;  %v1187_v51 = vor.u32 %v1186_v43, %v1185_v41  ;;  %v3291_v53 = vld [vmem:[%s4337_s2 + $0x150] sm:$0xff]   ;;  %v990_v4 = vsel %vm979_vm3, %v987_v48, %v989_v62 }
  0x68   : > { %2938 = vmatprep.subr.bf16.mxu1 %v3345_v1  ;;  %2982 = vmatprep.subr.bf16.mxu0 %v3345_v1 }
  0x6b   : > { %2939 = vmatpush3.bf16.msra.mxu1 %v3279_v55  ;;  %2983 = vmatpush3.bf16.msra.mxu0 %v3280_v56  ;;  %v988_v55 = vsel %vm979_vm3, %v985_v34, %v987_v48  ;;  %v1188_v56 = vsel %vm1169_vm4, %v1183_v35, %v1187_v51  ;;  %v1381_v34 = vrot.slane %v3481_v21, 6  ;;  %v1571_v35 = vrot.slane %v3530_v38, 2 }
  0x6c   : > { %3012 = vmatprep.subr.bf16.mxu1 %v3345_v1  ;;  %3056 = vmatprep.subr.bf16.mxu0 %v3345_v1  ;;  %v3347_v21 = vmov 0   ;;  %v1383_v48 = vrot.slane %v3530_v38, 6 }
  0x6d   : > { %2869 = vmatmul.mubr.bf16.gmra.mxu1 %v3437_v6  ;;  %2913 = vmatmul.mubr.bf16.gmra.mxu0 %v800_v57  ;;  %v1189_v6 = vrot.slane %v3513_v31, 5  ;;  %v1190_v57 = vrot.slane %v3473_v19, 6  ;;  %v1572_v43 = vsel %vm1567_vm6, %v1569_v27, %v1571_v35 }
  0x6e   : > { %2872 = vmatprep.mubr.msk.bf16.mxu1 %vm3346_vm0, %v3345_v1  ;;  %2916 = vmatprep.mubr.msk.bf16.mxu0 %vm3346_vm0, %v3345_v1  ;;  %v1384_v38 = vsel %vm1377_vm5, %v1381_v34, %v1383_v48 }
  0x6f   : > { %3231 = vset.pattern.permute.xlu0 %v3347_v21  ;;  %3232 = vset.pattern.permute.xlu1 %v3347_v21  ;;  %v2230_v21 = vld [vmem:[%s3916_s28 + $0x68] sm:$0xff] }
  0x75   : > { %2873 = vmatmul.mubr.bf16.gmra.mxu1 %v3449_v10  ;;  %2917 = vmatmul.mubr.bf16.gmra.mxu0 %v802_v61  ;;  %v3294_v61 = vld [vmem:[%s4337_s2 + $0x188] sm:$0xff]   ;;  %v1193_v10 = vrot.slane %v3559_v49, 5 }
  0x76   : > { %2876 = vmatprep.mubr.msk.bf16.mxu1 %vm3346_vm0, %v3345_v1  ;;  %2920 = vmatprep.mubr.msk.bf16.mxu0 %vm3346_vm0, %v3345_v1 }
  0x7d   : > { %2877 = vmatmul.mubr.bf16.gmra.mxu1 %v3484_v22  ;;  %2921 = vmatmul.mubr.bf16.gmra.mxu0 %v804_v63  ;;  %v1191_v63 = vor.u32 %v1190_v57, %v1189_v6  ;;  %v3304_v6 = vld [vmem:[%s4337_s2 + $0x220] sm:$0xff]  }
  0x7e   : > { %2940 = vmatprep.mubr.msk.bf16.mxu1 %vm3346_vm0, %v3345_v1  ;;  %2984 = vmatprep.mubr.msk.bf16.mxu0 %vm3346_vm0, %v3345_v1 }
  0x7f   : > { %v1192_v7 = vsel %vm1169_vm4, %v1187_v51, %v1191_v63  ;;  %v3942_v51 = vld [vmem:[%s3429_s12 + $0x20] sm:$0xff]  }
  0x85   : > { %2941 = vmatmul.mubr.bf16.vlgmr.msra.gmra.mxu1 %v982_v12  ;;  %2985 = vmatmul.mubr.bf16.vlgmr.msra.gmra.mxu0 %v1176_v13  ;;  %v991_v12 = vrot.slane %v3484_v22, 5  ;;  %v1195_v13 = vor.u32 %v1194_v9, %v1193_v10  ;;  %v993_v22 = vrot.slane %v3536_v42, 5  ;;  %v3308_v10 = vld [vmem:[%s4337_s2 + $0x210] sm:$0xff]  }
  0x86   : > { %3013 = vmatpush3.bf16.msra.mxu1 %v3281_v15  ;;  %3057 = vmatpush3.bf16.msra.mxu0 %v3282_v16  ;;  %v1197_v15 = vshrl.u32 %v3536_v42, 16 }
  0x87   : > { %2944 = vmatprep.mubr.msk.bf16.mxu1 %vm3346_vm0, %v3345_v1  ;;  %2988 = vmatprep.mubr.msk.bf16.mxu0 %vm3346_vm0, %v3345_v1  ;;  %v992_v16 = vsel %vm979_vm3, %v989_v62, %v991_v12  ;;  %v1196_v17 = vsel %vm1169_vm4, %v1191_v63, %v1195_v13  ;;  %v1385_v62 = vrot.slane %v3942_v51, 6  ;;  %v3971_v63 = vld [vmem:[%s3429_s12 + $0x28] sm:$0xff]  }
  0x88   : > { %3014 = vmatprep.subr.bf16.mxu1 %v3345_v1  ;;  %3058 = vmatprep.subr.bf16.mxu0 %v3345_v1  ;;  %v1199_v20 = vrot.slane %v1197_v15, 5 }
  0x89   : > { %v1386_v9 = vsel %vm1377_vm5, %v1383_v48, %v1385_v62  ;;  %v1759_v48 = vrot.slane %v3461_v14, 3 }
  0x8a   : > { %3015 = vmatpush3.bf16.msra.mxu1 %v3283_v60  ;;  %3059 = vmatpush3.bf16.msra.mxu0 %v3284_v23  ;;  %v1201_v58 = vor.u32 %v1200_v52, %v1199_v20  ;;  %v994_v60 = vsel %vm979_vm3, %v991_v12, %v993_v22  ;;  %v4000_v20 = vld [vmem:[%s3429_s12 + $0x30] sm:$0xff]  }
  0x8b   : > { %3016 = vmatprep.subr.bf16.mxu1 %v3345_v1  ;;  %3060 = vmatprep.subr.bf16.mxu0 %v3345_v1  ;;  %v1577_v52 = vrot.slane %v4000_v20, 2  ;;  %v2223_v22 = vld [vmem:[%s3916_s28 + $0x30] sm:$0xff] }
  0x8c   : > { %v1202_v23 = vsel %vm1169_vm4, %v1195_v13, %v1201_v58  ;;  %v3309_v13 = vld [vmem:[%s4337_s2 + $0x1c8] sm:$0xff]   ;;  %v2224_v58 = vld [vmem:[%s3916_s28 + $0x38] sm:$0xff] }
  0x8d   : > { %2945 = vmatmul.mubr.bf16.gmra.mxu1 %v984_v24  ;;  %2989 = vmatmul.mubr.bf16.gmra.mxu0 %v1180_v25  ;;  %v1378_v24 = vrot.slane %v3434_v5, 6  ;;  %v1379_v25 = vrot.slane %v3445_v8, 6  ;;  %v3297_v5 = vld [vmem:[%s4337_s2 + $0x1f8] sm:$0xff]  }
  0x8e   : > { %2948 = vmatprep.mubr.msk.bf16.mxu1 %vm3346_vm0, %v3345_v1  ;;  %2992 = vmatprep.mubr.msk.bf16.mxu0 %vm3346_vm0, %v3345_v1  ;;  %v3298_v8 = vld [vmem:[%s4337_s2 + $0x238] sm:$0xff]  }
  0x8f   : > { %3017 = vmatpush3.bf16.msra.mxu1 %v3285_v28  ;;  %3061 = vmatpush3.bf16.msra.mxu0 %v3286_v33  ;;  %v1380_v28 = vsel %vm1377_vm5, %v1378_v24, %v1379_v25  ;;  %v1570_v33 = vsel %vm1567_vm6, %v1568_v26, %v1569_v27  ;;  %v1382_v41 = vsel %vm1377_vm5, %v1379_v25, %v1381_v34  ;;  %v2225_v26 = vld [vmem:[%s3916_s28 + $0x40] sm:$0xff]  ;;  %v2226_v27 = vld [vmem:[%s3916_s28 + $0x48] sm:$0xff] }
  0x90   : > { %3018 = vmatprep.subr.bf16.mxu1 %v3345_v1  ;;  %3062 = vmatprep.subr.bf16.mxu0 %v3345_v1  ;;  %v4026_v34 = vld [vmem:[%s3489_s29 + $0x8] sm:$0xff]  }
  0x93   : > { %3019 = vmatpush3.bf16.msra.mxu1 %v3287_v36  ;;  %3063 = vmatpush3.bf16.msra.mxu0 %v3288_v37  ;;  %v3299_v36 = vld [vmem:[%s4337_s2 + $0x1f0] sm:$0xff]  }
  0x94   : > { %3020 = vmatprep.subr.bf16.mxu1 %v3345_v1  ;;  %3064 = vmatprep.subr.bf16.mxu0 %v3345_v1  ;;  %v3300_v37 = vld [vmem:[%s4337_s2 + $0x230] sm:$0xff]  }
  0x95   : > { %2949 = vmatmul.mubr.bf16.gmra.mxu1 %v986_v39  ;;  %2993 = vmatmul.mubr.bf16.gmra.mxu0 %v1184_v40  ;;  %v2217_v39 = vld [vmem:[%s3916_s28] sm:$0xff]  ;;  %v2219_v40 = vld [vmem:[%s3916_s28 + $0x10] sm:$0xff] }
  0x96   : > { %2952 = vmatprep.mubr.msk.bf16.mxu1 %vm3346_vm0, %v3345_v1  ;;  %2996 = vmatprep.mubr.msk.bf16.mxu0 %vm3346_vm0, %v3345_v1 }
  0x97   : > { %3021 = vmatpush3.bf16.msra.mxu1 %v3289_v44  ;;  %3065 = vmatpush3.bf16.msra.mxu0 %v3290_v47  ;;  %v3301_v44 = vld [vmem:[%s4337_s2 + $0x1e8] sm:$0xff]  }
  0x98   : > { %3022 = vmatprep.subr.bf16.mxu1 %v3345_v1  ;;  %3066 = vmatprep.subr.bf16.mxu0 %v3345_v1  ;;  %v3302_v47 = vld [vmem:[%s4337_s2 + $0x228] sm:$0xff]  }
  0x99   : > { %2233 = vperm.xlu0 %3231, %v2217_v39   ;;  %2243 = vperm.xlu1 %3232, %v2219_v40   ;;  %v4033_v39 = vld [vmem:[%s3489_s29] sm:$0xff]  }
  0x9a   : > { %v1391_v40 = vrot.slane %v4033_v39, 6 }
  0x9b   : > { %3023 = vmatpush3.bf16.msra.mxu1 %v3291_v53  ;;  %3067 = vmatpush3.bf16.msra.mxu0 %v3292_v54  ;;  %v1573_v53 = vrot.slane %v3942_v51, 2  ;;  %v2218_v54 = vld [vmem:[%s3916_s28 + $0x8] sm:$0xff] }
  0x9c   : > { %3024 = vmatprep.subr.bf16.mxu1 %v3345_v1  ;;  %3068 = vmatprep.subr.bf16.mxu0 %v3345_v1 }
  0x9d   : > { %2953 = vmatmul.mubr.bf16.gmra.mxu1 %v988_v55  ;;  %2997 = vmatmul.mubr.bf16.gmra.mxu0 %v1188_v56  ;;  %v2220_v55 = vld [vmem:[%s3916_s28 + $0x18] sm:$0xff]  ;;  %v3303_v56 = vld [vmem:[%s4337_s2 + $0x1e0] sm:$0xff]   ;;  %v1574_v57 = vsel %vm1567_vm6, %v1571_v35, %v1573_v53 }
  0x9e   : > { %2956 = vmatprep.mubr.msk.bf16.mxu1 %vm3346_vm0, %v3345_v1  ;;  %3000 = vmatprep.mubr.msk.bf16.mxu0 %vm3346_vm0, %v3345_v1 }
  0x9f   : > { %3025 = vmatpush3.bf16.msra.mxu1 %v3293_v59  ;;  %3069 = vmatpush3.bf16.msra.mxu0 %v3294_v61  ;;  %v3305_v59 = vld [vmem:[%s4337_s2 + $0x1d8] sm:$0xff]  }
  0xa0   : > { %3026 = vmatprep.subr.bf16.mxu1 %v3345_v1  ;;  %3070 = vmatprep.subr.bf16.mxu0 %v3345_v1  ;;  %v3306_v61 = vld [vmem:[%s4337_s2 + $0x218] sm:$0xff]  }
  0xa1   : > { %2238 = vperm.xlu0 %3231, %v2218_v54   ;;  %2248 = vperm.xlu1 %3232, %v2220_v55   ;;  %v1762_v54 = vrot.slane %v3510_v30, 3 }
  0xa3   : > { %3027 = vmatpush3.bf16.msra.mxu1 %v3295_v2  ;;  %3071 = vmatpush3.bf16.msra.mxu0 %v3296_v3  ;;  %v1575_v2 = vrot.slane %v3971_v63, 2  ;;  %v2221_v3 = vld [vmem:[%s3916_s28 + $0x20] sm:$0xff] }
  0xa4   : > { %3100 = vmatprep.subr.bf16.mxu1 %v3345_v1  ;;  %3144 = vmatprep.subr.bf16.mxu0 %v3345_v1 }
  0xa5   : > { %2957 = vmatmul.mubr.bf16.gmra.mxu1 %v990_v4  ;;  %3001 = vmatmul.mubr.bf16.gmra.mxu0 %v1192_v7  ;;  %v2222_v4 = vld [vmem:[%s3916_s28 + $0x28] sm:$0xff]  ;;  %v3307_v7 = vld [vmem:[%s4337_s2 + $0x1d0] sm:$0xff]   ;;  %v1576_v12 = vsel %vm1567_vm6, %v1573_v53, %v1575_v2  ;;  %v1578_v25 = vsel %vm1567_vm6, %v1575_v2, %v1577_v52  ;;  %v1761_v53 = vrot.slane %v3551_v45, 2 }
  0xa6   : > { %2960 = vmatprep.mubr.msk.bf16.mxu1 %vm3346_vm0, %v3345_v1  ;;  %3004 = vmatprep.mubr.msk.bf16.mxu0 %vm3346_vm0, %v3345_v1 }
  0xa7   : > { %2253 = vperm.xlu0 %3231, %v2221_v3   ;;  %2258 = vperm.xlu1 %3232, %v2222_v4   ;;  %v1765_v4 = vrot.slane %v3601_v0, 2 }
  0xab   : > { %2263 = vperm.xlu0 %3231, %v2223_v22   ;;  %2268 = vperm.xlu1 %3232, %v2224_v58  }
  0xad   : > { %2961 = vmatmul.mubr.bf16.gmra.mxu1 %v992_v16  ;;  %3005 = vmatmul.mubr.bf16.gmra.mxu0 %v1196_v17  ;;  %v3310_v16 = vld [vmem:[%s4337_s2 + $0x208] sm:$0xff]   ;;  %v1387_v17 = vrot.slane %v3971_v63, 6 }
  0xae   : > { %2964 = vmatprep.mubr.msk.bf16.mxu1 %vm3346_vm0, %v3345_v1  ;;  %3008 = vmatprep.mubr.msk.bf16.mxu0 %vm3346_vm0, %v3345_v1 }
  0xaf   : > { %v1388_v24 = vsel %vm1377_vm5, %v1385_v62, %v1387_v17  ;;  %2273 = vperm.xlu0 %3231, %v2225_v26   ;;  %2278 = vperm.xlu1 %3232, %v2226_v27  }
  0xb5   : > { %2965 = vmatmul.mubr.bf16.gmra.mxu1 %v994_v60  ;;  %3009 = vmatmul.mubr.bf16.gmra.mxu0 %v1202_v23  ;;  %v3312_v60 = vld [vmem:[%s4337_s2 + $0x1c0] sm:$0xff]  }
  0xb6   : > { %3028 = vmatprep.mubr.msk.bf16.mxu1 %vm3346_vm0, %v3345_v1  ;;  %3072 = vmatprep.mubr.msk.bf16.mxu0 %vm3346_vm0, %v3345_v1  ;;  %v3313_v23 = vld [vmem:[%s4337_s2 + $0x200] sm:$0xff]  }
  0xbd   : > { %3029 = vmatmul.mubr.bf16.vlgmr.msra.gmra.mxu1 %v1380_v28  ;;  %3073 = vmatmul.mubr.bf16.vlgmr.msra.gmra.mxu0 %v1570_v33  ;;  %v1389_v28 = vrot.slane %v4000_v20, 6  ;;  %v1579_v33 = vrot.slane %v3536_v42, 2 }
  0xbe   : > { %3101 = vmatpush3.bf16.msra.mxu1 %v3297_v5  ;;  %3145 = vmatpush3.bf16.msra.mxu0 %v3298_v8  ;;  %v2227_v5 = vld [vmem:[%s3916_s28 + $0x50] sm:$0xff]  ;;  %v2228_v8 = vld [vmem:[%s3916_s28 + $0x58] sm:$0xff] }
  0xbf   : > { %3032 = vmatprep.mubr.msk.bf16.mxu1 %vm3346_vm0, %v3345_v1  ;;  %3076 = vmatprep.mubr.msk.bf16.mxu0 %vm3346_vm0, %v3345_v1  ;;  %v1390_v35 = vsel %vm1377_vm5, %v1387_v17, %v1389_v28  ;;  %v3320_v17 = vld [vmem:[%s3429_s12 + $0x18] sm:$0xff]  }
  0xc0   : > { %3102 = vmatprep.subr.bf16.mxu1 %v3345_v1  ;;  %3146 = vmatprep.subr.bf16.mxu0 %v3345_v1 }
  0xc1   : > { %2283 = vperm.xlu0 %3231, %v2227_v5   ;;  %2288 = vperm.xlu1 %3232, %v2228_v8   ;;  %v1974_v8 = vrot.slane %v3942_v51, 3 }
  0xc2   : > { %3103 = vmatpush3.bf16.msra.mxu1 %v3299_v36  ;;  %3147 = vmatpush3.bf16.msra.mxu0 %v3300_v37  ;;  %v1580_v36 = vsel %vm1567_vm6, %v1577_v52, %v1579_v33  ;;  %v2229_v37 = vld [vmem:[%s3916_s28 + $0x60] sm:$0xff]  ;;  %v1972_v52 = vrot.slane %v3320_v17, 3 }
  0xc3   : > { %3104 = vmatprep.subr.bf16.mxu1 %v3345_v1  ;;  %3148 = vmatprep.subr.bf16.mxu0 %v3345_v1 }
  0xc5   : > { %3033 = vmatmul.mubr.bf16.gmra.mxu1 %v1382_v41  ;;  %3077 = vmatmul.mubr.bf16.gmra.mxu0 %v1572_v43  ;;  %v1581_v41 = vrot.slane %v4026_v34, 2  ;;  %v1392_v43 = vsel %vm1377_vm5, %v1389_v28, %v1391_v40  ;;  %v1773_v40 = vrot.slane %v3513_v31, 2 }
  0xc6   : > { %3036 = vmatprep.mubr.msk.bf16.mxu1 %vm3346_vm0, %v3345_v1  ;;  %3080 = vmatprep.mubr.msk.bf16.mxu0 %vm3346_vm0, %v3345_v1 }
  0xc7   : > { %3105 = vmatpush3.bf16.msra.mxu1 %v3301_v44  ;;  %3149 = vmatpush3.bf16.msra.mxu0 %v3302_v47  ;;  %v1582_v44 = vsel %vm1567_vm6, %v1579_v33, %v1581_v41  ;;  %v1758_v47 = vrot.slane %v3507_v29, 2  ;;  %v1763_v29 = vor.u32 %v1762_v54, %v1761_v53  ;;  %v1774_v41 = vrot.slane %v3473_v19, 3 }
  0xc8   : > { %3106 = vmatprep.subr.bf16.mxu1 %v3345_v1  ;;  %3150 = vmatprep.subr.bf16.mxu0 %v3345_v1 }
  0xc9   : > { %2293 = vperm.xlu0 %3231, %v2229_v37   ;;  %2298 = vperm.xlu1 %3232, %v2230_v21   ;;  %v1975_v21 = vsel %vm1968_vm8, %v1972_v52, %v1974_v8  ;;  %v1775_v51 = vor.u32 %v1774_v41, %v1773_v40 }
  0xcb   : > { %3107 = vmatpush3.bf16.msra.mxu1 %v3303_v56  ;;  %3151 = vmatpush3.bf16.msra.mxu0 %v3304_v6  ;;  %v1760_v6 = vor.u32 %v1759_v48, %v1758_v47  ;;  %v1976_v48 = vrot.slane %v3971_v63, 3 }
  0xcc   : > { %3108 = vmatprep.subr.bf16.mxu1 %v3345_v1  ;;  %3152 = vmatprep.subr.bf16.mxu0 %v3345_v1 }
  0xcd   : > { %3037 = vmatmul.mubr.bf16.gmra.mxu1 %v1384_v38  ;;  %3081 = vmatmul.mubr.bf16.gmra.mxu0 %v1574_v57  ;;  %v3318_v38 = vld [vmem:[%s3429_s12 + $0x8] sm:$0xff]   ;;  %v3319_v57 = vld [vmem:[%s3429_s12 + $0x10] sm:$0xff]   ;;  %v1764_v2 = vsel %vm1757_vm7, %v1760_v6, %v1763_v29  ;;  %v1977_v31 = vsel %vm1968_vm8, %v1974_v8, %v1976_v48  ;;  %v1777_v6 = vrot.slane %v3559_v49, 2  ;;  %s2504_s12 = sshll.u32 %s4350_s18, 3  ;;  %s2503_s18 = sshll.u32 %s4348_s26, 2 }
  0xce   : > { %3040 = vmatprep.mubr.msk.bf16.mxu1 %vm3346_vm0, %v3345_v1  ;;  %3084 = vmatprep.mubr.msk.bf16.mxu0 %vm3346_vm0, %v3345_v1  ;;  %v1969_v14 = vrot.slane %v3318_v38, 3  ;;  %v1970_v45 = vrot.slane %v3319_v57, 3  ;;  %s4219_s13 = scalar_lea.vmem %s4340_s5, %s2504_s12  ;;  %s4284_s16 = scalar_lea.vmem %s4339_s4, %s2503_s18 }
  0xcf   : > { %3109 = vmatpush3.bf16.msra.mxu1 %v3305_v59  ;;  %3153 = vmatpush3.bf16.msra.mxu0 %v3306_v61  ;;  %2216 = vst [vmem:[%s4219_s13] sm:$0xff] %v3345_v1 }
  0xd0   : > { %3110 = vmatprep.subr.bf16.mxu1 %v3345_v1  ;;  %3154 = vmatprep.subr.bf16.mxu0 %v3345_v1  ;;  %v1971_v3 = vsel %vm1968_vm8, %v1969_v14, %v1970_v45 }
  0xd3   : > { %3111 = vmatpush3.bf16.msra.mxu1 %v3307_v7  ;;  %3155 = vmatpush3.bf16.msra.mxu0 %v3308_v10  ;;  %v1766_v7 = vrot.slane %v3554_v46, 3 }
  0xd4   : > { %3112 = vmatprep.subr.bf16.mxu1 %v3345_v1  ;;  %3156 = vmatprep.subr.bf16.mxu0 %v3345_v1 }
  0xd5   : > { %3041 = vmatmul.mubr.bf16.gmra.mxu1 %v1386_v9  ;;  %3085 = vmatmul.mubr.bf16.gmra.mxu0 %v1576_v12 }
  0xd6   : > { %3044 = vmatprep.mubr.msk.bf16.mxu1 %vm3346_vm0, %v3345_v1  ;;  %3088 = vmatprep.mubr.msk.bf16.mxu0 %vm3346_vm0, %v3345_v1 }
  0xd7   : > { %3113 = vmatpush3.bf16.msra.mxu1 %v3309_v13  ;;  %3157 = vmatpush3.bf16.msra.mxu0 %v3310_v16  ;;  %v1767_v16 = vor.u32 %v1766_v7, %v1765_v4  ;;  %v1781_v4 = vrot.slane %v1197_v15, 2  ;;  %v1786_v15 = vshrl.u32 %v4026_v34, 16 }
  0xd8   : > { %3114 = vmatprep.subr.bf16.mxu1 %v3345_v1  ;;  %3158 = vmatprep.subr.bf16.mxu0 %v3345_v1 }
  0xd9   : > { %v1788_v8 = vrot.slane %v1786_v15, 2 }
  0xdb   : > { %3115 = vmatpush3.bf16.msra.mxu1 %v3312_v60  ;;  %3159 = vmatpush3.bf16.msra.mxu0 %v3313_v23  ;;  %v1768_v60 = vsel %vm1757_vm7, %v1763_v29, %v1767_v16  ;;  %v1973_v23 = vsel %vm1968_vm8, %v1970_v45, %v1972_v52  ;;  %v1778_v29 = vrot.slane %v3516_v32, 3 }
  0xdd   : > { %3045 = vmatmul.mubr.bf16.gmra.mxu1 %v1388_v24  ;;  %3089 = vmatmul.mubr.bf16.gmra.mxu0 %v1578_v25  ;;  %v1769_v24 = vrot.slane %v3470_v18, 2  ;;  %v1770_v25 = vrot.slane %v3452_v11, 3  ;;  %v1779_v63 = vor.u32 %v1778_v29, %v1777_v6 }
  0xde   : > { %3048 = vmatprep.mubr.msk.bf16.mxu1 %vm3346_vm0, %v3345_v1  ;;  %3092 = vmatprep.mubr.msk.bf16.mxu0 %vm3346_vm0, %v3345_v1 }
  0xdf   : > { %v1771_v5 = vor.u32 %v1770_v25, %v1769_v24 }
  0xe1   : > { %v1772_v37 = vsel %vm1757_vm7, %v1767_v16, %v1771_v5  ;;  %v1776_v19 = vsel %vm1757_vm7, %v1771_v5, %v1775_v51 }
  0xe5   : > { %3049 = vmatmul.mubr.bf16.gmra.mxu1 %v1390_v35  ;;  %3093 = vmatmul.mubr.bf16.gmra.mxu0 %v1580_v36 }
  0xe6   : > { %3052 = vmatprep.mubr.msk.bf16.mxu1 %vm3346_vm0, %v3345_v1  ;;  %3096 = vmatprep.mubr.msk.bf16.mxu0 %vm3346_vm0, %v3345_v1 }
  0xed   : > { %v4047_v55 = vpop.f32.mrf.mxu0  ;;  %v4049_v56 = vpop.f32.mrf.mxu1  ;;  %3053 = vmatmul.mubr.bf16.gmra.mxu1 %v1392_v43  ;;  %3097 = vmatmul.mubr.bf16.gmra.mxu0 %v1582_v44 }
  0xee   : > { %3116 = vmatprep.mubr.msk.bf16.mxu1 %vm3346_vm0, %v3345_v1  ;;  %3160 = vmatprep.mubr.msk.bf16.mxu0 %vm3346_vm0, %v3345_v1 }
  0xef   : > { %v2810_v59 = vpop.f32.mrf.mxu0  ;;  %v2826_v30 = vpop.f32.mrf.mxu1 }
  0xf0   : > { %v1978_v59 = vrot.slane %v4000_v20, 3 }
  0xf1   : > { %v4057_v61 = vpop.f32.mrf.mxu0  ;;  %v4059_v62 = vpop.f32.mrf.mxu1 }
  0xf3   : > { %v2811_v10 = vpop.f32.mrf.mxu0  ;;  %v2827_v9 = vpop.f32.mrf.mxu1 }
  0xf4   : > { %v1780_v10 = vsel %vm1757_vm7, %v1775_v51, %v1779_v63  ;;  %v1979_v9 = vsel %vm1968_vm8, %v1976_v48, %v1978_v59 }
  0xf5   : > { %v4065_v12 = vpop.f32.mrf.mxu0  ;;  %3117 = vmatmul.mubr.bf16.vlgmr.msra.gmra.mxu1 %v1764_v2  ;;  %3161 = vmatmul.mubr.bf16.vlgmr.msra.gmra.mxu0 %v1971_v3  ;;  %v4067_v13 = vpop.f32.mrf.mxu1 }
  0xf6   : > { %3120 = vmatprep.mubr.msk.bf16.mxu1 %vm3346_vm0, %v3345_v1  ;;  %3164 = vmatprep.mubr.msk.bf16.mxu0 %vm3346_vm0, %v3345_v1 }
  0xf7   : > { %v2814_v0 = vpop.f32.mrf.mxu0  ;;  %v2830_v22 = vpop.f32.mrf.mxu1 }
  0xf9   : > { %v4074_v46 = vpop.f32.mrf.mxu0  ;;  %v4076_v58 = vpop.f32.mrf.mxu1 }
  0xfb   : > { %v2815_v26 = vpop.f32.mrf.mxu0  ;;  %v2831_v27 = vpop.f32.mrf.mxu1 }
  0xfd   : > { %v4082_v28 = vpop.f32.mrf.mxu0  ;;  %3121 = vmatmul.mubr.bf16.gmra.mxu1 %v1768_v60  ;;  %3165 = vmatmul.mubr.bf16.gmra.mxu0 %v1973_v23  ;;  %v4084_v33 = vpop.f32.mrf.mxu1 }
  0xfe   : > { %3124 = vmatprep.mubr.msk.bf16.mxu1 %vm3346_vm0, %v3345_v1  ;;  %3168 = vmatprep.mubr.msk.bf16.mxu0 %vm3346_vm0, %v3345_v1 }
  0xff   : > { %v2818_v18 = vpop.f32.mrf.mxu0  ;;  %v2834_v35 = vpop.f32.mrf.mxu1 }
 0x101   : > { %v4091_v11 = vpop.f32.mrf.mxu0  ;;  %v4093_v36 = vpop.f32.mrf.mxu1 }
 0x103   : > { %v2819_v43 = vpop.f32.mrf.mxu0  ;;  %v2835_v44 = vpop.f32.mrf.mxu1 }
 0x104   : > { %v1982_v43 = vrot.slane %v4026_v34, 3 }
 0x105   : > { %v4099_v47 = vpop.f32.mrf.mxu0  ;;  %3125 = vmatmul.mubr.bf16.gmra.mxu1 %v1772_v37  ;;  %3169 = vmatmul.mubr.bf16.gmra.mxu0 %v1975_v21 }
 0x106   : > { %3128 = vmatprep.mubr.msk.bf16.mxu1 %vm3346_vm0, %v3345_v1  ;;  %3172 = vmatprep.mubr.msk.bf16.mxu0 %vm3346_vm0, %v3345_v1 }
 0x107   : > { %v2822_v53 = vpop.f32.mrf.mxu0 }
 0x109   : > { %v4106_v54 = vpop.f32.mrf.mxu0 }
 0x10b   : > { %v2823_v38 = vpop.f32.mrf.mxu0 }
 0x10d   : > { %v718_v14 = vpop.f32.mrf.mxu1  ;;  %v894_v57 = vpop.f32.mrf.mxu0  ;;  %3129 = vmatmul.mubr.bf16.gmra.mxu1 %v1776_v19  ;;  %3173 = vmatmul.mubr.bf16.gmra.mxu0 %v1977_v31 }
 0x10e   : > { %v719_v45 = vadd.f32 %v718_v14, %v4047_v55  ;;  %3132 = vmatprep.mubr.msk.bf16.mxu1 %vm3346_vm0, %v3345_v1  ;;  %3176 = vmatprep.mubr.msk.bf16.mxu0 %vm3346_vm0, %v3345_v1  ;;  %v1782_v55 = vrot.slane %v3562_v50, 3  ;;  %v1980_v50 = vrot.slane %v4033_v39, 3 }
 0x10f   : > { %v2854_v30 = vpop.f32.mrf.mxu1  ;;  %v2898_v49 = vpop.f32.mrf.mxu0 }
 0x110   : > { %v4118_v2 = vadd.f32 %v894_v57, %v719_v45  ;;  %v1783_v22 = vor.u32 %v1782_v55, %v1781_v4  ;;  %v1981_v5 = vsel %vm1968_vm8, %v1978_v59, %v1980_v50 }
 0x111   : > { %v721_v32 = vpop.f32.mrf.mxu1  ;;  %v897_v3 = vpop.f32.mrf.mxu0 }
 0x112   : > { %v722_v7 = vadd.f32 %v721_v32, %v4057_v61  ;;  %v1789_v61 = vshll.u32 %v4026_v34, 16 }
 0x113   : > { %v2855_v16 = vpop.f32.mrf.mxu1  ;;  %v2899_v17 = vpop.f32.mrf.mxu0 }
 0x114   : > { %v4126_v20 = vadd.f32 %v897_v3, %v722_v7  ;;  %v1791_v18 = vrot.slane %v1789_v61, 3 }
 0x115   : > { %v726_v52 = vpop.f32.mrf.mxu1  ;;  %v902_v0 = vpop.f32.mrf.mxu0  ;;  %3133 = vmatmul.mubr.bf16.gmra.mxu1 %v1780_v10  ;;  %3177 = vmatmul.mubr.bf16.gmra.mxu0 %v1979_v9 }
 0x116   : > { %v727_v42 = vadd.f32 %v726_v52, %v4065_v12  ;;  %3136 = vmatprep.mubr.msk.bf16.mxu1 %vm3346_vm0, %v3345_v1  ;;  %3180 = vmatprep.mubr.msk.bf16.mxu0 %vm3346_vm0, %v3345_v1  ;;  %v1784_v12 = vsel %vm1757_vm7, %v1779_v63, %v1783_v22 }
 0x117   : > { %v2858_v60 = vpop.f32.mrf.mxu1  ;;  %v2902_v23 = vpop.f32.mrf.mxu0 }
 0x118   : > { %v4136_v24 = vadd.f32 %v902_v0, %v727_v42 }
 0x119   : > { %v729_v25 = vpop.f32.mrf.mxu1  ;;  %v905_v26 = vpop.f32.mrf.mxu0 }
 0x11a   : > { %v730_v27 = vadd.f32 %v729_v25, %v4074_v46  ;;  %v1792_v46 = vor.u32 %v1791_v18, %v1788_v8 }
 0x11b   : > { %v2859_v35 = vpop.f32.mrf.mxu1  ;;  %v2903_v39 = vpop.f32.mrf.mxu0 }
 0x11c   : > { %v4141_v37 = vadd.f32 %v905_v26, %v730_v27  ;;  %v1793_v6 = vsel %vm1757_vm7, %v1783_v22, %v1792_v46 }
 0x11d   : > { %v734_v21 = vpop.f32.mrf.mxu1  ;;  %v910_v40 = vpop.f32.mrf.mxu0  ;;  %3137 = vmatmul.mubr.bf16.gmra.mxu1 %v1784_v12  ;;  %3181 = vmatmul.mubr.bf16.gmra.mxu0 %v1981_v5 }
 0x11e   : > { %v735_v41 = vadd.f32 %v734_v21, %v4082_v28  ;;  %3140 = vmatprep.mubr.msk.bf16.mxu1 %vm3346_vm0, %v3345_v1  ;;  %3184 = vmatprep.mubr.msk.bf16.mxu0 %vm3346_vm0, %v3345_v1  ;;  %v1983_v28 = vsel %vm1968_vm8, %v1980_v50, %v1982_v43 }
 0x11f   : > { %v2862_v44 = vpop.f32.mrf.mxu1  ;;  %v2906_v51 = vpop.f32.mrf.mxu0 }
 0x120   : > { %v4149_v48 = vadd.f32 %v910_v40, %v735_v41 }
 0x121   : > { %v737_v53 = vpop.f32.mrf.mxu1  ;;  %v913_v19 = vpop.f32.mrf.mxu0 }
 0x122   : > { %v738_v31 = vadd.f32 %v737_v53, %v4091_v11 }
 0x123   : > { %v2863_v29 = vpop.f32.mrf.mxu1  ;;  %v2907_v38 = vpop.f32.mrf.mxu0 }
 0x124   : > { %v4154_v14 = vadd.f32 %v913_v19, %v738_v31 }
 0x125   : > { %v742_v57 = vpop.f32.mrf.mxu1  ;;  %v918_v45 = vpop.f32.mrf.mxu0  ;;  %3141 = vmatmul.mubr.bf16.gmra.mxu1 %v1793_v6  ;;  %3185 = vmatmul.mubr.bf16.gmra.mxu0 %v1983_v28 }
 0x126   : > { %v743_v34 = vadd.f32 %v742_v57, %v4099_v47 }
 0x127   : > { %v2866_v63 = vpop.f32.mrf.mxu1  ;;  %v2910_v59 = vpop.f32.mrf.mxu0 }
 0x128   : > { %v4157_v30 = vadd.f32 %v918_v45, %v743_v34 }
 0x129   : > { %v745_v49 = vpop.f32.mrf.mxu1  ;;  %v921_v11 = vpop.f32.mrf.mxu0 }
 0x12a   : > { %v746_v32 = vadd.f32 %v745_v49, %v4106_v54 }
 0x12b   : > { %v2867_v3 = vpop.f32.mrf.mxu1  ;;  %v2911_v4 = vpop.f32.mrf.mxu0 }
 0x12c   : > { %v4160_v55 = vadd.f32 %v921_v11, %v746_v32 }
 0x12d   : > { %v750_v7 = vpop.f32.mrf.mxu1  ;;  %v926_v10 = vpop.f32.mrf.mxu0 }
 0x12e   : > { %v751_v9 = vadd.f32 %v750_v7, %v4049_v56 }
 0x12f   : > { %v2870_v16 = vpop.f32.mrf.mxu1  ;;  %v2914_v17 = vpop.f32.mrf.mxu0 }
 0x130   : > { %v4163_v52 = vadd.f32 %v926_v10, %v751_v9 }
 0x131   : > { %v753_v47 = vpop.f32.mrf.mxu1  ;;  %v929_v0 = vpop.f32.mrf.mxu0 }
 0x132   : > { %v754_v22 = vadd.f32 %v753_v47, %v4059_v62 }
 0x133   : > { %v2871_v42 = vpop.f32.mrf.mxu1  ;;  %v2915_v50 = vpop.f32.mrf.mxu0 }
 0x134   : > { %v4166_v15 = vadd.f32 %v929_v0, %v754_v22 }
 0x135   : > { %v758_v54 = vpop.f32.mrf.mxu1  ;;  %v934_v61 = vpop.f32.mrf.mxu0 }
 0x136   : > { %v759_v60 = vadd.f32 %v758_v54, %v4067_v13 }
 0x137   : > { %v2874_v23 = vpop.f32.mrf.mxu1  ;;  %v2918_v25 = vpop.f32.mrf.mxu0 }
 0x138   : > { %v4169_v26 = vadd.f32 %v934_v61, %v759_v60 }
 0x139   : > { %v761_v56 = vpop.f32.mrf.mxu1  ;;  %v937_v12 = vpop.f32.mrf.mxu0 }
 0x13a   : > { %v762_v27 = vadd.f32 %v761_v56, %v4076_v58 }
 0x13b   : > { %v2875_v5 = vpop.f32.mrf.mxu1  ;;  %v2919_v8 = vpop.f32.mrf.mxu0 }
 0x13c   : > { %v4172_v18 = vadd.f32 %v937_v12, %v762_v27 }
 0x13d   : > { %v766_v62 = vpop.f32.mrf.mxu1  ;;  %v942_v35 = vpop.f32.mrf.mxu0 }
 0x13e   : > { %v767_v39 = vadd.f32 %v766_v62, %v4084_v33 }
 0x13f   : > { %v2878_v21 = vpop.f32.mrf.mxu1  ;;  %v2922_v40 = vpop.f32.mrf.mxu0 }
 0x140   : > { %v4175_v41 = vadd.f32 %v942_v35, %v767_v39 }
 0x141   : > { %v769_v13 = vpop.f32.mrf.mxu1  ;;  %v945_v46 = vpop.f32.mrf.mxu0 }
 0x142   : > { %v770_v43 = vadd.f32 %v769_v13, %v4093_v36 }
 0x143   : > { %v2879_v44 = vpop.f32.mrf.mxu1  ;;  %v2923_v51 = vpop.f32.mrf.mxu0 }
 0x144   : > { %v4178_v53 = vadd.f32 %v945_v46, %v770_v43 }
 0x145   : > { %v1084_v58 = vpop.f32.mrf.mxu1  ;;  %v1292_v19 = vpop.f32.mrf.mxu0 }
 0x146   : > { %v1139_v31 = vadd.f32 %v1084_v58, %v4118_v2 }
 0x147   : > { %v2942_v6 = vpop.f32.mrf.mxu1  ;;  %v2986_v28 = vpop.f32.mrf.mxu0 }
 0x148   : > { %v4181_v29 = vadd.f32 %v1292_v19, %v1139_v31 }
 0x149   : > { %v1087_v33 = vpop.f32.mrf.mxu1  ;;  %v1295_v38 = vpop.f32.mrf.mxu0 }
 0x14a   : > { %v1140_v57 = vadd.f32 %v1087_v33, %v4126_v20 }
 0x14b   : > { %v2943_v45 = vpop.f32.mrf.mxu1  ;;  %v2987_v34 = vpop.f32.mrf.mxu0 }
 0x14c   : > { %v4184_v63 = vadd.f32 %v1295_v38, %v1140_v57 }
 0x14d   : > { %v1092_v36 = vpop.f32.mrf.mxu1  ;;  %v1300_v59 = vpop.f32.mrf.mxu0 }
 0x14e   : > { %v1141_v49 = vadd.f32 %v1092_v36, %v4136_v24 }
 0x14f   : > { %v2946_v11 = vpop.f32.mrf.mxu1  ;;  %v2990_v32 = vpop.f32.mrf.mxu0 }
 0x150   : > { %v4187_v3 = vadd.f32 %v1300_v59, %v1141_v49 }
 0x151   : > { %v1095_v2 = vpop.f32.mrf.mxu1  ;;  %v1303_v4 = vpop.f32.mrf.mxu0 }
 0x152   : > { %v1142_v7 = vadd.f32 %v1095_v2, %v4141_v37 }
 0x153   : > { %v2947_v10 = vpop.f32.mrf.mxu1  ;;  %v2991_v9 = vpop.f32.mrf.mxu0 }
 0x154   : > { %v4190_v16 = vadd.f32 %v1303_v4, %v1142_v7 }
 0x155   : > { %v1100_v20 = vpop.f32.mrf.mxu1  ;;  %v1308_v17 = vpop.f32.mrf.mxu0 }
 0x156   : > { %v1143_v47 = vadd.f32 %v1100_v20, %v4149_v48 }
 0x157   : > { %v2950_v0 = vpop.f32.mrf.mxu1  ;;  %v2994_v22 = vpop.f32.mrf.mxu0 }
 0x158   : > { %v4193_v42 = vadd.f32 %v1308_v17, %v1143_v47 }
 0x159   : > { %v1103_v24 = vpop.f32.mrf.mxu1  ;;  %v1311_v50 = vpop.f32.mrf.mxu0 }
 0x15a   : > { %v1144_v54 = vadd.f32 %v1103_v24, %v4154_v14 }
 0x15b   : > { %v2951_v61 = vpop.f32.mrf.mxu1  ;;  %v2995_v60 = vpop.f32.mrf.mxu0 }
 0x15c   : > { %v4196_v23 = vadd.f32 %v1311_v50, %v1144_v54 }
 0x15d   : > { %v1108_v37 = vpop.f32.mrf.mxu1  ;;  %v1316_v25 = vpop.f32.mrf.mxu0 }
 0x15e   : > { %v1145_v56 = vadd.f32 %v1108_v37, %v4157_v30 }
 0x15f   : > { %v2954_v12 = vpop.f32.mrf.mxu1  ;;  %v2998_v27 = vpop.f32.mrf.mxu0 }
 0x160   : > { %v4199_v5 = vadd.f32 %v1316_v25, %v1145_v56 }
 0x161   : > { %v1111_v48 = vpop.f32.mrf.mxu1  ;;  %v1319_v8 = vpop.f32.mrf.mxu0 }
 0x162   : > { %v1146_v62 = vadd.f32 %v1111_v48, %v4160_v55 }
 0x163   : > { %v2955_v35 = vpop.f32.mrf.mxu1  ;;  %v2999_v39 = vpop.f32.mrf.mxu0 }
 0x164   : > { %v4202_v21 = vadd.f32 %v1319_v8, %v1146_v62 }
 0x165   : > { %v1116_v14 = vpop.f32.mrf.mxu1  ;;  %v1324_v40 = vpop.f32.mrf.mxu0 }
 0x166   : > { %v1147_v13 = vadd.f32 %v1116_v14, %v4163_v52 }
 0x167   : > { %v2958_v46 = vpop.f32.mrf.mxu1  ;;  %v3002_v30 = vpop.f32.mrf.mxu0 }
 0x168   : > { %v4205_v43 = vadd.f32 %v1324_v40, %v1147_v13 }
 0x169   : > { %v1119_v44 = vpop.f32.mrf.mxu1  ;;  %v1327_v51 = vpop.f32.mrf.mxu0 }
 0x16a   : > { %v1148_v58 = vadd.f32 %v1119_v44, %v4166_v15 }
 0x16b   : > { %v2959_v19 = vpop.f32.mrf.mxu1  ;;  %v3003_v55 = vpop.f32.mrf.mxu0 }
 0x16c   : > { %v4208_v31 = vadd.f32 %v1327_v51, %v1148_v58 }
 0x16d   : > { %v1124_v6 = vpop.f32.mrf.mxu1  ;;  %v1332_v28 = vpop.f32.mrf.mxu0 }
 0x16e   : > { %v1149_v33 = vadd.f32 %v1124_v6, %v4169_v26 }
 0x16f   : > { %v2962_v38 = vpop.f32.mrf.mxu1  ;;  %v3006_v52 = vpop.f32.mrf.mxu0 }
 0x170   : > { %v4212_v57 = vadd.f32 %v1332_v28, %v1149_v33 }
 0x171   : > { %v1127_v45 = vpop.f32.mrf.mxu1  ;;  %v1335_v34 = vpop.f32.mrf.mxu0 }
 0x172   : > { %v1150_v36 = vadd.f32 %v1127_v45, %v4172_v18 }
 0x173   : > { %v2963_v15 = vpop.f32.mrf.mxu1  ;;  %v3007_v59 = vpop.f32.mrf.mxu0 }
 0x174   : > { %v4221_v26 = vadd.f32 %v1335_v34, %v1150_v36 }
 0x175   : > { %v1132_v49 = vpop.f32.mrf.mxu1  ;;  %v1340_v11 = vpop.f32.mrf.mxu0 }
 0x176   : > { %v1151_v32 = vadd.f32 %v1132_v49, %v4175_v41 }
 0x177   : > { %v2966_v2 = vpop.f32.mrf.mxu1  ;;  %v3010_v4 = vpop.f32.mrf.mxu0 }
 0x178   : > { %v4226_v18 = vadd.f32 %v1340_v11, %v1151_v32 }
 0x179   : > { %v1135_v7 = vpop.f32.mrf.mxu1  ;;  %v1343_v10 = vpop.f32.mrf.mxu0 }
 0x17a   : > { %v1152_v9 = vadd.f32 %v1135_v7, %v4178_v53 }
 0x17b   : > { %v2967_v20 = vpop.f32.mrf.mxu1  ;;  %v3011_v17 = vpop.f32.mrf.mxu0 }
 0x17c   : > { %v4229_v47 = vadd.f32 %v1343_v10, %v1152_v9 }
 0x17d   : > { %v1482_v0 = vpop.f32.mrf.mxu1  ;;  %v1672_v22 = vpop.f32.mrf.mxu0 }
 0x17f   : > { %v3030_v24 = vpop.f32.mrf.mxu1  ;;  %v3074_v1 = vpop.f32.mrf.mxu0 }
 0x181   : > { %v1485_v50 = vpop.f32.mrf.mxu1  ;;  %v1675_v54 = vpop.f32.mrf.mxu0 }
 0x183   : > { %v3031_v61 = vpop.f32.mrf.mxu1  ;;  %v3075_v41 = vpop.f32.mrf.mxu0 }
 0x184   : > { %v1537_v61 = vadd.f32 %v1482_v0, %v4181_v29 }
 0x185   : > { %v1490_v60 = vpop.f32.mrf.mxu1  ;;  %v4231_v37 = vpop.f32.mrf.mxu0 }
 0x187   : > { %v3034_v25 = vpop.f32.mrf.mxu1  ;;  %v3078_v56 = vpop.f32.mrf.mxu0 }
 0x189   : > { %v1493_v12 = vpop.f32.mrf.mxu1  ;;  %v4233_v27 = vpop.f32.mrf.mxu0 }
 0x18b   : > { %v3035_v53 = vpop.f32.mrf.mxu1  ;;  %v3079_v48 = vpop.f32.mrf.mxu0 }
 0x18c   : > { %v1727_v48 = vadd.f32 %v1672_v22, %v1537_v61 }
 0x18d   : > { %v4235_v8 = vpop.f32.mrf.mxu1  ;;  %v4237_v62 = vpop.f32.mrf.mxu0 }
 0x18f   : > { %v3038_v35 = vpop.f32.mrf.mxu1  ;;  %v3082_v39 = vpop.f32.mrf.mxu0 }
 0x190   : > { %v1538_v35 = vadd.f32 %v1485_v50, %v4184_v63  ;;  %v2234_v39 = vpop.permute.xlu0 %2233 }
 0x191   : > { %v4239_v14 = vpop.f32.mrf.mxu1  ;;  %v4241_v40 = vpop.f32.mrf.mxu0 }
 0x193   : > { %v3039_v13 = vpop.f32.mrf.mxu1  ;;  %v3083_v46 = vpop.f32.mrf.mxu0 }
 0x195   : > { %v4243_v30 = vpop.f32.mrf.mxu1  ;;  %v4245_v44 = vpop.f32.mrf.mxu0 }
 0x197   : > { %v3042_v51 = vpop.f32.mrf.mxu1  ;;  %v3086_v58 = vpop.f32.mrf.mxu0 }
 0x199   : > { %v4247_v19 = vpop.f32.mrf.mxu1  ;;  %v4249_v55 = vpop.f32.mrf.mxu0 }
 0x19b   : > { %v3043_v6 = vpop.f32.mrf.mxu1  ;;  %v3087_v28 = vpop.f32.mrf.mxu0 }
 0x19c   : > { %v1728_v28 = vadd.f32 %v1675_v54, %v1538_v35 }
 0x19d   : > { %v4251_v33 = vpop.f32.mrf.mxu1  ;;  %v4253_v38 = vpop.f32.mrf.mxu0 }
 0x19f   : > { %v3046_v52 = vpop.f32.mrf.mxu1  ;;  %v3090_v45 = vpop.f32.mrf.mxu0 }
 0x1a0   : > { %v1539_v52 = vadd.f32 %v1490_v60, %v4187_v3 }
 0x1a1   : > { %v4255_v34 = vpop.f32.mrf.mxu1  ;;  %v4257_v36 = vpop.f32.mrf.mxu0 }
 0x1a2   : > { %v1729_v63 = vadd.f32 %v4231_v37, %v1539_v52 }
 0x1a3   : > { %v3047_v15 = vpop.f32.mrf.mxu1  ;;  %v3091_v59 = vpop.f32.mrf.mxu0 }
 0x1a4   : > { %v2239_v59 = vpop.permute.xlu0 %2238 }
 0x1a5   : > { %v4259_v49 = vpop.f32.mrf.mxu1  ;;  %v4261_v11 = vpop.f32.mrf.mxu0 }
 0x1a7   : > { %v3050_v32 = vpop.f32.mrf.mxu1  ;;  %v3094_v2 = vpop.f32.mrf.mxu0 }
 0x1a8   : > { %v1540_v32 = vadd.f32 %v1493_v12, %v4190_v16  ;;  %v1541_v12 = vadd.f32 %v4235_v8, %v4193_v42  ;;  %v1542_v42 = vadd.f32 %v4239_v14, %v4196_v23  ;;  %v2254_v14 = vpop.permute.xlu0 %2253 }
 0x1a9   : > { %v4263_v4 = vpop.f32.mrf.mxu1  ;;  %v4265_v7 = vpop.f32.mrf.mxu0 }
 0x1aa   : > { %v1730_v16 = vadd.f32 %v4233_v27, %v1540_v32 }
 0x1ab   : > { %v3051_v10 = vpop.f32.mrf.mxu1  ;;  %v3095_v9 = vpop.f32.mrf.mxu0 }
 0x1ad   : > { %v4267_v20 = vpop.f32.mrf.mxu1  ;;  %v4269_v17 = vpop.f32.mrf.mxu0 }
 0x1af   : > { %v3054_v24 = vpop.f32.mrf.mxu1  ;;  %v3098_v1 = vpop.f32.mrf.mxu0 }
 0x1b0   : > { %v2244_v1 = vpop.permute.xlu1 %2243 }
 0x1b1   : > { %v4272_v41 = vpop.f32.mrf.mxu1  ;;  %v4274_v25 = vpop.f32.mrf.mxu0 }
 0x1b3   : > { %v3055_v56 = vpop.f32.mrf.mxu1  ;;  %v3099_v53 = vpop.f32.mrf.mxu0 }
 0x1b5   : > { %v1883_v13 = vpop.f32.mrf.mxu1  ;;  %v2073_v46 = vpop.f32.mrf.mxu0 }
 0x1b6   : > { %v1938_v51 = vadd.f32 %v1883_v13, %v1727_v48 }
 0x1b7   : > { %v3118_v58 = vpop.f32.mrf.mxu1  ;;  %v3162_v6 = vpop.f32.mrf.mxu0 }
 0x1b8   : > { %v2128_v29 = vadd.f32 %v2073_v46, %v1938_v51  ;;  %v1731_v6 = vadd.f32 %v4237_v62, %v1541_v12 }
 0x1b9   : > { %v1886_v0 = vpop.f32.mrf.mxu1  ;;  %v2076_v45 = vpop.f32.mrf.mxu0 }
 0x1ba   : > { %v1939_v15 = vadd.f32 %v1886_v0, %v1728_v28  ;;  %v2301_v50 = vmul.f32 %v2234_v39, %v2128_v29  ;;  %v2249_v0 = vpop.permute.xlu1 %2248 }
 0x1bb   : > { %v3119_v22 = vpop.f32.mrf.mxu1  ;;  %v3163_v2 = vpop.f32.mrf.mxu0 }
 0x1bc   : > { %v2129_v10 = vadd.f32 %v2076_v45, %v1939_v15  ;;  %v2334_v56 = vmul.f32 %v2301_v50, %v2301_v50 }
 0x1bd   : > { %v1891_v3 = vpop.f32.mrf.mxu1  ;;  %v2081_v54 = vpop.f32.mrf.mxu0 }
 0x1be   : > { %v2619_v60 = vpack.c.bf16 %v2129_v10, %v2128_v29  ;;  %v2302_v9 = vmul.f32 %v2239_v59, %v2129_v10  ;;  %v1940_v24 = vadd.f32 %v1891_v3, %v1729_v63  ;;  %v1543_v63 = vadd.f32 %v4243_v30, %v4199_v5 }
 0x1bf   : > { %v3122_v37 = vpop.f32.mrf.mxu1  ;;  %v3166_v61 = vpop.f32.mrf.mxu0  ;;  %v1732_v10 = vadd.f32 %v4241_v40, %v1542_v42  ;;  %v1544_v5 = vadd.f32 %v4247_v19, %v4202_v21 }
 0x1c0   : > { %2620 = vst [vmem:[%s4284_s16] sm:$0xff] %v2619_v60   ;;  %v2315_v53 = vadd.f32 %v2302_v9, %v2301_v50  ;;  %v2335_v48 = vmul.f32 %v2302_v9, %v2302_v9  ;;  %v2130_v35 = vadd.f32 %v2081_v54, %v1940_v24  ;;  %v1733_v12 = vadd.f32 %v4245_v44, %v1543_v63 }
 0x1c1   : > { %v1894_v39 = vpop.f32.mrf.mxu1  ;;  %v2084_v13 = vpop.f32.mrf.mxu0 }
 0x1c2   : > { %v2348_v46 = vadd.f32 %v2335_v48, %v2334_v56  ;;  %v2303_v51 = vmul.f32 %v2244_v1, %v2130_v35  ;;  %v1941_v58 = vadd.f32 %v1894_v39, %v1730_v16  ;;  %v2259_v56 = vpop.permute.xlu1 %2258 }
 0x1c3   : > { %v3123_v28 = vpop.f32.mrf.mxu1  ;;  %v3167_v52 = vpop.f32.mrf.mxu0 }
 0x1c4   : > { %v2316_v27 = vadd.f32 %v2315_v53, %v2303_v51  ;;  %v2336_v8 = vmul.f32 %v2303_v51, %v2303_v51  ;;  %v2131_v29 = vadd.f32 %v2084_v13, %v1941_v58  ;;  %v1545_v58 = vadd.f32 %v4251_v33, %v4205_v43  ;;  %v2264_v52 = vpop.permute.xlu0 %2263 }
 0x1c5   : > { %v1899_v45 = vpop.f32.mrf.mxu1  ;;  %v2089_v15 = vpop.f32.mrf.mxu0  ;;  %v1734_v28 = vadd.f32 %v4249_v55, %v1544_v5  ;;  %v1546_v43 = vadd.f32 %v4255_v34, %v4208_v31 }
 0x1c6   : > { %v2349_v59 = vadd.f32 %v2348_v46, %v2336_v8  ;;  %v2624_v32 = vpack.c.bf16 %v2131_v29, %v2130_v35  ;;  %v2304_v22 = vmul.f32 %v2249_v0, %v2131_v29  ;;  %v1942_v2 = vadd.f32 %v1899_v45, %v1731_v6  ;;  %v2269_v33 = vpop.permute.xlu1 %2268 }
 0x1c7   : > { %v3126_v62 = vpop.f32.mrf.mxu1  ;;  %v3170_v50 = vpop.f32.mrf.mxu0 }
 0x1c8   : > { %2651 = vst [vmem:[%s4284_s16 + $0x8] sm:$0xff] %v2624_v32   ;;  %v2317_v3 = vadd.f32 %v2316_v27, %v2304_v22  ;;  %v2337_v23 = vmul.f32 %v2304_v22, %v2304_v22  ;;  %v2132_v54 = vadd.f32 %v2089_v15, %v1942_v2  ;;  %v1735_v15 = vadd.f32 %v4253_v38, %v1545_v58 }
 0x1c9   : > { %v1902_v60 = vpop.f32.mrf.mxu1  ;;  %v2092_v9 = vpop.f32.mrf.mxu0  ;;  %v1549_v58 = vadd.f32 %v4267_v20, %v4226_v18  ;;  %v1550_v18 = vadd.f32 %v4272_v41, %v4229_v47 }
 0x1ca   : > { %v2350_v24 = vadd.f32 %v2349_v59, %v2337_v23  ;;  %v2305_v1 = vmul.f32 %v2254_v14, %v2132_v54  ;;  %v1943_v16 = vadd.f32 %v1902_v60, %v1732_v10  ;;  %v1547_v14 = vadd.f32 %v4259_v49, %v4212_v57  ;;  %v2279_v49 = vpop.permute.xlu1 %2278 }
 0x1cb   : > { %v3127_v37 = vpop.f32.mrf.mxu1  ;;  %v3171_v61 = vpop.f32.mrf.mxu0  ;;  %v1736_v60 = vadd.f32 %v4257_v36, %v1546_v43  ;;  %v1548_v57 = vadd.f32 %v4263_v4, %v4221_v26 }
 0x1cc   : > { %v2318_v30 = vadd.f32 %v2317_v3, %v2305_v1  ;;  %v2338_v40 = vmul.f32 %v2305_v1, %v2305_v1  ;;  %v2133_v53 = vadd.f32 %v2092_v9, %v1943_v16  ;;  %v2274_v9 = vpop.permute.xlu0 %2273  ;;  %v1737_v5 = vadd.f32 %v4261_v11, %v1547_v14 }
 0x1cd   : > { %v1907_v48 = vpop.f32.mrf.mxu1  ;;  %v2097_v35 = vpop.f32.mrf.mxu0 }
 0x1ce   : > { %v2351_v39 = vadd.f32 %v2350_v24, %v2338_v40  ;;  %v2629_v13 = vpack.c.bf16 %v2133_v53, %v2132_v54  ;;  %v2306_v46 = vmul.f32 %v2259_v56, %v2133_v53  ;;  %v1944_v51 = vadd.f32 %v1907_v48, %v1733_v12  ;;  %v2289_v20 = vpop.permute.xlu1 %2288 }
 0x1cf   : > { %v3130_v44 = vpop.f32.mrf.mxu1  ;;  %v3174_v6 = vpop.f32.mrf.mxu0 }
 0x1d0   : > { %2652 = vst [vmem:[%s4284_s16 + $0x10] sm:$0xff] %v2629_v13   ;;  %v2319_v21 = vadd.f32 %v2318_v30, %v2306_v46  ;;  %v2339_v19 = vmul.f32 %v2306_v46, %v2306_v46  ;;  %v2134_v42 = vadd.f32 %v2097_v35, %v1944_v51  ;;  %v1738_v6 = vadd.f32 %v4265_v7, %v1548_v57 }
 0x1d1   : > { %v1910_v27 = vpop.f32.mrf.mxu1  ;;  %v2100_v8 = vpop.f32.mrf.mxu0 }
 0x1d2   : > { %v2352_v29 = vadd.f32 %v2351_v39, %v2339_v19  ;;  %v2307_v0 = vmul.f32 %v2264_v52, %v2134_v42  ;;  %v1945_v45 = vadd.f32 %v1910_v27, %v1734_v28  ;;  %v2284_v28 = vpop.permute.xlu0 %2283 }
 0x1d3   : > { %v3131_v59 = vpop.f32.mrf.mxu1  ;;  %v3175_v32 = vpop.f32.mrf.mxu0 }
 0x1d4   : > { %v2320_v55 = vadd.f32 %v2319_v21, %v2307_v0  ;;  %v2340_v22 = vmul.f32 %v2307_v0, %v2307_v0  ;;  %v2135_v2 = vadd.f32 %v2100_v8, %v1945_v45 }
 0x1d5   : > { %v1915_v63 = vpop.f32.mrf.mxu1  ;;  %v2105_v62 = vpop.f32.mrf.mxu0 }
 0x1d6   : > { %v2353_v50 = vadd.f32 %v2352_v29, %v2340_v22  ;;  %v2634_v10 = vpack.c.bf16 %v2135_v2, %v2134_v42  ;;  %v2308_v3 = vmul.f32 %v2269_v33, %v2135_v2  ;;  %v1946_v23 = vadd.f32 %v1915_v63, %v1735_v15 }
 0x1d7   : > { %v3134_v38 = vpop.f32.mrf.mxu1  ;;  %v3178_v54 = vpop.f32.mrf.mxu0  ;;  %v1739_v29 = vadd.f32 %v4269_v17, %v1549_v58  ;;  %v1740_v17 = vadd.f32 %v4274_v25, %v1550_v18 }
 0x1d8   : > { %2653 = vst [vmem:[%s4284_s16 + $0x18] sm:$0xff] %v2634_v10   ;;  %v2321_v31 = vadd.f32 %v2320_v55, %v2308_v3  ;;  %v2341_v34 = vmul.f32 %v2308_v3, %v2308_v3  ;;  %v2136_v24 = vadd.f32 %v2105_v62, %v1946_v23 }
 0x1d9   : > { %v1918_v1 = vpop.f32.mrf.mxu1  ;;  %v2108_v16 = vpop.f32.mrf.mxu0 }
 0x1da   : > { %v2354_v12 = vadd.f32 %v2353_v50, %v2341_v34  ;;  %v2309_v37 = vmul.f32 %v2274_v9, %v2136_v24  ;;  %v1947_v61 = vadd.f32 %v1918_v1, %v1736_v60  ;;  %v2294_v50 = vpop.permute.xlu0 %2293  ;;  %v2299_v1 = vpop.permute.xlu1 %2298 }
 0x1db   : > { %v3135_v30 = vpop.f32.mrf.mxu1  ;;  %v3179_v40 = vpop.f32.mrf.mxu0 }
 0x1dc   : > { %v2322_v36 = vadd.f32 %v2321_v31, %v2309_v37  ;;  %v2342_v56 = vmul.f32 %v2309_v37, %v2309_v37  ;;  %v2137_v53 = vadd.f32 %v2108_v16, %v1947_v61 }
 0x1dd   : > { %v1923_v48 = vpop.f32.mrf.mxu1  ;;  %v2113_v35 = vpop.f32.mrf.mxu0 }
 0x1de   : > { %v2355_v39 = vadd.f32 %v2354_v12, %v2342_v56  ;;  %v2639_v13 = vpack.c.bf16 %v2137_v53, %v2136_v24  ;;  %v2310_v46 = vmul.f32 %v2279_v49, %v2137_v53  ;;  %v1948_v51 = vadd.f32 %v1923_v48, %v1737_v5 }
 0x1df   : > { %v3138_v11 = vpop.f32.mrf.mxu1  ;;  %v3182_v44 = vpop.f32.mrf.mxu0 }
 0x1e0   : > { %2654 = vst [vmem:[%s4284_s16 + $0x20] sm:$0xff] %v2639_v13   ;;  %v2323_v26 = vadd.f32 %v2322_v36, %v2310_v46  ;;  %v2343_v4 = vmul.f32 %v2310_v46, %v2310_v46  ;;  %v2138_v52 = vadd.f32 %v2113_v35, %v1948_v51  ;;  %v2369_v51 = vld [vmem:[%s4219_s13] sm:$0x3] }
 0x1e1   : > { %v1926_v21 = vpop.f32.mrf.mxu1  ;;  %v2116_v19 = vpop.f32.mrf.mxu0 }
 0x1e2   : > { %v2356_v42 = vadd.f32 %v2355_v39, %v2343_v4  ;;  %v2311_v27 = vmul.f32 %v2284_v28, %v2138_v52  ;;  %v1949_v8 = vadd.f32 %v1926_v21, %v1738_v6 }
 0x1e3   : > { %v3139_v0 = vpop.f32.mrf.mxu1  ;;  %v3183_v45 = vpop.f32.mrf.mxu0 }
 0x1e4   : > { %v2324_v7 = vadd.f32 %v2323_v26, %v2311_v27  ;;  %v2344_v15 = vmul.f32 %v2311_v27, %v2311_v27  ;;  %v2139_v59 = vadd.f32 %v2116_v19, %v1949_v8 }
 0x1e5   : > { %v1931_v32 = vpop.f32.mrf.mxu1  ;;  %v2121_v43 = vpop.f32.mrf.mxu0 }
 0x1e6   : > { %v2357_v33 = vadd.f32 %v2356_v42, %v2344_v15  ;;  %v2644_v55 = vpack.c.bf16 %v2139_v59, %v2138_v52  ;;  %v2312_v22 = vmul.f32 %v2289_v20, %v2139_v59  ;;  %v1950_v2 = vadd.f32 %v1931_v32, %v1739_v29 }
 0x1e7   : > { %v3142_v63 = vpop.f32.mrf.mxu1  ;;  %v3186_v62 = vpop.f32.mrf.mxu0 }
 0x1e8   : > { %2655 = vst [vmem:[%s4284_s16 + $0x28] sm:$0xff] %v2644_v55   ;;  %v2325_v10 = vadd.f32 %v2324_v7, %v2312_v22  ;;  %v2345_v3 = vmul.f32 %v2312_v22, %v2312_v22  ;;  %v2140_v47 = vadd.f32 %v2121_v43, %v1950_v2 }
 0x1e9   : > { %v1934_v41 = vpop.f32.mrf.mxu1  ;;  %v2124_v23 = vpop.f32.mrf.mxu0 }
 0x1ea   : > { %v2358_v14 = vadd.f32 %v2357_v33, %v2345_v3  ;;  %v2313_v38 = vmul.f32 %v2294_v50, %v2140_v47  ;;  %v1951_v54 = vadd.f32 %v1934_v41, %v1740_v17 }
 0x1eb   : > { %v3143_v60 = vpop.f32.mrf.mxu1  ;;  %v3187_v9 = vpop.f32.mrf.mxu0 }
 0x1ec   : > { %v2326_v31 = vadd.f32 %v2325_v10, %v2313_v38  ;;  %v2346_v34 = vmul.f32 %v2313_v38, %v2313_v38  ;;  %v2141_v24 = vadd.f32 %v2124_v23, %v1951_v54 }
 0x1ee   : > { %v2359_v16 = vadd.f32 %v2358_v14, %v2346_v34  ;;  %v2649_v12 = vpack.c.bf16 %v2141_v24, %v2140_v47  ;;  %v2314_v25 = vmul.f32 %v2299_v1, %v2141_v24 }
 0x1f0   : > { %2656 = vst [vmem:[%s4284_s16 + $0x30] sm:$0xff] %v2649_v12   ;;  %v2327_v37 = vadd.f32 %v2326_v31, %v2314_v25  ;;  %v2347_v61 = vmul.f32 %v2314_v25, %v2314_v25 }
 0x1f2   : > { %v2328_v5 = vrot.slane %v2327_v37, 4  ;;  %v2360_v30 = vadd.f32 %v2359_v16, %v2347_v61 }
 0x1f4   : > { %v2329_v40 = vadd.f32 %v2328_v5, %v2327_v37  ;;  %v2361_v57 = vrot.slane %v2360_v30, 4 }
 0x1f6   : > { %v2330_v49 = vrot.slane %v2329_v40, 2  ;;  %v2362_v36 = vadd.f32 %v2361_v57, %v2360_v30 }
 0x1f8   : > { %v2331_v56 = vadd.f32 %v2330_v49, %v2329_v40  ;;  %v2363_v53 = vrot.slane %v2362_v36, 2 }
 0x1fa   : > { %v2332_v48 = vrot.slane %v2331_v56, 1  ;;  %v2364_v35 = vadd.f32 %v2363_v53, %v2362_v36 }
 0x1fc   : > { %v2365_v39 = vrot.slane %v2364_v35, 1  ;;  %v2333_v13 = vadd.f32 %v2332_v48, %v2331_v56 }
 0x1fe   : > { %v2366_v46 = vadd.f32 %v2365_v39, %v2364_v35 }
 0x200   : > { %v2368_v58 = vsel %vm2367_vm9, %v2333_v13, %v2366_v46 }
 0x201   : > { %v2370_v11 = vadd.f32 %v2369_v51, %v2368_v58 }
 0x203   : > { %2371 = vst [vmem:[%s4219_s13] sm:$0x3] %v2370_v11 }
 0x204 PF: > { %s16_s20 = sadd.s32 1, %s3343_s20   ;;  %s4341_s18 = smov %s3339_s19 }
 0x205   : > { %p13_p8 = scmp.ge.s32.totalorder %s16_s20, 4   ;;  %s4342_s19 = smov %s4344_s21 }
 0x207   :  { %15 = sbr.rel (!%p13_p8) target bundleno = 2 (0x2), region = 88 }

// kernel: _lambda_.7
= control target key start
LH: loop header
LB: loop body
LE: loop exit
PB: predicated region body
PF: predicated region fallthrough
CT: control target
= control target key end

     0   :  { %s447_s12 = smov 0   ;;  %s477_s0 = inlined_call_operand.vmem [shape: bf16[128,128], index: 0, kind: input, shape index: {}]   ;;  %s478_s1 = inlined_call_operand.vmem [shape: f32[1,128], index: 1, kind: input, shape index: {}]   ;;  %s479_s2 = inlined_call_operand.vmem [shape: f32[1,128], index: 2, kind: input, shape index: {}]   ;;  %s480_s3 = inlined_call_operand.vmem [shape: bf16[128,128], index: 3, kind: output, shape index: {}]  }
   0x1 LB: > { %s340_s13 = sadd.s32 4294967295, %s425_s12   ;;  %p344_p0 = scmp.ge.s32.totalorder %s425_s12, 1  ;;  %s425_s12 = sphi %s447_s12, %s13_s12  }
   0x2   : > { %p138_p1 = scmp.lt.s32.totalorder %s425_s12, 3 }
   0x4   : > { %p139_p2 = pnand %p344_p0, %p138_p1 }
   0x5   : > { %s345_s14 = sshll.u32 (!%p139_p2), %s340_s13, 3 }
   0x6   : > { %142 = sbr.rel (%p139_p2) target bundleno = 32 (0x20), region = 32  ;;  %p163_p3 = scmp.lt.s32.totalorder (!%p139_p2), %s345_s14, 15 }
   0xb   : > { %s482_s14 = smov (!%p163_p3, %s345_s14), 15  ;;  %v349_v0 = vld [vmem:[%s478_s1] ss:$0 sm:$0xff] }
   0xc   : > { %s346_s15 = sshll.u32 %s482_s14, 2  ;;  %v350_v13 = vld [vmem:[%s479_s2] ss:$0 sm:$0xff] }
   0xd   : > { %s166_s18 = scalar_lea.vmem %s477_s0, %s346_s15  ;;  %s172_s25 = scalar_lea.vmem %s480_s3, %s346_s15 }
   0xe   : > { %v370_v1 = vld [vmem:[%s166_s18] sm:$0xff]   ;;  %v405_v2 = vld [vmem:[%s166_s18 + $0x8] sm:$0xff]   ;;  %v406_v3 = vld [vmem:[%s166_s18 + $0x10] sm:$0xff]  }
   0xf   : > { %v371_v4 = vunpack.c.l.bf16 %v370_v1  ;;  %v372_v5 = vunpack.c.h.bf16 %v370_v1  ;;  %v375_v6 = vunpack.c.l.bf16 %v405_v2  ;;  %v376_v7 = vunpack.c.h.bf16 %v405_v2  ;;  %v407_v8 = vld [vmem:[%s166_s18 + $0x18] sm:$0xff]  }
  0x10   : > { %v379_v9 = vunpack.c.l.bf16 %v406_v3  ;;  %v380_v10 = vunpack.c.h.bf16 %v406_v3  ;;  %v383_v11 = vunpack.c.l.bf16 %v407_v8  ;;  %v384_v12 = vunpack.c.h.bf16 %v407_v8 }
  0x11   : > { %v197_v14 = vmul.f32 %v371_v4, %v349_v0  ;;  %v198_v15 = vmul.f32 %v372_v5, %v349_v0  ;;  %v199_v16 = vmul.f32 %v375_v6, %v349_v0  ;;  %v200_v17 = vmul.f32 %v376_v7, %v349_v0 }
  0x12   : > { %v201_v18 = vmul.f32 %v379_v9, %v349_v0  ;;  %v202_v19 = vmul.f32 %v380_v10, %v349_v0  ;;  %v203_v20 = vmul.f32 %v383_v11, %v349_v0  ;;  %v204_v21 = vmul.f32 %v384_v12, %v349_v0 }
  0x13   : > { %v212_v22 = vadd.f32 %v350_v13, %v197_v14  ;;  %v213_v23 = vadd.f32 %v350_v13, %v198_v15  ;;  %v214_v24 = vadd.f32 %v350_v13, %v199_v16  ;;  %v215_v25 = vadd.f32 %v350_v13, %v200_v17 }
  0x14   : > { %v216_v26 = vadd.f32 %v350_v13, %v201_v18  ;;  %v217_v27 = vadd.f32 %v350_v13, %v202_v19  ;;  %v218_v28 = vadd.f32 %v350_v13, %v203_v20  ;;  %v219_v29 = vadd.f32 %v350_v13, %v204_v21 }
  0x15   : > { %vm220_vm0 = vcmp.ge.f32.partialorder %v212_v22, 0.0  ;;  %vm221_vm1 = vcmp.ge.f32.partialorder %v213_v23, 0.0  ;;  %v228_v30 = vmul.f32 0.2, %v212_v22  ;;  %v229_v31 = vmul.f32 0.2, %v213_v23 }
  0x16   : > { %vm222_vm2 = vcmp.ge.f32.partialorder %v214_v24, 0.0  ;;  %vm223_vm3 = vcmp.ge.f32.partialorder %v215_v25, 0.0  ;;  %v230_v32 = vmul.f32 0.2, %v214_v24  ;;  %v231_v33 = vmul.f32 0.2, %v215_v25 }
  0x17   : > { %v236_v34 = vsel %vm220_vm0, %v212_v22, %v228_v30  ;;  %v237_v35 = vsel %vm221_vm1, %v213_v23, %v229_v31  ;;  %vm224_vm4 = vcmp.ge.f32.partialorder %v216_v26, 0.0  ;;  %vm225_vm5 = vcmp.ge.f32.partialorder %v217_v27, 0.0 }
  0x18   : > { %v388_v36 = vpack.c.bf16 %v237_v35, %v236_v34  ;;  %v238_v37 = vsel %vm222_vm2, %v214_v24, %v230_v32  ;;  %v239_v38 = vsel %vm223_vm3, %v215_v25, %v231_v33  ;;  %v232_v39 = vmul.f32 0.2, %v216_v26 }
  0x19   : > { %v393_v40 = vpack.c.bf16 %v239_v38, %v238_v37  ;;  %v233_v41 = vmul.f32 0.2, %v217_v27  ;;  %vm226_vm6 = vcmp.ge.f32.partialorder %v218_v28, 0.0  ;;  %vm227_vm7 = vcmp.ge.f32.partialorder %v219_v29, 0.0 }
  0x1a   : > { %389 = vst [vmem:[%s172_s25] sm:$0xff] %v388_v36   ;;  %v240_v42 = vsel %vm224_vm4, %v216_v26, %v232_v39  ;;  %v234_v43 = vmul.f32 0.2, %v218_v28  ;;  %v235_v44 = vmul.f32 0.2, %v219_v29 }
  0x1b   : > { %408 = vst [vmem:[%s172_s25 + $0x8] sm:$0xff] %v393_v40   ;;  %v241_v45 = vsel %vm225_vm5, %v217_v27, %v233_v41 }
  0x1c   : > { %v398_v46 = vpack.c.bf16 %v241_v45, %v240_v42  ;;  %v242_v47 = vsel %vm226_vm6, %v218_v28, %v234_v43  ;;  %v243_v48 = vsel %vm227_vm7, %v219_v29, %v235_v44 }
  0x1d   : > { %v403_v49 = vpack.c.bf16 %v243_v48, %v242_v47 }
  0x1e   : > { %409 = vst [vmem:[%s172_s25 + $0x10] sm:$0xff] %v398_v46  }
  0x1f   : > { %410 = vst [vmem:[%s172_s25 + $0x18] sm:$0xff] %v403_v49  }
  0x20 PF: > { %s13_s12 = sadd.s32 1, %s425_s12  }
  0x21   : > { %p10_p4 = scmp.ge.s32.totalorder %s13_s12, 4  }
  0x23   :  { %12 = sbr.rel (!%p10_p4) target bundleno = 1 (0x1), region = 62 }

// kernel: _lambda_.6
= control target key start
LH: loop header
LB: loop body
LE: loop exit
PB: predicated region body
PF: predicated region fallthrough
CT: control target
= control target key end

     0   :  { %s751_s12 = smov 0   ;;  %s753_s13 = smov 0   ;;  %s834_s0 = inlined_call_operand.vmem [shape: bf16[128,128], index: 0, kind: input, shape index: {}]   ;;  %s835_s1 = inlined_call_operand.vmem [shape: bf16[128,128], index: 1, kind: input, shape index: {}]   ;;  %s836_s2 = inlined_call_operand.vmem [shape: bf16[128,128], index: 2, kind: output, shape index: {0}]   ;;  %s837_s3 = inlined_call_operand.vmem [shape: f32[16,128], index: 3, kind: output, shape index: {1}]  }
   0x1   :  { %s755_s14 = smov 0  }
   0x2 LB: > { %s26_s15 = sadd.s32 1, %s724_s13  ;;  %p558_p0 = scmp.ge.s32.totalorder %s728_s14, 1  ;;  %s728_s14 = sphi %s755_s14, %s14_s14   ;;  %s724_s13 = sphi %s753_s13, %s839_s13   ;;  %s720_s12 = sphi %s751_s12, %s838_s12  }
   0x3   : > { %p28_p1 = scmp.ge.s32.totalorder %s26_s15, 2  ;;  %p159_p2 = scmp.lt.s32.totalorder %s728_s14, 3 }
   0x5   : > { %s841_s15 = smov (%p28_p1, %s26_s15), 0  ;;  %p160_p3 = pnand %p558_p0, %p159_p2 }
   0x6   : > { %s559_s18 = sshll.u32 (!%p160_p3), %s720_s12, 3  ;;  %p205_p5 = scmp.lt.s32.totalorder (!%p160_p3), %s720_s12, 1 }
   0x7   : > { %163 = sbr.rel (%p160_p3) target bundleno = 276 (0x114), region = 28  ;;  %p191_p4 = scmp.lt.s32.totalorder (!%p160_p3), %s559_s18, 15 }
   0xc   : > { %v694_v0 = vld [vmem:[%s835_s1 + $0x38] sm:$0xff]   ;;  %v695_v1 = vld [vmem:[%s835_s1 + $0x30] sm:$0xff]   ;;  %s843_s18 = smov (!%p191_p4, %s559_s18), 15  ;;  %v696_v2 = vld [vmem:[%s835_s1 + $0x28] sm:$0xff]   ;;  %s845_s12 = smov (!%p205_p5, %s720_s12), 1  ;;  %v730_v12 = vmov 0.0  }
   0xd   : > { %629 = vmatprep.subr.bf16.mxu0 %v694_v0  ;;  %653 = vmatprep.subr.bf16.mxu1 %v694_v0  ;;  %s560_s23 = sshll.u32 %s843_s18, 2  ;;  %v697_v3 = vld [vmem:[%s835_s1 + $0x20] sm:$0xff]   ;;  %v698_v6 = vld [vmem:[%s835_s1 + $0x18] sm:$0xff]   ;;  %v699_v7 = vld [vmem:[%s835_s1 + $0x10] sm:$0xff]   ;;  %s563_s10 = sshll.u32 %s845_s12, 3  ;;  %vm450_vm0 = vcmask 1040384  }
   0xe   : > { %630 = vmatpush3.bf16.msra.mxu0 %v694_v0  ;;  %661 = vmatpush3.bf16.msra.mxu1 %v694_v0  ;;  %s789_s26 = scalar_lea.vmem %s834_s0, %s560_s23  ;;  %v700_v8 = vld [vmem:[%s835_s1 + $0x8] sm:$0xff]   ;;  %v701_v9 = vld [vmem:[%s835_s1] sm:$0xff]   ;;  %s815_s17 = scalar_lea.vmem %s837_s3, %s563_s10 }
   0xf   : > { %631 = vmatprep.subr.bf16.mxu0 %v695_v1  ;;  %654 = vmatprep.subr.bf16.mxu1 %v695_v1  ;;  %v702_v4 = vld [vmem:[%s789_s26] sm:$0xff]   ;;  %v704_v5 = vld [vmem:[%s789_s26 + $0x10] sm:$0xff]   ;;  %v703_v10 = vld [vmem:[%s789_s26 + $0x8] sm:$0xff]   ;;  %415 = vst [vmem:[%s815_s17] sm:$0xff] %v730_v12  ;;  %s202_s21 = scalar_lea.vmem %s836_s2, %s560_s23 }
  0x10   : > { %645 = vmatprep.mubr.bf16.mxu0 %v702_v4  ;;  %649 = vmatprep.mubr.bf16.mxu1 %v704_v5  ;;  %v705_v11 = vld [vmem:[%s789_s26 + $0x18] sm:$0xff]  }
  0x12   : > { %632 = vmatpush3.bf16.msra.mxu0 %v695_v1  ;;  %662 = vmatpush3.bf16.msra.mxu1 %v695_v1 }
  0x13   : > { %633 = vmatprep.subr.bf16.mxu0 %v696_v2  ;;  %655 = vmatprep.subr.bf16.mxu1 %v696_v2 }
  0x16   : > { %634 = vmatpush3.bf16.msra.mxu0 %v696_v2  ;;  %663 = vmatpush3.bf16.msra.mxu1 %v696_v2  ;;  %v452_v59 = vld [vmem:[%s815_s17] sm:$0x3] }
  0x17   : > { %635 = vmatprep.subr.bf16.mxu0 %v697_v3  ;;  %656 = vmatprep.subr.bf16.mxu1 %v697_v3 }
  0x1a   : > { %636 = vmatpush3.bf16.msra.mxu0 %v697_v3  ;;  %664 = vmatpush3.bf16.msra.mxu1 %v697_v3 }
  0x1b   : > { %637 = vmatprep.subr.bf16.mxu0 %v698_v6  ;;  %657 = vmatprep.subr.bf16.mxu1 %v698_v6 }
  0x1e   : > { %638 = vmatpush3.bf16.msra.mxu0 %v698_v6  ;;  %665 = vmatpush3.bf16.msra.mxu1 %v698_v6 }
  0x1f   : > { %639 = vmatprep.subr.bf16.mxu0 %v699_v7  ;;  %658 = vmatprep.subr.bf16.mxu1 %v699_v7 }
  0x22   : > { %640 = vmatpush3.bf16.msra.mxu0 %v699_v7  ;;  %666 = vmatpush3.bf16.msra.mxu1 %v699_v7 }
  0x23   : > { %641 = vmatprep.subr.bf16.mxu0 %v700_v8  ;;  %659 = vmatprep.subr.bf16.mxu1 %v700_v8 }
  0x26   : > { %642 = vmatpush3.bf16.msra.mxu0 %v700_v8  ;;  %667 = vmatpush3.bf16.msra.mxu1 %v700_v8 }
  0x27   : > { %643 = vmatprep.subr.bf16.mxu0 %v701_v9  ;;  %660 = vmatprep.subr.bf16.mxu1 %v701_v9 }
  0x2a   : > { %644 = vmatpush3.bf16.msra.mxu0 %v701_v9  ;;  %668 = vmatpush3.bf16.msra.mxu1 %v701_v9 }
  0x2d   : > { %646 = vmatmul.mubr.bf16.vlgmr.msra.gmra.mxu0 %v703_v10  ;;  %650 = vmatmul.mubr.bf16.vlgmr.msra.gmra.mxu1 %v705_v11 }
  0xed   : > { %v647_v13 = vpop.f32.mrf.mxu0  ;;  %v651_v14 = vpop.f32.mrf.mxu1 }
  0xee   : > { %v431_v28 = vmul.f32 %v647_v13, %v647_v13  ;;  %v435_v40 = vmul.f32 %v651_v14, %v651_v14 }
  0xef   : > { %v340_v15 = vpop.f32.mrf.mxu0  ;;  %v356_v16 = vpop.f32.mrf.mxu1 }
  0xf0   : > { %v429_v21 = vmul.f32 %v340_v15, %v340_v15  ;;  %v433_v34 = vmul.f32 %v356_v16, %v356_v16 }
  0xf1   : > { %v648_v17 = vpop.f32.mrf.mxu0  ;;  %v652_v18 = vpop.f32.mrf.mxu1 }
  0xf2   : > { %v602_v19 = vpack.c.bf16 %v648_v17, %v647_v13  ;;  %v612_v20 = vpack.c.bf16 %v652_v18, %v651_v14  ;;  %v432_v31 = vmul.f32 %v648_v17, %v648_v17  ;;  %v436_v43 = vmul.f32 %v652_v18, %v652_v18 }
  0xf3   : > { %v343_v22 = vpop.f32.mrf.mxu0  ;;  %v359_v23 = vpop.f32.mrf.mxu1 }
  0xf4   : > { %614 = vst [vmem:[%s202_s21 + $0x8] sm:$0xff] %v602_v19   ;;  %v597_v24 = vpack.c.bf16 %v343_v22, %v340_v15  ;;  %v416_v25 = vadd.f32 %v343_v22, %v340_v15  ;;  %v430_v26 = vmul.f32 %v343_v22, %v343_v22  ;;  %616 = vst [vmem:[%s202_s21 + $0x18] sm:$0xff] %v612_v20  }
  0xf5   : > { %v607_v27 = vpack.c.bf16 %v359_v23, %v356_v16  ;;  %v434_v38 = vmul.f32 %v359_v23, %v359_v23 }
  0xf6   : > { %598 = vst [vmem:[%s202_s21] sm:$0xff] %v597_v24   ;;  %v417_v29 = vadd.f32 %v647_v13, %v416_v25  ;;  %v437_v30 = vadd.f32 %v430_v26, %v429_v21 }
  0xf7   : > { %615 = vst [vmem:[%s202_s21 + $0x10] sm:$0xff] %v607_v27  }
  0xf8   : > { %v438_v32 = vadd.f32 %v437_v30, %v431_v28  ;;  %v418_v33 = vadd.f32 %v648_v17, %v417_v29 }
  0xfa   : > { %v419_v35 = vadd.f32 %v418_v33, %v356_v16  ;;  %v439_v36 = vadd.f32 %v438_v32, %v432_v31 }
  0xfc   : > { %v420_v37 = vadd.f32 %v419_v35, %v359_v23  ;;  %v440_v39 = vadd.f32 %v439_v36, %v433_v34 }
  0xfe   : > { %v421_v41 = vadd.f32 %v651_v14, %v420_v37  ;;  %v441_v42 = vadd.f32 %v440_v39, %v434_v38 }
 0x100   : > { %v422_v44 = vadd.f32 %v652_v18, %v421_v41  ;;  %v442_v45 = vadd.f32 %v441_v42, %v435_v40 }
 0x102   : > { %v423_v46 = vrot.slane %v422_v44, 4  ;;  %v443_v47 = vadd.f32 %v442_v45, %v436_v43 }
 0x104   : > { %v424_v48 = vadd.f32 %v423_v46, %v422_v44  ;;  %v444_v49 = vrot.slane %v443_v47, 4 }
 0x106   : > { %v425_v50 = vrot.slane %v424_v48, 2  ;;  %v445_v51 = vadd.f32 %v444_v49, %v443_v47 }
 0x108   : > { %v426_v52 = vadd.f32 %v425_v50, %v424_v48  ;;  %v446_v53 = vrot.slane %v445_v51, 2 }
 0x10a   : > { %v427_v54 = vrot.slane %v426_v52, 1  ;;  %v447_v55 = vadd.f32 %v446_v53, %v445_v51 }
 0x10c   : > { %v448_v56 = vrot.slane %v447_v55, 1  ;;  %v428_v57 = vadd.f32 %v427_v54, %v426_v52 }
 0x10e   : > { %v449_v58 = vadd.f32 %v448_v56, %v447_v55 }
 0x110   : > { %v451_v60 = vsel %vm450_vm0, %v428_v57, %v449_v58 }
 0x111   : > { %v453_v61 = vadd.f32 %v452_v59, %v451_v60 }
 0x113   : > { %454 = vst [vmem:[%s815_s17] sm:$0x3] %v453_v61 }
 0x114 PF: > { %s14_s14 = sadd.s32 1, %s728_s14   ;;  %s838_s12 = smov %s724_s13 }
 0x115   : > { %p11_p6 = scmp.ge.s32.totalorder %s14_s14, 4   ;;  %s839_s13 = smov %s841_s15 }
 0x117   :  { %13 = sbr.rel (!%p11_p6) target bundleno = 2 (0x2), region = 74 }

// kernel: _lambda_.9
= control target key start
LH: loop header
LB: loop body
LE: loop exit
PB: predicated region body
PF: predicated region fallthrough
CT: control target
= control target key end

     0   :  { %s376_s12 = smov 0   ;;  %s413_s0 = inlined_call_operand.vmem [shape: bf16[128,128], index: 0, kind: input, shape index: {}]   ;;  %s414_s1 = inlined_call_operand.vmem [shape: f32[1,128], index: 1, kind: input, shape index: {}]   ;;  %s415_s2 = inlined_call_operand.vmem [shape: f32[1,128], index: 2, kind: input, shape index: {}]   ;;  %s416_s3 = inlined_call_operand.vmem [shape: f32[128,128], index: 3, kind: output, shape index: {}]  }
   0x1 LB: > { %s308_s13 = sadd.s32 4294967295, %s354_s12   ;;  %p312_p0 = scmp.ge.s32.totalorder %s354_s12, 1  ;;  %s354_s12 = sphi %s376_s12, %s13_s12  }
   0x2   : > { %p138_p1 = scmp.lt.s32.totalorder %s354_s12, 3 }
   0x4   : > { %p139_p2 = pnand %p312_p0, %p138_p1 }
   0x5   : > { %s313_s14 = sshll.u32 (!%p139_p2), %s308_s13, 3 }
   0x6   : > { %142 = sbr.rel (%p139_p2) target bundleno = 30 (0x1e), region = 32  ;;  %p163_p3 = scmp.lt.s32.totalorder (!%p139_p2), %s313_s14, 15 }
   0xb   : > { %s418_s14 = smov (!%p163_p3, %s313_s14), 15  ;;  %v317_v0 = vld [vmem:[%s414_s1] ss:$0 sm:$0xff] }
   0xc   : > { %s314_s15 = sshll.u32 %s418_s14, 2  ;;  %v318_v9 = vld [vmem:[%s415_s2] ss:$0 sm:$0xff]  ;;  %s316_s23 = sshll.u32 %s418_s14, 3 }
   0xd   : > { %s166_s18 = scalar_lea.vmem %s413_s0, %s314_s15  ;;  %s400_s26 = scalar_lea.vmem %s416_s3, %s316_s23 }
   0xe   : > { %v322_v1 = vld [vmem:[%s166_s18] sm:$0xff]   ;;  %v337_v2 = vld [vmem:[%s166_s18 + $0x8] sm:$0xff]   ;;  %v338_v3 = vld [vmem:[%s166_s18 + $0x10] sm:$0xff]  }
   0xf   : > { %v323_v4 = vunpack.c.l.bf16 %v322_v1  ;;  %v324_v5 = vunpack.c.h.bf16 %v322_v1  ;;  %v327_v6 = vunpack.c.l.bf16 %v337_v2  ;;  %v328_v7 = vunpack.c.h.bf16 %v337_v2  ;;  %v339_v8 = vld [vmem:[%s166_s18 + $0x18] sm:$0xff]  }
  0x10   : > { %v331_v10 = vunpack.c.l.bf16 %v338_v3  ;;  %v332_v11 = vunpack.c.h.bf16 %v338_v3  ;;  %v335_v12 = vunpack.c.l.bf16 %v339_v8  ;;  %v336_v13 = vunpack.c.h.bf16 %v339_v8 }
  0x11   : > { %v197_v14 = vmul.f32 %v323_v4, %v317_v0  ;;  %v198_v15 = vmul.f32 %v324_v5, %v317_v0  ;;  %v199_v16 = vmul.f32 %v327_v6, %v317_v0  ;;  %v200_v17 = vmul.f32 %v328_v7, %v317_v0 }
  0x12   : > { %v201_v18 = vmul.f32 %v331_v10, %v317_v0  ;;  %v202_v19 = vmul.f32 %v332_v11, %v317_v0  ;;  %v203_v20 = vmul.f32 %v335_v12, %v317_v0  ;;  %v204_v21 = vmul.f32 %v336_v13, %v317_v0 }
  0x13   : > { %v212_v22 = vadd.f32 %v318_v9, %v197_v14  ;;  %v213_v23 = vadd.f32 %v318_v9, %v198_v15  ;;  %v214_v24 = vadd.f32 %v318_v9, %v199_v16  ;;  %v215_v25 = vadd.f32 %v318_v9, %v200_v17 }
  0x14   : > { %v216_v26 = vadd.f32 %v318_v9, %v201_v18  ;;  %v217_v27 = vadd.f32 %v318_v9, %v202_v19  ;;  %v218_v28 = vadd.f32 %v318_v9, %v203_v20  ;;  %v219_v29 = vadd.f32 %v318_v9, %v204_v21 }
  0x15   : > { %vm220_vm0 = vcmp.ge.f32.partialorder %v212_v22, 0.0  ;;  %v228_v30 = vmul.f32 0.2, %v212_v22  ;;  %vm221_vm1 = vcmp.ge.f32.partialorder %v213_v23, 0.0  ;;  %v229_v31 = vmul.f32 0.2, %v213_v23 }
  0x16   : > { %vm222_vm2 = vcmp.ge.f32.partialorder %v214_v24, 0.0  ;;  %v230_v32 = vmul.f32 0.2, %v214_v24  ;;  %vm223_vm3 = vcmp.ge.f32.partialorder %v215_v25, 0.0  ;;  %v231_v33 = vmul.f32 0.2, %v215_v25 }
  0x17   : > { %v236_v34 = vsel %vm220_vm0, %v212_v22, %v228_v30  ;;  %v237_v35 = vsel %vm221_vm1, %v213_v23, %v229_v31  ;;  %vm224_vm4 = vcmp.ge.f32.partialorder %v216_v26, 0.0  ;;  %v232_v36 = vmul.f32 0.2, %v216_v26 }
  0x18   : > { %244 = vst [vmem:[%s400_s26] sm:$0xff] %v236_v34  ;;  %245 = vst [vmem:[%s400_s26 + $0x8] sm:$0xff] %v237_v35  ;;  %v238_v37 = vsel %vm222_vm2, %v214_v24, %v230_v32  ;;  %v239_v38 = vsel %vm223_vm3, %v215_v25, %v231_v33  ;;  %vm225_vm5 = vcmp.ge.f32.partialorder %v217_v27, 0.0  ;;  %v233_v39 = vmul.f32 0.2, %v217_v27 }
  0x19   : > { %246 = vst [vmem:[%s400_s26 + $0x10] sm:$0xff] %v238_v37  ;;  %247 = vst [vmem:[%s400_s26 + $0x18] sm:$0xff] %v239_v38  ;;  %v240_v40 = vsel %vm224_vm4, %v216_v26, %v232_v36  ;;  %vm226_vm6 = vcmp.ge.f32.partialorder %v218_v28, 0.0  ;;  %v234_v41 = vmul.f32 0.2, %v218_v28  ;;  %vm227_vm7 = vcmp.ge.f32.partialorder %v219_v29, 0.0 }
  0x1a   : > { %248 = vst [vmem:[%s400_s26 + $0x20] sm:$0xff] %v240_v40  ;;  %v241_v42 = vsel %vm225_vm5, %v217_v27, %v233_v39  ;;  %v235_v43 = vmul.f32 0.2, %v219_v29 }
  0x1b   : > { %249 = vst [vmem:[%s400_s26 + $0x28] sm:$0xff] %v241_v42  ;;  %v242_v44 = vsel %vm226_vm6, %v218_v28, %v234_v41 }
  0x1c   : > { %250 = vst [vmem:[%s400_s26 + $0x30] sm:$0xff] %v242_v44  ;;  %v243_v45 = vsel %vm227_vm7, %v219_v29, %v235_v43 }
  0x1d   : > { %251 = vst [vmem:[%s400_s26 + $0x38] sm:$0xff] %v243_v45 }
  0x1e PF: > { %s13_s12 = sadd.s32 1, %s354_s12  }
  0x1f   : > { %p10_p4 = scmp.ge.s32.totalorder %s13_s12, 4  }
  0x21   :  { %12 = sbr.rel (!%p10_p4) target bundleno = 1 (0x1), region = 62 }

// kernel: _lambda_.11
= control target key start
LH: loop header
LB: loop body
LE: loop exit
PB: predicated region body
PF: predicated region fallthrough
CT: control target
= control target key end

     0   :  { %s460_s15 = smov 0   ;;  %s512_s0 = inlined_call_operand.vmem [shape: bf16[128,128], index: 0, kind: input, shape index: {}]   ;;  %s513_s1 = inlined_call_operand.vmem [shape: f32[1,128], index: 1, kind: input, shape index: {}]   ;;  %s514_s2 = inlined_call_operand.vmem [shape: f32[1,128], index: 2, kind: input, shape index: {}]   ;;  %s515_s3 = inlined_call_operand.vmem [shape: f32[128,128], index: 3, kind: input, shape index: {}, may-alias: {3,4}]   ;;  %s516_s4 = inlined_call_operand.vmem [shape: f32[128,128], index: 4, kind: output, shape index: {}, may-alias: {3,4}]  }
   0x1 LB: > { %s385_s16 = sadd.s32 4294967295, %s433_s15   ;;  %p389_p0 = scmp.ge.s32.totalorder %s433_s15, 1  ;;  %s433_s15 = sphi %s460_s15, %s14_s15  }
   0x2   : > { %p174_p1 = scmp.lt.s32.totalorder %s433_s15, 3 }
   0x4   : > { %p175_p2 = pnand %p389_p0, %p174_p1 }
   0x5   : > { %s390_s17 = sshll.u32 (!%p175_p2), %s385_s16, 3 }
   0x6   : > { %178 = sbr.rel (%p175_p2) target bundleno = 33 (0x21), region = 36  ;;  %p206_p3 = scmp.lt.s32.totalorder (!%p175_p2), %s390_s17, 15 }
   0xb   : > { %s518_s17 = smov (!%p206_p3, %s390_s17), 15  ;;  %v396_v0 = vld [vmem:[%s513_s1] ss:$0 sm:$0xff] }
   0xc   : > { %s391_s18 = sshll.u32 %s518_s17, 2  ;;  %s393_s24 = sshll.u32 %s518_s17, 3  ;;  %v397_v13 = vld [vmem:[%s514_s2] ss:$0 sm:$0xff] }
   0xd   : > { %s209_s21 = scalar_lea.vmem %s512_s0, %s391_s18  ;;  %s486_s29 = scalar_lea.vmem %s515_s3, %s393_s24 }
   0xe   : > { %v401_v1 = vld [vmem:[%s209_s21] sm:$0xff]   ;;  %v416_v2 = vld [vmem:[%s209_s21 + $0x8] sm:$0xff]   ;;  %v417_v3 = vld [vmem:[%s209_s21 + $0x10] sm:$0xff]   ;;  %s221_s6 = scalar_lea.vmem %s516_s4, %s393_s24 }
   0xf   : > { %v402_v4 = vunpack.c.l.bf16 %v401_v1  ;;  %v403_v5 = vunpack.c.h.bf16 %v401_v1  ;;  %v406_v6 = vunpack.c.l.bf16 %v416_v2  ;;  %v407_v7 = vunpack.c.h.bf16 %v416_v2  ;;  %v418_v8 = vld [vmem:[%s209_s21 + $0x18] sm:$0xff]   ;;  %v293_v30 = vld [vmem:[%s486_s29] sm:$0xff]  ;;  %v294_v31 = vld [vmem:[%s486_s29 + $0x8] sm:$0xff] }
  0x10   : > { %v410_v9 = vunpack.c.l.bf16 %v417_v3  ;;  %v411_v10 = vunpack.c.h.bf16 %v417_v3  ;;  %v414_v11 = vunpack.c.l.bf16 %v418_v8  ;;  %v415_v12 = vunpack.c.h.bf16 %v418_v8  ;;  %v295_v35 = vld [vmem:[%s486_s29 + $0x10] sm:$0xff]  ;;  %v296_v36 = vld [vmem:[%s486_s29 + $0x18] sm:$0xff]  ;;  %v297_v44 = vld [vmem:[%s486_s29 + $0x20] sm:$0xff] }
  0x11   : > { %v246_v14 = vmul.f32 %v402_v4, %v396_v0  ;;  %v247_v15 = vmul.f32 %v403_v5, %v396_v0  ;;  %v248_v16 = vmul.f32 %v406_v6, %v396_v0  ;;  %v249_v17 = vmul.f32 %v407_v7, %v396_v0  ;;  %v298_v45 = vld [vmem:[%s486_s29 + $0x28] sm:$0xff]  ;;  %v299_v50 = vld [vmem:[%s486_s29 + $0x30] sm:$0xff]  ;;  %v300_v51 = vld [vmem:[%s486_s29 + $0x38] sm:$0xff] }
  0x12   : > { %v250_v18 = vmul.f32 %v410_v9, %v396_v0  ;;  %v251_v19 = vmul.f32 %v411_v10, %v396_v0  ;;  %v252_v20 = vmul.f32 %v414_v11, %v396_v0  ;;  %v253_v21 = vmul.f32 %v415_v12, %v396_v0 }
  0x13   : > { %v261_v22 = vadd.f32 %v397_v13, %v246_v14  ;;  %v262_v23 = vadd.f32 %v397_v13, %v247_v15  ;;  %v263_v24 = vadd.f32 %v397_v13, %v248_v16  ;;  %v264_v25 = vadd.f32 %v397_v13, %v249_v17 }
  0x14   : > { %v265_v26 = vadd.f32 %v397_v13, %v250_v18  ;;  %v266_v27 = vadd.f32 %v397_v13, %v251_v19  ;;  %v267_v28 = vadd.f32 %v397_v13, %v252_v20  ;;  %v268_v29 = vadd.f32 %v397_v13, %v253_v21 }
  0x15   : > { %vm269_vm0 = vcmp.ge.f32.partialorder %v261_v22, 0.0  ;;  %vm270_vm1 = vcmp.ge.f32.partialorder %v262_v23, 0.0  ;;  %vm271_vm2 = vcmp.ge.f32.partialorder %v263_v24, 0.0  ;;  %vm272_vm3 = vcmp.ge.f32.partialorder %v264_v25, 0.0 }
  0x16   : > { %vm273_vm4 = vcmp.ge.f32.partialorder %v265_v26, 0.0  ;;  %vm274_vm5 = vcmp.ge.f32.partialorder %v266_v27, 0.0  ;;  %vm275_vm6 = vcmp.ge.f32.partialorder %v267_v28, 0.0  ;;  %vm276_vm7 = vcmp.ge.f32.partialorder %v268_v29, 0.0 }
  0x17   : > { %v277_v32 = vmul.f32 0.2, %v261_v22  ;;  %v278_v33 = vmul.f32 0.2, %v262_v23  ;;  %v279_v34 = vmul.f32 0.2, %v263_v24 }
  0x18   : > { %v280_v37 = vmul.f32 0.2, %v264_v25  ;;  %v281_v38 = vmul.f32 0.2, %v265_v26  ;;  %v282_v39 = vmul.f32 0.2, %v266_v27 }
  0x19   : > { %v283_v40 = vmul.f32 0.2, %v267_v28  ;;  %v284_v41 = vmul.f32 0.2, %v268_v29  ;;  %v285_v42 = vsel %vm269_vm0, %v261_v22, %v277_v32  ;;  %v286_v43 = vsel %vm270_vm1, %v262_v23, %v278_v33 }
  0x1a   : > { %v287_v46 = vsel %vm271_vm2, %v263_v24, %v279_v34  ;;  %v288_v47 = vsel %vm272_vm3, %v264_v25, %v280_v37  ;;  %v289_v48 = vsel %vm273_vm4, %v265_v26, %v281_v38  ;;  %v290_v49 = vsel %vm274_vm5, %v266_v27, %v282_v39 }
  0x1b   : > { %v291_v52 = vsel %vm275_vm6, %v267_v28, %v283_v40  ;;  %v292_v53 = vsel %vm276_vm7, %v268_v29, %v284_v41  ;;  %v301_v54 = vadd.f32 %v293_v30, %v285_v42  ;;  %v302_v55 = vadd.f32 %v294_v31, %v286_v43 }
  0x1c   : > { %v303_v56 = vadd.f32 %v295_v35, %v287_v46  ;;  %v304_v57 = vadd.f32 %v296_v36, %v288_v47  ;;  %v305_v58 = vadd.f32 %v297_v44, %v289_v48  ;;  %v306_v59 = vadd.f32 %v298_v45, %v290_v49 }
  0x1d   : > { %v307_v60 = vadd.f32 %v299_v50, %v291_v52  ;;  %v308_v61 = vadd.f32 %v300_v51, %v292_v53  ;;  %309 = vst [vmem:[%s221_s6] sm:$0xff] %v301_v54  ;;  %310 = vst [vmem:[%s221_s6 + $0x8] sm:$0xff] %v302_v55 }
  0x1e   : > { %311 = vst [vmem:[%s221_s6 + $0x10] sm:$0xff] %v303_v56  ;;  %312 = vst [vmem:[%s221_s6 + $0x18] sm:$0xff] %v304_v57 }
  0x1f   : > { %313 = vst [vmem:[%s221_s6 + $0x20] sm:$0xff] %v305_v58  ;;  %314 = vst [vmem:[%s221_s6 + $0x28] sm:$0xff] %v306_v59 }
  0x20   : > { %315 = vst [vmem:[%s221_s6 + $0x30] sm:$0xff] %v307_v60  ;;  %316 = vst [vmem:[%s221_s6 + $0x38] sm:$0xff] %v308_v61 }
  0x21 PF: > { %s14_s15 = sadd.s32 1, %s433_s15  }
  0x22   : > { %p11_p4 = scmp.ge.s32.totalorder %s14_s15, 4  }
  0x24   :  { %13 = sbr.rel (!%p11_p4) target bundleno = 1 (0x1), region = 69 }

</bundles_post_ra>
